<compile_context>
chip_gen: v7x
topology: tpu7x:2x2x1
jax: 0.10.0
libtpu: 0.0.40
codegen_flags: <defaults>
</compile_context>

<pallas_src>
import functools

import jax
import jax.numpy as jnp
from jax.experimental import pallas as pl
from jax.experimental.pallas import tpu as pltpu


def _conv_block_kernel(x_ref, w_ref, b_ref, o_ref, acc_ref, hpool_ref, *,
                       H, W, Cin, Cout, KH, KW, pool, eps):
    """Per-batch kernel.

    x_ref     : (H + KH - 1, W + KW - 1, Cin)  zero-padded NHWC input (VMEM)
    w_ref     : (KH * KW * Cin, Cout)          conv weights, row = (kh*KW + kw)*Cin + ci
    b_ref     : (1, Cout)                      conv bias
    o_ref     : (H // pool, W // pool, Cout)   pooled output
    acc_ref   : (H * W, Cout) f32              conv accumulator scratch
    hpool_ref : (H // pool, W, Cout) f32       H-pooled activations scratch
    """
    HW = H * W

    # ---- Conv2d (stride 1, padding applied in the wrapper): per-tap MXU matmuls ----
    acc_ref[...] = jnp.zeros_like(acc_ref)
    for kh in range(KH):
        for kw in range(KW):
            x_win = x_ref[kh:kh + H, kw:kw + W, :]            # (H, W, Cin)
            # Collapse leading dims only (lane dim Cin unchanged, W % 8 == 0).
            x2d = x_win.reshape(HW, Cin)                      # (H*W, Cin)
            r0 = (kh * KW + kw) * Cin
            w_tap = w_ref[r0:r0 + Cin, :]                     # (Cin, Cout)
            acc_ref[...] += jnp.dot(x2d, w_tap,
                                    preferred_element_type=jnp.float32)

    a = acc_ref[...] + b_ref[...]                             # (H*W, Cout), single load

    # ---- InstanceNorm2d (affine=False, biased variance, eps) + ReLU ----
    inv_hw = 1.0 / float(HW)
    mean = jnp.sum(a, axis=0, keepdims=True) * inv_hw         # (1, Cout)
    d = a - mean
    var = jnp.sum(d * d, axis=0, keepdims=True) * inv_hw      # (1, Cout)
    y = jnp.maximum(d * jax.lax.rsqrt(var + eps), 0.0)        # (H*W, Cout)

    # ---- MaxPool2d(pool), H direction: in-register via safe reshape + aligned slices ----
    Hp, Wp = H // pool, W // pool
    y_r = y.reshape(Hp, pool * W, Cout)       # split of leading dim only; minor dim unchanged
    hmax = y_r[:, 0:W, :]
    for p in range(1, pool):
        hmax = jnp.maximum(hmax, y_r[:, p * W:(p + 1) * W, :])
    hpool_ref[...] = hmax                                     # (Hp, W, Cout)

    # ---- MaxPool2d(pool), W direction: strided VMEM reads of the small scratch ----
    pooled = hpool_ref[:, pl.ds(0, Wp, stride=pool), :]
    for dw in range(1, pool):
        pooled = jnp.maximum(pooled, hpool_ref[:, pl.ds(dw, Wp, stride=pool), :])
    o_ref[...] = pooled.astype(o_ref.dtype)


def conv_block_forward(x_nchw, w_oihw, bias, *, padding=1, pool=2, eps=1e-5):
    """ConvBlock.forward for NCHW input x, Conv2d weight (O, I, KH, KW), bias (O,)."""
    N, Cin, H, W = x_nchw.shape
    Cout, _, KH, KW = w_oihw.shape
    assert H % pool == 0 and W % pool == 0
    assert KH == 2 * padding + 1 and KW == 2 * padding + 1  # "same" conv as in ConvBlock
    Hp, Wp = H // pool, W // pool

    # Glue: NCHW -> NHWC + zero pad spatial dims (fused by XLA), flatten weights
    # to (KH*KW*Cin, Cout) so each tap is a contiguous (Cin, Cout) slab.
    x_nhwc = jnp.transpose(x_nchw, (0, 2, 3, 1)).astype(jnp.float32)
    x_pad = jnp.pad(x_nhwc, ((0, 0), (padding, padding), (padding, padding), (0, 0)))
    w_flat = jnp.transpose(w_oihw, (2, 3, 1, 0)).reshape(KH * KW * Cin, Cout)
    w_flat = w_flat.astype(jnp.float32)
    b2 = bias.reshape(1, Cout).astype(jnp.float32)

    Hpad = H + 2 * padding
    Wpad = W + 2 * padding

    kernel = functools.partial(_conv_block_kernel, H=H, W=W, Cin=Cin, Cout=Cout,
                               KH=KH, KW=KW, pool=pool, eps=eps)

    out_nhwc = pl.pallas_call(
        kernel,
        out_shape=jax.ShapeDtypeStruct((N, Hp, Wp, Cout), jnp.float32),
        grid=(N,),
        in_specs=[
            pl.BlockSpec((None, Hpad, Wpad, Cin), lambda n: (n, 0, 0, 0)),
            pl.BlockSpec((KH * KW * Cin, Cout), lambda n: (0, 0)),
            pl.BlockSpec((1, Cout), lambda n: (0, 0)),
        ],
        out_specs=pl.BlockSpec((None, Hp, Wp, Cout), lambda n: (n, 0, 0, 0)),
        scratch_shapes=[
            pltpu.VMEM((H * W, Cout), jnp.float32),   # conv accumulator
            pltpu.VMEM((Hp, W, Cout), jnp.float32),   # H-pooled activations
        ],
        # Batch elements are independent -> parallel (sharded across v7x's 2 TCs).
        compiler_params=pltpu.CompilerParams(dimension_semantics=("parallel",)),
    )(x_pad, w_flat, b2)

    # Glue: back to PyTorch's NCHW convention.
    return jnp.transpose(out_nhwc, (0, 3, 1, 2))


def _reference_forward(x, w, b, *, padding=1, pool=2, eps=1e-5):
    """Pure-JAX reference matching the PyTorch ConvBlock forward."""
    y = jax.lax.conv_general_dilated(
        x, w, window_strides=(1, 1),
        padding=((padding, padding), (padding, padding)),
        dimension_numbers=("NCHW", "OIHW", "NCHW"))
    y = y + b.reshape(1, -1, 1, 1)
    mean = jnp.mean(y, axis=(2, 3), keepdims=True)
    var = jnp.mean((y - mean) ** 2, axis=(2, 3), keepdims=True)
    y = (y - mean) / jnp.sqrt(var + eps)
    y = jnp.maximum(y, 0.0)
    y = jax.lax.reduce_window(y, -jnp.inf, jax.lax.max,
                              (1, 1, pool, pool), (1, 1, pool, pool), "VALID")
    return y


if __name__ == "__main__":
    # Small shapes consistent with ConvBlock(in_channels=4, out_channels=8, kernel_size=3).
    N, Cin, Cout, H, W = 2, 4, 8, 16, 16
    KH = KW = 3

    key = jax.random.PRNGKey(0)
    kx, kw, kb = jax.random.split(key, 3)
    x = jax.random.normal(kx, (N, Cin, H, W), dtype=jnp.float32)
    conv_w = 0.1 * jax.random.normal(kw, (Cout, Cin, KH, KW), dtype=jnp.float32)
    conv_b = 0.1 * jax.random.normal(kb, (Cout,), dtype=jnp.float32)

    out = conv_block_forward(x, conv_w, conv_b)
    out = jax.block_until_ready(out)

    ref = _reference_forward(x, conv_w, conv_b)
    if out.shape != (N, Cout, H // 2, W // 2):
        raise AssertionError(f"bad output shape {out.shape}")
    if not jnp.allclose(out, ref, atol=1e-3, rtol=1e-3):
        raise AssertionError("Pallas ConvBlock does not match the JAX reference")

    print("KERNEL_OK")
</pallas_src>

<mosaic_0001>
module attributes {stable_mosaic.version = 11 : i64} {
  func.func @_conv_block_kernel(%arg0: i32, %arg1: memref<1x18x18x4xf32, #tpu.memory_space<vmem>>, %arg2: memref<36x8xf32, #tpu.memory_space<vmem>>, %arg3: memref<1x8xf32, #tpu.memory_space<vmem>>, %arg4: memref<1x8x8x8xf32, #tpu.memory_space<vmem>>, %arg5: memref<256x8xf32, #tpu.memory_space<vmem>>, %arg6: memref<8x16x8xf32, #tpu.memory_space<vmem>>) attributes {dimension_semantics = [#tpu.dimension_semantics<parallel>], iteration_bounds = array<i64: 2>, scalar_prefetch = 0 : i64, scratch_operands = 2 : i64, tpu.core_type = #tpu.core_type<tc>, window_params = [{transform_indices = @transform_0, window_bounds = array<i64: 1, 18, 18, 4>}, {pipeline_mode = #tpu.pipeline_mode<synchronous>, transform_indices = @transform_1, window_bounds = array<i64: 36, 8>}, {pipeline_mode = #tpu.pipeline_mode<synchronous>, transform_indices = @transform_2, window_bounds = array<i64: 1, 8>}, {transform_indices = @transform_3, window_bounds = array<i64: 1, 8, 8, 8>}]} {
    %cst = arith.constant 0.000000e+00 : f32
    %0 = vector.broadcast %cst : f32 to vector<256x8xf32>
    %c0 = arith.constant 0 : index
    %c0_0 = arith.constant 0 : index
    %1 = vector.load %arg5[%c0, %c0_0] : memref<256x8xf32, #tpu.memory_space<vmem>>, vector<256x8xf32>
    tpu.vector_store %arg5[%c0, %c0_0], %0 {strides = array<i32>} : memref<256x8xf32, #tpu.memory_space<vmem>>, vector<256x8xf32>,
    %c0_1 = arith.constant 0 : index
    %c0_2 = arith.constant 0 : index
    %c0_3 = arith.constant 0 : index
    %c0_4 = arith.constant 0 : index
    %2 = vector.load %arg1[%c0_1, %c0_2, %c0_3, %c0_4] : memref<1x18x18x4xf32, #tpu.memory_space<vmem>>, vector<1x16x16x4xf32>
    %3 = vector.shape_cast %2 : vector<1x16x16x4xf32> to vector<16x16x4xf32>
    %4 = vector.shape_cast %3 : vector<16x16x4xf32> to vector<256x4xf32>
    %c0_5 = arith.constant 0 : index
    %c0_6 = arith.constant 0 : index
    %5 = vector.load %arg2[%c0_5, %c0_6] : memref<36x8xf32, #tpu.memory_space<vmem>>, vector<4x8xf32>
    %c0_7 = arith.constant 0 : index
    %c0_8 = arith.constant 0 : index
    %6 = vector.load %arg5[%c0_7, %c0_8] : memref<256x8xf32, #tpu.memory_space<vmem>>, vector<256x8xf32>
    %cst_9 = arith.constant dense<0.000000e+00> : vector<256x8xf32>
    %7 = tpu.matmul %4, %5, %cst_9 {dimension_numbers = #tpu.dot_dimension_numbers<[1], [0], [0], [1], [0, 0, 1, 1], [], []>} : vector<256x4xf32>, vector<4x8xf32>, vector<256x8xf32> -> vector<256x8xf32>
    %8 = arith.addf %6, %7 : vector<256x8xf32>
    %c0_10 = arith.constant 0 : index
    %c0_11 = arith.constant 0 : index
    %9 = vector.load %arg5[%c0_10, %c0_11] : memref<256x8xf32, #tpu.memory_space<vmem>>, vector<256x8xf32>
    tpu.vector_store %arg5[%c0_10, %c0_11], %8 {strides = array<i32>} : memref<256x8xf32, #tpu.memory_space<vmem>>, vector<256x8xf32>,
    %c0_12 = arith.constant 0 : index
    %c0_13 = arith.constant 0 : index
    %c1 = arith.constant 1 : index
    %c0_14 = arith.constant 0 : index
    %10 = vector.load %arg1[%c0_12, %c0_13, %c1, %c0_14] : memref<1x18x18x4xf32, #tpu.memory_space<vmem>>, vector<1x16x16x4xf32>
    %11 = vector.shape_cast %10 : vector<1x16x16x4xf32> to vector<16x16x4xf32>
    %12 = vector.shape_cast %11 : vector<16x16x4xf32> to vector<256x4xf32>
    %c4 = arith.constant 4 : index
    %c0_15 = arith.constant 0 : index
    %13 = vector.load %arg2[%c4, %c0_15] : memref<36x8xf32, #tpu.memory_space<vmem>>, vector<4x8xf32>
    %c0_16 = arith.constant 0 : index
    %c0_17 = arith.constant 0 : index
    %14 = vector.load %arg5[%c0_16, %c0_17] : memref<256x8xf32, #tpu.memory_space<vmem>>, vector<256x8xf32>
    %cst_18 = arith.constant dense<0.000000e+00> : vector<256x8xf32>
    %15 = tpu.matmul %12, %13, %cst_18 {dimension_numbers = #tpu.dot_dimension_numbers<[1], [0], [0], [1], [0, 0, 1, 1], [], []>} : vector<256x4xf32>, vector<4x8xf32>, vector<256x8xf32> -> vector<256x8xf32>
    %16 = arith.addf %14, %15 : vector<256x8xf32>
    %c0_19 = arith.constant 0 : index
    %c0_20 = arith.constant 0 : index
    %17 = vector.load %arg5[%c0_19, %c0_20] : memref<256x8xf32, #tpu.memory_space<vmem>>, vector<256x8xf32>
    tpu.vector_store %arg5[%c0_19, %c0_20], %16 {strides = array<i32>} : memref<256x8xf32, #tpu.memory_space<vmem>>, vector<256x8xf32>,
    %c0_21 = arith.constant 0 : index
    %c0_22 = arith.constant 0 : index
    %c2 = arith.constant 2 : index
    %c0_23 = arith.constant 0 : index
    %18 = vector.load %arg1[%c0_21, %c0_22, %c2, %c0_23] : memref<1x18x18x4xf32, #tpu.memory_space<vmem>>, vector<1x16x16x4xf32>
    %19 = vector.shape_cast %18 : vector<1x16x16x4xf32> to vector<16x16x4xf32>
    %20 = vector.shape_cast %19 : vector<16x16x4xf32> to vector<256x4xf32>
    %c8 = arith.constant 8 : index
    %c0_24 = arith.constant 0 : index
    %21 = vector.load %arg2[%c8, %c0_24] : memref<36x8xf32, #tpu.memory_space<vmem>>, vector<4x8xf32>
    %c0_25 = arith.constant 0 : index
    %c0_26 = arith.constant 0 : index
    %22 = vector.load %arg5[%c0_25, %c0_26] : memref<256x8xf32, #tpu.memory_space<vmem>>, vector<256x8xf32>
    %cst_27 = arith.constant dense<0.000000e+00> : vector<256x8xf32>
    %23 = tpu.matmul %20, %21, %cst_27 {dimension_numbers = #tpu.dot_dimension_numbers<[1], [0], [0], [1], [0, 0, 1, 1], [], []>} : vector<256x4xf32>, vector<4x8xf32>, vector<256x8xf32> -> vector<256x8xf32>
    %24 = arith.addf %22, %23 : vector<256x8xf32>
    %c0_28 = arith.constant 0 : index
    %c0_29 = arith.constant 0 : index
    %25 = vector.load %arg5[%c0_28, %c0_29] : memref<256x8xf32, #tpu.memory_space<vmem>>, vector<256x8xf32>
    tpu.vector_store %arg5[%c0_28, %c0_29], %24 {strides = array<i32>} : memref<256x8xf32, #tpu.memory_space<vmem>>, vector<256x8xf32>,
    %c0_30 = arith.constant 0 : index
    %c1_31 = arith.constant 1 : index
    %c0_32 = arith.constant 0 : index
    %c0_33 = arith.constant 0 : index
    %26 = vector.load %arg1[%c0_30, %c1_31, %c0_32, %c0_33] : memref<1x18x18x4xf32, #tpu.memory_space<vmem>>, vector<1x16x16x4xf32>
    %27 = vector.shape_cast %26 : vector<1x16x16x4xf32> to vector<16x16x4xf32>
    %28 = vector.shape_cast %27 : vector<16x16x4xf32> to vector<256x4xf32>
    %c12 = arith.constant 12 : index
    %c0_34 = arith.constant 0 : index
    %29 = vector.load %arg2[%c12, %c0_34] : memref<36x8xf32, #tpu.memory_space<vmem>>, vector<4x8xf32>
    %c0_35 = arith.constant 0 : index
    %c0_36 = arith.constant 0 : index
    %30 = vector.load %arg5[%c0_35, %c0_36] : memref<256x8xf32, #tpu.memory_space<vmem>>, vector<256x8xf32>
    %cst_37 = arith.constant dense<0.000000e+00> : vector<256x8xf32>
    %31 = tpu.matmul %28, %29, %cst_37 {dimension_numbers = #tpu.dot_dimension_numbers<[1], [0], [0], [1], [0, 0, 1, 1], [], []>} : vector<256x4xf32>, vector<4x8xf32>, vector<256x8xf32> -> vector<256x8xf32>
    %32 = arith.addf %30, %31 : vector<256x8xf32>
    %c0_38 = arith.constant 0 : index
    %c0_39 = arith.constant 0 : index
    %33 = vector.load %arg5[%c0_38, %c0_39] : memref<256x8xf32, #tpu.memory_space<vmem>>, vector<256x8xf32>
    tpu.vector_store %arg5[%c0_38, %c0_39], %32 {strides = array<i32>} : memref<256x8xf32, #tpu.memory_space<vmem>>, vector<256x8xf32>,
    %c0_40 = arith.constant 0 : index
    %c1_41 = arith.constant 1 : index
    %c1_42 = arith.constant 1 : index
    %c0_43 = arith.constant 0 : index
    %34 = vector.load %arg1[%c0_40, %c1_41, %c1_42, %c0_43] : memref<1x18x18x4xf32, #tpu.memory_space<vmem>>, vector<1x16x16x4xf32>
    %35 = vector.shape_cast %34 : vector<1x16x16x4xf32> to vector<16x16x4xf32>
    %36 = vector.shape_cast %35 : vector<16x16x4xf32> to vector<256x4xf32>
    %c16 = arith.constant 16 : index
    %c0_44 = arith.constant 0 : index
    %37 = vector.load %arg2[%c16, %c0_44] : memref<36x8xf32, #tpu.memory_space<vmem>>, vector<4x8xf32>
    %c0_45 = arith.constant 0 : index
    %c0_46 = arith.constant 0 : index
    %38 = vector.load %arg5[%c0_45, %c0_46] : memref<256x8xf32, #tpu.memory_space<vmem>>, vector<256x8xf32>
    %cst_47 = arith.constant dense<0.000000e+00> : vector<256x8xf32>
    %39 = tpu.matmul %36, %37, %cst_47 {dimension_numbers = #tpu.dot_dimension_numbers<[1], [0], [0], [1], [0, 0, 1, 1], [], []>} : vector<256x4xf32>, vector<4x8xf32>, vector<256x8xf32> -> vector<256x8xf32>
    %40 = arith.addf %38, %39 : vector<256x8xf32>
    %c0_48 = arith.constant 0 : index
    %c0_49 = arith.constant 0 : index
    %41 = vector.load %arg5[%c0_48, %c0_49] : memref<256x8xf32, #tpu.memory_space<vmem>>, vector<256x8xf32>
    tpu.vector_store %arg5[%c0_48, %c0_49], %40 {strides = array<i32>} : memref<256x8xf32, #tpu.memory_space<vmem>>, vector<256x8xf32>,
    %c0_50 = arith.constant 0 : index
    %c1_51 = arith.constant 1 : index
    %c2_52 = arith.constant 2 : index
    %c0_53 = arith.constant 0 : index
    %42 = vector.load %arg1[%c0_50, %c1_51, %c2_52, %c0_53] : memref<1x18x18x4xf32, #tpu.memory_space<vmem>>, vector<1x16x16x4xf32>
    %43 = vector.shape_cast %42 : vector<1x16x16x4xf32> to vector<16x16x4xf32>
    %44 = vector.shape_cast %43 : vector<16x16x4xf32> to vector<256x4xf32>
    %c20 = arith.constant 20 : index
    %c0_54 = arith.constant 0 : index
    %45 = vector.load %arg2[%c20, %c0_54] : memref<36x8xf32, #tpu.memory_space<vmem>>, vector<4x8xf32>
    %c0_55 = arith.constant 0 : index
    %c0_56 = arith.constant 0 : index
    %46 = vector.load %arg5[%c0_55, %c0_56] : memref<256x8xf32, #tpu.memory_space<vmem>>, vector<256x8xf32>
    %cst_57 = arith.constant dense<0.000000e+00> : vector<256x8xf32>
    %47 = tpu.matmul %44, %45, %cst_57 {dimension_numbers = #tpu.dot_dimension_numbers<[1], [0], [0], [1], [0, 0, 1, 1], [], []>} : vector<256x4xf32>, vector<4x8xf32>, vector<256x8xf32> -> vector<256x8xf32>
    %48 = arith.addf %46, %47 : vector<256x8xf32>
    %c0_58 = arith.constant 0 : index
    %c0_59 = arith.constant 0 : index
    %49 = vector.load %arg5[%c0_58, %c0_59] : memref<256x8xf32, #tpu.memory_space<vmem>>, vector<256x8xf32>
    tpu.vector_store %arg5[%c0_58, %c0_59], %48 {strides = array<i32>} : memref<256x8xf32, #tpu.memory_space<vmem>>, vector<256x8xf32>,
    %c0_60 = arith.constant 0 : index
    %c2_61 = arith.constant 2 : index
    %c0_62 = arith.constant 0 : index
    %c0_63 = arith.constant 0 : index
    %50 = vector.load %arg1[%c0_60, %c2_61, %c0_62, %c0_63] : memref<1x18x18x4xf32, #tpu.memory_space<vmem>>, vector<1x16x16x4xf32>
    %51 = vector.shape_cast %50 : vector<1x16x16x4xf32> to vector<16x16x4xf32>
    %52 = vector.shape_cast %51 : vector<16x16x4xf32> to vector<256x4xf32>
    %c24 = arith.constant 24 : index
    %c0_64 = arith.constant 0 : index
    %53 = vector.load %arg2[%c24, %c0_64] : memref<36x8xf32, #tpu.memory_space<vmem>>, vector<4x8xf32>
    %c0_65 = arith.constant 0 : index
    %c0_66 = arith.constant 0 : index
    %54 = vector.load %arg5[%c0_65, %c0_66] : memref<256x8xf32, #tpu.memory_space<vmem>>, vector<256x8xf32>
    %cst_67 = arith.constant dense<0.000000e+00> : vector<256x8xf32>
    %55 = tpu.matmul %52, %53, %cst_67 {dimension_numbers = #tpu.dot_dimension_numbers<[1], [0], [0], [1], [0, 0, 1, 1], [], []>} : vector<256x4xf32>, vector<4x8xf32>, vector<256x8xf32> -> vector<256x8xf32>
    %56 = arith.addf %54, %55 : vector<256x8xf32>
    %c0_68 = arith.constant 0 : index
    %c0_69 = arith.constant 0 : index
    %57 = vector.load %arg5[%c0_68, %c0_69] : memref<256x8xf32, #tpu.memory_space<vmem>>, vector<256x8xf32>
    tpu.vector_store %arg5[%c0_68, %c0_69], %56 {strides = array<i32>} : memref<256x8xf32, #tpu.memory_space<vmem>>, vector<256x8xf32>,
    %c0_70 = arith.constant 0 : index
    %c2_71 = arith.constant 2 : index
    %c1_72 = arith.constant 1 : index
    %c0_73 = arith.constant 0 : index
    %58 = vector.load %arg1[%c0_70, %c2_71, %c1_72, %c0_73] : memref<1x18x18x4xf32, #tpu.memory_space<vmem>>, vector<1x16x16x4xf32>
    %59 = vector.shape_cast %58 : vector<1x16x16x4xf32> to vector<16x16x4xf32>
    %60 = vector.shape_cast %59 : vector<16x16x4xf32> to vector<256x4xf32>
    %c28 = arith.constant 28 : index
    %c0_74 = arith.constant 0 : index
    %61 = vector.load %arg2[%c28, %c0_74] : memref<36x8xf32, #tpu.memory_space<vmem>>, vector<4x8xf32>
    %c0_75 = arith.constant 0 : index
    %c0_76 = arith.constant 0 : index
    %62 = vector.load %arg5[%c0_75, %c0_76] : memref<256x8xf32, #tpu.memory_space<vmem>>, vector<256x8xf32>
    %cst_77 = arith.constant dense<0.000000e+00> : vector<256x8xf32>
    %63 = tpu.matmul %60, %61, %cst_77 {dimension_numbers = #tpu.dot_dimension_numbers<[1], [0], [0], [1], [0, 0, 1, 1], [], []>} : vector<256x4xf32>, vector<4x8xf32>, vector<256x8xf32> -> vector<256x8xf32>
    %64 = arith.addf %62, %63 : vector<256x8xf32>
    %c0_78 = arith.constant 0 : index
    %c0_79 = arith.constant 0 : index
    %65 = vector.load %arg5[%c0_78, %c0_79] : memref<256x8xf32, #tpu.memory_space<vmem>>, vector<256x8xf32>
    tpu.vector_store %arg5[%c0_78, %c0_79], %64 {strides = array<i32>} : memref<256x8xf32, #tpu.memory_space<vmem>>, vector<256x8xf32>,
    %c0_80 = arith.constant 0 : index
    %c2_81 = arith.constant 2 : index
    %c2_82 = arith.constant 2 : index
    %c0_83 = arith.constant 0 : index
    %66 = vector.load %arg1[%c0_80, %c2_81, %c2_82, %c0_83] : memref<1x18x18x4xf32, #tpu.memory_space<vmem>>, vector<1x16x16x4xf32>
    %67 = vector.shape_cast %66 : vector<1x16x16x4xf32> to vector<16x16x4xf32>
    %68 = vector.shape_cast %67 : vector<16x16x4xf32> to vector<256x4xf32>
    %c32 = arith.constant 32 : index
    %c0_84 = arith.constant 0 : index
    %69 = vector.load %arg2[%c32, %c0_84] : memref<36x8xf32, #tpu.memory_space<vmem>>, vector<4x8xf32>
    %c0_85 = arith.constant 0 : index
    %c0_86 = arith.constant 0 : index
    %70 = vector.load %arg5[%c0_85, %c0_86] : memref<256x8xf32, #tpu.memory_space<vmem>>, vector<256x8xf32>
    %cst_87 = arith.constant dense<0.000000e+00> : vector<256x8xf32>
    %71 = tpu.matmul %68, %69, %cst_87 {dimension_numbers = #tpu.dot_dimension_numbers<[1], [0], [0], [1], [0, 0, 1, 1], [], []>} : vector<256x4xf32>, vector<4x8xf32>, vector<256x8xf32> -> vector<256x8xf32>
    %72 = arith.addf %70, %71 : vector<256x8xf32>
    %c0_88 = arith.constant 0 : index
    %c0_89 = arith.constant 0 : index
    %73 = vector.load %arg5[%c0_88, %c0_89] : memref<256x8xf32, #tpu.memory_space<vmem>>, vector<256x8xf32>
    tpu.vector_store %arg5[%c0_88, %c0_89], %72 {strides = array<i32>} : memref<256x8xf32, #tpu.memory_space<vmem>>, vector<256x8xf32>,
    %c0_90 = arith.constant 0 : index
    %c0_91 = arith.constant 0 : index
    %74 = vector.load %arg5[%c0_90, %c0_91] : memref<256x8xf32, #tpu.memory_space<vmem>>, vector<256x8xf32>
    %c0_92 = arith.constant 0 : index
    %c0_93 = arith.constant 0 : index
    %75 = vector.load %arg3[%c0_92, %c0_93] : memref<1x8xf32, #tpu.memory_space<vmem>>, vector<1x8xf32>
    %76 = vector.broadcast %75 : vector<1x8xf32> to vector<256x8xf32>
    %77 = arith.addf %74, %76 : vector<256x8xf32>
    %cst_94 = arith.constant dense<0.000000e+00> : vector<8xf32>
    %78 = vector.multi_reduction <add>, %77, %cst_94 [0] : vector<256x8xf32> to vector<8xf32>
    %79 = vector.shape_cast %78 : vector<8xf32> to vector<1x8xf32>
    %cst_95 = arith.constant 3.906250e-03 : f32
    %80 = vector.broadcast %cst_95 : f32 to vector<1x8xf32>
    %81 = arith.mulf %79, %80 : vector<1x8xf32>
    %82 = vector.broadcast %81 : vector<1x8xf32> to vector<256x8xf32>
    %83 = arith.subf %77, %82 : vector<256x8xf32>
    %84 = arith.mulf %83, %83 : vector<256x8xf32>
    %cst_96 = arith.constant dense<0.000000e+00> : vector<8xf32>
    %85 = vector.multi_reduction <add>, %84, %cst_96 [0] : vector<256x8xf32> to vector<8xf32>
    %86 = vector.shape_cast %85 : vector<8xf32> to vector<1x8xf32>
    %cst_97 = arith.constant 3.906250e-03 : f32
    %87 = vector.broadcast %cst_97 : f32 to vector<1x8xf32>
    %88 = arith.mulf %86, %87 : vector<1x8xf32>
    %cst_98 = arith.constant 9.99999974E-6 : f32
    %89 = vector.broadcast %cst_98 : f32 to vector<1x8xf32>
    %90 = arith.addf %88, %89 : vector<1x8xf32>
    %91 = math.rsqrt %90 : vector<1x8xf32>
    %92 = vector.broadcast %91 : vector<1x8xf32> to vector<256x8xf32>
    %93 = arith.mulf %83, %92 : vector<256x8xf32>
    %cst_99 = arith.constant 0.000000e+00 : f32
    %94 = vector.broadcast %cst_99 : f32 to vector<256x8xf32>
    %95 = arith.maximumf %93, %94 : vector<256x8xf32>
    %96 = vector.shape_cast %95 : vector<256x8xf32> to vector<8x32x8xf32>
    %97 = vector.extract_strided_slice %96 {offsets = [0, 0, 0], sizes = [8, 16, 8], strides = [1, 1, 1]} : vector<8x32x8xf32> to vector<8x16x8xf32>
    %98 = vector.extract_strided_slice %96 {offsets = [0, 16, 0], sizes = [8, 16, 8], strides = [1, 1, 1]} : vector<8x32x8xf32> to vector<8x16x8xf32>
    %99 = arith.maximumf %97, %98 : vector<8x16x8xf32>
    %c0_100 = arith.constant 0 : index
    %c0_101 = arith.constant 0 : index
    %c0_102 = arith.constant 0 : index
    %100 = vector.load %arg6[%c0_100, %c0_101, %c0_102] : memref<8x16x8xf32, #tpu.memory_space<vmem>>, vector<8x16x8xf32>
    tpu.vector_store %arg6[%c0_100, %c0_101, %c0_102], %99 {strides = array<i32>} : memref<8x16x8xf32, #tpu.memory_space<vmem>>, vector<8x16x8xf32>,
    %c0_103 = arith.constant 0 : index
    %c0_104 = arith.constant 0 : index
    %c0_105 = arith.constant 0 : index
    %101 = tpu.strided_load %arg6[%c0_103, %c0_104, %c0_105] {strides = array<i32: 1, 2, 1>} : memref<8x16x8xf32, #tpu.memory_space<vmem>>, vector<8x8x8xf32>
    %c0_106 = arith.constant 0 : index
    %c1_107 = arith.constant 1 : index
    %c0_108 = arith.constant 0 : index
    %102 = tpu.strided_load %arg6[%c0_106, %c1_107, %c0_108] {strides = array<i32: 1, 2, 1>} : memref<8x16x8xf32, #tpu.memory_space<vmem>>, vector<8x8x8xf32>
    %103 = arith.maximumf %101, %102 : vector<8x8x8xf32>
    %c0_109 = arith.constant 0 : index
    %c0_110 = arith.constant 0 : index
    %c0_111 = arith.constant 0 : index
    %c0_112 = arith.constant 0 : index
    %104 = vector.load %arg4[%c0_109, %c0_110, %c0_111, %c0_112] : memref<1x8x8x8xf32, #tpu.memory_space<vmem>>, vector<1x8x8x8xf32>
    %105 = vector.shape_cast %104 : vector<1x8x8x8xf32> to vector<8x8x8xf32>
    %106 = vector.shape_cast %103 : vector<8x8x8xf32> to vector<1x8x8x8xf32>
    tpu.vector_store %arg4[%c0_109, %c0_110, %c0_111, %c0_112], %106 {strides = array<i32>} : memref<1x8x8x8xf32, #tpu.memory_space<vmem>>, vector<1x8x8x8xf32>,
    return
  }
  func.func @transform_0(%arg0: i32) -> (i32, i32, i32, i32) {
    %c0_i32 = arith.constant 0 : i32
    %c0_i32_0 = arith.constant 0 : i32
    %c0_i32_1 = arith.constant 0 : i32
    %c0_i32_2 = arith.constant 0 : i32
    return %arg0, %c0_i32, %c0_i32_0, %c0_i32_1 : i32, i32, i32, i32
  }
  func.func @transform_1(%arg0: i32) -> (i32, i32) {
    %c0_i32 = arith.constant 0 : i32
    %c0_i32_0 = arith.constant 0 : i32
    %c0_i32_1 = arith.constant 0 : i32
    return %c0_i32, %c0_i32_0 : i32, i32
  }
  func.func @transform_2(%arg0: i32) -> (i32, i32) {
    %c0_i32 = arith.constant 0 : i32
    %c0_i32_0 = arith.constant 0 : i32
    %c0_i32_1 = arith.constant 0 : i32
    return %c0_i32, %c0_i32_0 : i32, i32
  }
  func.func @transform_3(%arg0: i32) -> (i32, i32, i32, i32) {
    %c0_i32 = arith.constant 0 : i32
    %c0_i32_0 = arith.constant 0 : i32
    %c0_i32_1 = arith.constant 0 : i32
    %c0_i32_2 = arith.constant 0 : i32
    return %arg0, %c0_i32, %c0_i32_0, %c0_i32_1 : i32, i32, i32, i32
  }
}

</mosaic_0001>

<bundles_post_ra>
// kernel: tpu_custom_call.1
= control target key start
LH: loop header
LB: loop body
LE: loop exit
PB: predicated region body
PF: predicated region fallthrough
CT: control target
= control target key end

     0   :  { %8 = vsyncpa [#allocation5], 0  ;;  %s7982_s0 = inlined_call_operand.vmem [shape: f32[2,18,18,4], index: 0, kind: input, shape index: {}]   ;;  %s7983_s1 = inlined_call_operand.vmem [shape: f32[36,8], index: 1, kind: input, shape index: {}]   ;;  %s7984_s2 = inlined_call_operand.vmem [shape: f32[1,8], index: 2, kind: input, shape index: {}]   ;;  %s7985_s3 = inlined_call_operand.hbm [shape: f32[2,8,8,8], index: 3, kind: output, shape index: {}]  }
   0x1   :  { %10 = vsyncpa [#allocation5 + $0x1], 0  ;;  %s6163_s12 = smov 0   ;;  %s6165_s13 = smov 0  }
   0x2   :  { %s6167_s14 = smov 0   ;;  %s6169_s15 = smov 0  }
   0x3 LB: > { %s6184_s16 = sadd.s32 4294967295, %s6137_s15   ;;  %s4779_s17 = sadd.s32 4294967294, %s6137_s15   ;;  %s6137_s15 = sphi %s6169_s15, %s8084_s15   ;;  %s6133_s14 = sphi %s6167_s14, %s8083_s14   ;;  %s6129_s13 = sphi %s6165_s13, %s8082_s13   ;;  %s6125_s12 = sphi %s6163_s12, %s8081_s12  }
   0x4   : > { %s6188_s18 = sadd.s32 1, %s6137_s15   ;;  %s91_s19 = sadd.s32 1, %s6133_s14 }
   0x5   : > { %s88_s20 = ssub.s32 %s6137_s15, %s6188_s18  ;;  %p101_p0 = scmp.ne.s32.totalorder %s6133_s14, %s6129_s13 }
   0x6   : > { %p89_p1 = scmp.eq.s32.totalorder %s88_s20, 0  ;;  %p102_p2 = scmp.eq.s32.totalorder %s6184_s16, 1 }
   0x7   : > { %p107_p3 = scmp.ne.s32.totalorder %s6129_s13, %s6125_s12  ;;  %p108_p4 = scmp.eq.s32.totalorder %s4779_s17, 1 }
   0x8   : > { %s6199_s21 = scalar_select %p89_p1, %s6133_s14, %s91_s19  }
   0x9   : > { %p6201_p5 = por %p102_p2, %p101_p0  ;;  %p6205_p6 = por %p108_p4, %p107_p3 }
   0xa   : > { %p4782_p7 = scmp.ge.s32.totalorder %s6137_s15, 1  ;;  %p140_p8 = scmp.lt.s32.totalorder %s6137_s15, 3 }
   0xc   : > { %p141_p9 = pnand %p4782_p7, %p140_p8 }
   0xe   : > { %144 = sbr.rel (%p141_p9) target bundleno = 713 (0x2c9), region = 32 }
  0x15   : > { %v234_v0 = vld [vmem:[%s7983_s1] sm:$0xf]  ;;  %vm364_vm0 = vcmask 1043456   ;;  %p164_p10 = scmp.lt.s32.totalorder %s6184_s16, 1  ;;  %v689_v1 = vld [vmem:[%s7983_s1 + $0x4] sm:$0xf] }
  0x16   : > { %6028 = vmatprep.subr.msk.mxu1 %vm364_vm0, %v234_v0  ;;  %5578 = vmatprep.subr.msk.mxu0 %vm364_vm0, %v234_v0  ;;  %v1142_v2 = vld [vmem:[%s7983_s1 + $0x8] sm:$0xf]  ;;  %vm267_vm1 = vcmask 31744   ;;  %v6248_v7 = vld [vmem:[%s7983_s1 + $0xc] sm:$0xf]  ;;  %vm169_vm2 = vcmask 64512  }
  0x17   : > { %6029 = vmatpush3.msk.msra.mxu1 %vm364_vm0, %v234_v0  ;;  %s165_s30 = scalar_select %p164_p10, %s6184_s16, 1  ;;  %5579 = vmatpush3.msk.msra.mxu0 %vm364_vm0, %v234_v0  ;;  %v6266_v11 = vld [vmem:[%s7983_s1 + $0x10] sm:$0xf]  ;;  %v6415_v42 = vld [vmem:[%s7983_s1 + $0x14] sm:$0xf] }
  0x18   : > { %5628 = vmatprep.subr.msk.mxu1 %vm364_vm0, %v689_v1  ;;  %5678 = vmatprep.subr.msk.mxu0 %vm364_vm0, %v1142_v2  ;;  %v6431_v45 = vld [vmem:[%s7983_s1 + $0x18] sm:$0xf]  ;;  %s5280_s6 = sshll.u32 %s6184_s16, 10  ;;  %s6140_s19 = smov [#allocation4]  }
  0x19   : > { %s6030_s4 = smul.u32 432, %s165_s30  ;;  %s7925_s10 = scalar_lea.hbm %s7985_s3, %s5280_s6 }
  0x1a   : > { %s6079_s20 = sshll.u32 %s6140_s19, 4  ;;  %s6080_s20 = int_to_ptr.vmem [resolvable:$false] %s6079_s20 }
  0x1b   : > { %s6231_s7 = scalar_lea.vmem %s7982_s0, %s6030_s4  ;;  %s161_s4 = sand.u32 1, %s6129_s13  }
  0x1c   : > { %v6234_v3 = vld [vmem:[%s6231_s7 + $0xc0] sm:$0xff]  ;;  %v6237_v4 = vld [vmem:[%s6231_s7 + $0xc8] sm:$0xff]  ;;  %v6240_v5 = vld [vmem:[%s6231_s7 + $0xd8] sm:$0xff]  ;;  %s4783_s5 = sshll.u32 %s161_s4, 6  ;;  %s7941_s11 = scalar_lea.sflag [#allocation5], %s161_s4 }
  0x1d   : > { %5604 = vmatprep.mubr.msk.f32.mxu1 %vm267_vm1, %v6234_v3  ;;  %v202_v6 = vld [vmem:[%s6231_s7] sm:$0xff]  ;;  %v203_v8 = vld [vmem:[%s6231_s7 + $0x8] sm:$0xff]  ;;  %v6261_v10 = vld [vmem:[%s6231_s7 + $0x18] sm:$0xff]  ;;  %s6081_s24 = scalar_lea.vmem %s6080_s20, 2048 }
  0x1e   : > { %5605 = vmatmul.mubr.msk.f32.vlgmr.msra.gmra.mrb[0].mxu1 %vm267_vm1, %v6237_v4  ;;  %5580 = vmatprep.mubr.msk.f32.mxu0 %vm267_vm1, %v202_v6  ;;  %v6258_v9 = vld [vmem:[%s6231_s7 + $0xe0] sm:$0xff]  ;;  %v6269_v12 = vld [vmem:[%s6231_s7 + $0xf0] sm:$0xff]  ;;  %v6290_v15 = vld [vmem:[%s6231_s7 + $0xf8] sm:$0xff] }
  0x1f   : > { %5629 = vmatpush3.msk.msra.mxu1 %vm364_vm0, %v689_v1  ;;  %5607 = vmatprep.mubr.msk.f32.mxu1 %vm267_vm1, %v6240_v5  ;;  %v6278_v13 = vld [vmem:[%s6231_s7 + $0x20] sm:$0xff]  ;;  %v6283_v14 = vld [vmem:[%s6231_s7 + $0x30] sm:$0xff]  ;;  %v6293_v16 = vld [vmem:[%s6231_s7 + $0x108] sm:$0xff] }
  0x20   : > { %5581 = vmatmul.mubr.msk.f32.vlgmr.msra.gmra.mrb[0].mxu0 %vm267_vm1, %v203_v8  ;;  %5728 = vmatprep.subr.msk.mxu1 %vm364_vm0, %v6248_v7  ;;  %v6300_v17 = vld [vmem:[%s6231_s7 + $0x38] sm:$0xff]  ;;  %v6305_v18 = vld [vmem:[%s6231_s7 + $0x48] sm:$0xff]  ;;  %v6310_v19 = vld [vmem:[%s6231_s7 + $0x110] sm:$0xff] }
  0x21   : > { %5679 = vmatpush3.msk.msra.mxu0 %vm364_vm0, %v1142_v2  ;;  %5583 = vmatprep.mubr.msk.f32.mxu0 %vm267_vm1, %v6261_v10  ;;  %v6313_v20 = vld [vmem:[%s6231_s7 + $0x120] sm:$0xff]  ;;  %v6320_v21 = vld [vmem:[%s6231_s7 + $0x50] sm:$0xff]  ;;  %v6330_v23 = vld [vmem:[%s6231_s7 + $0x128] sm:$0xff] }
  0x22   : > { %5608 = vmatmul.mubr.msk.f32.gmra.mrb[2].mxu1 %vm267_vm1, %v6258_v9  ;;  %5778 = vmatprep.subr.msk.mxu0 %vm364_vm0, %v6266_v11  ;;  %v6325_v22 = vld [vmem:[%s6231_s7 + $0x60] sm:$0xff]  ;;  %v6333_v24 = vld [vmem:[%s6231_s7 + $0x138] sm:$0xff]  ;;  %v6340_v25 = vld [vmem:[%s6231_s7 + $0x68] sm:$0xff] }
  0x23   : > { %5610 = vmatprep.mubr.msk.f32.mxu1 %vm267_vm1, %v6269_v12  ;;  %v6345_v26 = vld [vmem:[%s6231_s7 + $0x78] sm:$0xff]  ;;  %v6350_v27 = vld [vmem:[%s6231_s7 + $0x140] sm:$0xff]  ;;  %v6353_v28 = vld [vmem:[%s6231_s7 + $0x150] sm:$0xff] }
  0x24   : > { %5584 = vmatmul.mubr.msk.f32.gmra.mrb[2].mxu0 %vm267_vm1, %v6278_v13  ;;  %v6360_v29 = vld [vmem:[%s6231_s7 + $0x80] sm:$0xff]  ;;  %v6365_v30 = vld [vmem:[%s6231_s7 + $0x90] sm:$0xff]  ;;  %v6370_v31 = vld [vmem:[%s6231_s7 + $0x158] sm:$0xff] }
  0x25   : > { %5586 = vmatprep.mubr.msk.f32.mxu0 %vm267_vm1, %v6283_v14  ;;  %v6373_v32 = vld [vmem:[%s6231_s7 + $0x168] sm:$0xff]  ;;  %v6380_v33 = vld [vmem:[%s6231_s7 + $0x98] sm:$0xff]  ;;  %v6390_v35 = vld [vmem:[%s6231_s7 + $0x170] sm:$0xff] }
  0x26   : > { %5611 = vmatmul.mubr.msk.f32.gmra.mrb[4].mxu1 %vm267_vm1, %v6290_v15  ;;  %8023 = vst [vmem:[#allocation7_spill] sm:$0xff] %v6373_v32  ;;  %v6385_v34 = vld [vmem:[%s6231_s7 + $0xa8] sm:$0xff]  ;;  %8024 = vst [vmem:[#allocation8_spill] sm:$0xff] %v6390_v35  ;;  %v6398_v37 = vld [vmem:[%s6231_s7 + $0xb0] sm:$0xff] }
  0x27   : > { %5613 = vmatprep.mubr.msk.f32.mxu1 %vm267_vm1, %v6293_v16  ;;  %v657_v36 = vld [vmem:[%s6231_s7 + $0x1] sm:$0xff]  ;;  %v658_v39 = vld [vmem:[%s6231_s7 + $0x9] sm:$0xff]  ;;  %v6406_v40 = vld [vmem:[%s6231_s7 + $0x19] sm:$0xff] }
  0x28   : > { %5587 = vmatmul.mubr.msk.f32.gmra.mrb[4].mxu0 %vm267_vm1, %v6300_v17  ;;  %v1110_v38 = vld [vmem:[%s6231_s7 + $0x2] sm:$0xff]  ;;  %v1111_v41 = vld [vmem:[%s6231_s7 + $0xa] sm:$0xff]  ;;  %v6419_v43 = vld [vmem:[%s6231_s7 + $0x1a] sm:$0xff] }
  0x29   : > { %5589 = vmatprep.mubr.msk.f32.mxu0 %vm267_vm1, %v6305_v18  ;;  %8025 = vst [vmem:[#allocation9_spill] sm:$0xff] %v6419_v43  ;;  %v6426_v44 = vld [vmem:[%s6231_s7 + $0x21] sm:$0xff]  ;;  %v6434_v46 = vld [vmem:[%s6231_s7 + $0x31] sm:$0xff]  ;;  %v6456_v49 = vld [vmem:[%s6231_s7 + $0x39] sm:$0xff] }
  0x2a   : > { %5614 = vmatmul.mubr.msk.f32.gmra.mrb[6].mxu1 %vm267_vm1, %v6310_v19  ;;  %v6444_v47 = vld [vmem:[%s6231_s7 + $0x22] sm:$0xff]  ;;  %v6449_v48 = vld [vmem:[%s6231_s7 + $0x32] sm:$0xff]  ;;  %v6466_v51 = vld [vmem:[%s6231_s7 + $0x3a] sm:$0xff] }
  0x2b   : > { %5616 = vmatprep.mubr.msk.f32.mxu1 %vm267_vm1, %v6313_v20  ;;  %8026 = vst [vmem:[#allocation10_spill] sm:$0xff] %v6444_v47  ;;  %8027 = vst [vmem:[#allocation11_spill] sm:$0xff] %v6449_v48  ;;  %v6459_v50 = vld [vmem:[%s6231_s7 + $0x49] sm:$0xff]  ;;  %v6476_v53 = vld [vmem:[%s6231_s7 + $0x51] sm:$0xff] }
  0x2c   : > { %5590 = vmatmul.mubr.msk.f32.gmra.mrb[6].mxu0 %vm267_vm1, %v6320_v21  ;;  %8028 = vst [vmem:[#allocation12_spill] sm:$0xff] %v6466_v51  ;;  %v6471_v52 = vld [vmem:[%s6231_s7 + $0x4a] sm:$0xff]  ;;  %v6479_v54 = vld [vmem:[%s6231_s7 + $0x61] sm:$0xff]  ;;  %v6486_v55 = vld [vmem:[%s6231_s7 + $0x52] sm:$0xff] }
  0x2d   : > { %5592 = vmatprep.mubr.msk.f32.mxu0 %vm267_vm1, %v6325_v22  ;;  %8029 = vst [vmem:[#allocation13_spill] sm:$0xff] %v6471_v52  ;;  %8030 = vst [vmem:[#allocation14_spill] sm:$0xff] %v6486_v55  ;;  %v6491_v56 = vld [vmem:[%s6231_s7 + $0x62] sm:$0xff]  ;;  %v6499_v58 = vld [vmem:[%s6231_s7 + $0x79] sm:$0xff] }
  0x2e   : > { %5617 = vmatmul.mubr.msk.f32.gmra.mrb[8].mxu1 %vm267_vm1, %v6330_v23  ;;  %8031 = vst [vmem:[#allocation15_spill] sm:$0xff] %v6491_v56  ;;  %v6496_v57 = vld [vmem:[%s6231_s7 + $0x69] sm:$0xff]  ;;  %v6511_v60 = vld [vmem:[%s6231_s7 + $0x7a] sm:$0xff]  ;;  %v6519_v62 = vld [vmem:[%s6231_s7 + $0x91] sm:$0xff] }
  0x2f   : > { %5619 = vmatprep.mubr.msk.f32.mxu1 %vm267_vm1, %v6333_v24  ;;  %v6506_v59 = vld [vmem:[%s6231_s7 + $0x6a] sm:$0xff]  ;;  %8033 = vst [vmem:[#allocation17_spill] sm:$0xff] %v6511_v60  ;;  %v6516_v61 = vld [vmem:[%s6231_s7 + $0x81] sm:$0xff]  ;;  %v6531_v0 = vld [vmem:[%s6231_s7 + $0x92] sm:$0xff] }
  0x30   : > { %5593 = vmatmul.mubr.msk.f32.gmra.mrb[8].mxu0 %vm267_vm1, %v6340_v25  ;;  %8032 = vst [vmem:[#allocation16_spill] sm:$0xff] %v6506_v59  ;;  %v6526_v63 = vld [vmem:[%s6231_s7 + $0x82] sm:$0xff]  ;;  %8035 = vst [vmem:[#allocation19_spill] sm:$0xff] %v6531_v0  ;;  %v6536_v1 = vld [vmem:[%s6231_s7 + $0x99] sm:$0xff] }
  0x31   : > { %5595 = vmatprep.mubr.msk.f32.mxu0 %vm267_vm1, %v6345_v26  ;;  %8034 = vst [vmem:[#allocation18_spill] sm:$0xff] %v6526_v63  ;;  %v6539_v2 = vld [vmem:[%s6231_s7 + $0xa9] sm:$0xff]  ;;  %v6546_v6 = vld [vmem:[%s6231_s7 + $0x9a] sm:$0xff]  ;;  %v6556_v8 = vld [vmem:[%s6231_s7 + $0xb1] sm:$0xff] }
  0x32   : > { %5620 = vmatmul.mubr.msk.f32.gmra.mrb[10].mxu1 %vm267_vm1, %v6350_v27  ;;  %8036 = vst [vmem:[#allocation20_spill] sm:$0xff] %v6546_v6 }
  0x33   : > { %5622 = vmatprep.mubr.msk.f32.mxu1 %vm267_vm1, %v6353_v28 }
  0x34   : > { %5596 = vmatmul.mubr.msk.f32.gmra.mrb[10].mxu0 %vm267_vm1, %v6360_v29 }
  0x35   : > { %5598 = vmatprep.mubr.msk.f32.mxu0 %vm267_vm1, %v6365_v30 }
  0x36   : > { %5623 = vmatmul.mubr.msk.f32.gmra.mrb[12].mxu1 %vm267_vm1, %v6370_v31 }
  0x37   : > { %5625 = vmatprep.mubr.msk.f32.mxu1 %vm267_vm1, %v6373_v32  ;;  %v6748_v32 = vld [vmem:[%s6231_s7 + $0x171] sm:$0xff] }
  0x38   : > { %5599 = vmatmul.mubr.msk.f32.gmra.mrb[12].mxu0 %vm267_vm1, %v6380_v33 }
  0x39   : > { %5601 = vmatprep.mubr.msk.f32.mxu0 %vm267_vm1, %v6385_v34 }
  0x3a   : > { %5626 = vmatmul.mubr.msk.f32.gmra.mrb[14].mxu1 %vm267_vm1, %v6390_v35  ;;  %v6731_v35 = vld [vmem:[%s6231_s7 + $0x169] sm:$0xff] }
  0x3b   : > { %5630 = vmatprep.mubr.msk.f32.mxu1 %vm267_vm1, %v657_v36  ;;  %v6566_v36 = vld [vmem:[%s6231_s7 + $0xb2] sm:$0xff] }
  0x3c   : > { %5602 = vmatmul.mubr.msk.f32.gmra.mrb[14].mxu0 %vm267_vm1, %v6398_v37  ;;  %8038 = vst [vmem:[#allocation22_spill] sm:$0xff] %v6566_v36 }
  0x3d   : > { %5680 = vmatprep.mubr.msk.f32.mxu0 %vm267_vm1, %v1110_v38  ;;  %v6571_v38 = vld [vmem:[%s6231_s7 + $0xc2] sm:$0xff] }
  0x3e   : > { %5631 = vmatmul.mubr.msk.f32.vlgmr.msra.gmra.mrb[16].mxu1 %vm267_vm1, %v658_v39  ;;  %8039 = vst [vmem:[#allocation23_spill] sm:$0xff] %v6571_v38  ;;  %v6576_v39 = vld [vmem:[%s6231_s7 + $0xc9] sm:$0xff] }
  0x3f   : > { %5729 = vmatpush3.msk.msra.mxu1 %vm364_vm0, %v6248_v7  ;;  %5633 = vmatprep.mubr.msk.f32.mxu1 %vm267_vm1, %v6406_v40  ;;  %v6551_v7 = vld [vmem:[%s6231_s7 + $0xaa] sm:$0xff] }
  0x40   : > { %5681 = vmatmul.mubr.msk.f32.vlgmr.msra.gmra.mrb[16].mxu0 %vm267_vm1, %v1111_v41  ;;  %5828 = vmatprep.subr.msk.mxu1 %vm364_vm0, %v6415_v42  ;;  %8037 = vst [vmem:[#allocation21_spill] sm:$0xff] %v6551_v7  ;;  %v6579_v41 = vld [vmem:[%s6231_s7 + $0xd9] sm:$0xff] }
  0x41   : > { %5779 = vmatpush3.msk.msra.mxu0 %vm364_vm0, %v6266_v11  ;;  %5683 = vmatprep.mubr.msk.f32.mxu0 %vm267_vm1, %v6419_v43  ;;  %v6559_v11 = vld [vmem:[%s6231_s7 + $0xc1] sm:$0xff]  ;;  %v6728_v43 = vld [vmem:[%s6231_s7 + $0x159] sm:$0xff] }
  0x42   : > { %5634 = vmatmul.mubr.msk.f32.gmra.mrb[18].mxu1 %vm267_vm1, %v6426_v44  ;;  %5878 = vmatprep.subr.msk.mxu0 %vm364_vm0, %v6431_v45 }
  0x43   : > { %5636 = vmatprep.mubr.msk.f32.mxu1 %vm267_vm1, %v6434_v46 }
  0x44   : > { %5684 = vmatmul.mubr.msk.f32.gmra.mrb[18].mxu0 %vm267_vm1, %v6444_v47  ;;  %v6711_v47 = vld [vmem:[%s6231_s7 + $0x151] sm:$0xff] }
  0x45   : > { %5686 = vmatprep.mubr.msk.f32.mxu0 %vm267_vm1, %v6449_v48  ;;  %v6708_v48 = vld [vmem:[%s6231_s7 + $0x141] sm:$0xff] }
  0x46   : > { %5637 = vmatmul.mubr.msk.f32.gmra.mrb[20].mxu1 %vm267_vm1, %v6456_v49 }
  0x47   : > { %5639 = vmatprep.mubr.msk.f32.mxu1 %vm267_vm1, %v6459_v50 }
  0x48   : > { %5687 = vmatmul.mubr.msk.f32.gmra.mrb[20].mxu0 %vm267_vm1, %v6466_v51  ;;  %v6698_v51 = vld [vmem:[%s6231_s7 + $0x12a] sm:$0xff] }
  0x49   : > { %5689 = vmatprep.mubr.msk.f32.mxu0 %vm267_vm1, %v6471_v52  ;;  %v6139_v52 = vmov 0.0   ;;  %8048 = vst [vmem:[#allocation32_spill] sm:$0xff] %v6698_v51 }
  0x4a   : > { %5640 = vmatmul.mubr.msk.f32.gmra.mrb[22].mxu1 %vm267_vm1, %v6476_v53  ;;  %187 = vst.msk [vmem:[#allocation2 + $0x88] sm:$0xff] %vm169_vm2, %v6139_v52  ;;  %170 = vst.msk [vmem:[#allocation2] sm:$0xff] %vm169_vm2, %v6139_v52 }
  0x4b   : > { %5642 = vmatprep.mubr.msk.f32.mxu1 %vm267_vm1, %v6479_v54  ;;  %171 = vst.msk [vmem:[#allocation2 + $0x8] sm:$0xff] %vm169_vm2, %v6139_v52  ;;  %172 = vst.msk [vmem:[#allocation2 + $0x10] sm:$0xff] %vm169_vm2, %v6139_v52 }
  0x4c   : > { %5690 = vmatmul.mubr.msk.f32.gmra.mrb[22].mxu0 %vm267_vm1, %v6486_v55  ;;  %v6639_v55 = vld [vmem:[%s6231_s7 + $0x121] sm:$0xff]  ;;  %173 = vst.msk [vmem:[#allocation2 + $0x18] sm:$0xff] %vm169_vm2, %v6139_v52  ;;  %174 = vst.msk [vmem:[#allocation2 + $0x20] sm:$0xff] %vm169_vm2, %v6139_v52 }
  0x4d   : > { %5692 = vmatprep.mubr.msk.f32.mxu0 %vm267_vm1, %v6491_v56  ;;  %v6636_v56 = vld [vmem:[%s6231_s7 + $0x111] sm:$0xff]  ;;  %175 = vst.msk [vmem:[#allocation2 + $0x28] sm:$0xff] %vm169_vm2, %v6139_v52  ;;  %176 = vst.msk [vmem:[#allocation2 + $0x30] sm:$0xff] %vm169_vm2, %v6139_v52 }
  0x4e   : > { %5643 = vmatmul.mubr.msk.f32.gmra.mrb[24].mxu1 %vm267_vm1, %v6496_v57  ;;  %177 = vst.msk [vmem:[#allocation2 + $0x38] sm:$0xff] %vm169_vm2, %v6139_v52  ;;  %178 = vst.msk [vmem:[#allocation2 + $0x40] sm:$0xff] %vm169_vm2, %v6139_v52 }
  0x4f   : > { %5645 = vmatprep.mubr.msk.f32.mxu1 %vm267_vm1, %v6499_v58  ;;  %179 = vst.msk [vmem:[#allocation2 + $0x48] sm:$0xff] %vm169_vm2, %v6139_v52  ;;  %180 = vst.msk [vmem:[#allocation2 + $0x50] sm:$0xff] %vm169_vm2, %v6139_v52 }
  0x50   : > { %5693 = vmatmul.mubr.msk.f32.gmra.mrb[24].mxu0 %vm267_vm1, %v6506_v59  ;;  %v6619_v59 = vld [vmem:[%s6231_s7 + $0x109] sm:$0xff]  ;;  %181 = vst.msk [vmem:[#allocation2 + $0x58] sm:$0xff] %vm169_vm2, %v6139_v52  ;;  %182 = vst.msk [vmem:[#allocation2 + $0x60] sm:$0xff] %vm169_vm2, %v6139_v52 }
  0x51   : > { %5695 = vmatprep.mubr.msk.f32.mxu0 %vm267_vm1, %v6511_v60  ;;  %v6616_v60 = vld [vmem:[%s6231_s7 + $0xf9] sm:$0xff]  ;;  %183 = vst.msk [vmem:[#allocation2 + $0x68] sm:$0xff] %vm169_vm2, %v6139_v52  ;;  %184 = vst.msk [vmem:[#allocation2 + $0x70] sm:$0xff] %vm169_vm2, %v6139_v52 }
  0x52   : > { %5646 = vmatmul.mubr.msk.f32.gmra.mrb[26].mxu1 %vm267_vm1, %v6516_v61  ;;  %185 = vst.msk [vmem:[#allocation2 + $0x78] sm:$0xff] %vm169_vm2, %v6139_v52  ;;  %186 = vst.msk [vmem:[#allocation2 + $0x80] sm:$0xff] %vm169_vm2, %v6139_v52 }
  0x53   : > { %5648 = vmatprep.mubr.msk.f32.mxu1 %vm267_vm1, %v6519_v62  ;;  %188 = vst.msk [vmem:[#allocation2 + $0x90] sm:$0xff] %vm169_vm2, %v6139_v52  ;;  %189 = vst.msk [vmem:[#allocation2 + $0x98] sm:$0xff] %vm169_vm2, %v6139_v52 }
  0x54   : > { %5696 = vmatmul.mubr.msk.f32.gmra.mrb[26].mxu0 %vm267_vm1, %v6526_v63  ;;  %v6599_v63 = vld [vmem:[%s6231_s7 + $0xf1] sm:$0xff]  ;;  %190 = vst.msk [vmem:[#allocation2 + $0xa0] sm:$0xff] %vm169_vm2, %v6139_v52  ;;  %191 = vst.msk [vmem:[#allocation2 + $0xa8] sm:$0xff] %vm169_vm2, %v6139_v52 }
  0x55   : > { %5698 = vmatprep.mubr.msk.f32.mxu0 %vm267_vm1, %v6531_v0  ;;  %v6596_v0 = vld [vmem:[%s6231_s7 + $0xe1] sm:$0xff]  ;;  %192 = vst.msk [vmem:[#allocation2 + $0xb0] sm:$0xff] %vm169_vm2, %v6139_v52  ;;  %193 = vst.msk [vmem:[#allocation2 + $0xb8] sm:$0xff] %vm169_vm2, %v6139_v52 }
  0x56   : > { %5649 = vmatmul.mubr.msk.f32.gmra.mrb[28].mxu1 %vm267_vm1, %v6536_v1  ;;  %194 = vst.msk [vmem:[#allocation2 + $0xc0] sm:$0xff] %vm169_vm2, %v6139_v52  ;;  %195 = vst.msk [vmem:[#allocation2 + $0xc8] sm:$0xff] %vm169_vm2, %v6139_v52 }
  0x57   : > { %5651 = vmatprep.mubr.msk.f32.mxu1 %vm267_vm1, %v6539_v2  ;;  %196 = vst.msk [vmem:[#allocation2 + $0xd0] sm:$0xff] %vm169_vm2, %v6139_v52  ;;  %197 = vst.msk [vmem:[#allocation2 + $0xd8] sm:$0xff] %vm169_vm2, %v6139_v52 }
  0x58   : > { %5699 = vmatmul.mubr.msk.f32.gmra.mrb[28].mxu0 %vm267_vm1, %v6546_v6  ;;  %v6591_v6 = vld [vmem:[%s6231_s7 + $0xda] sm:$0xff]  ;;  %198 = vst.msk [vmem:[#allocation2 + $0xe0] sm:$0xff] %vm169_vm2, %v6139_v52  ;;  %199 = vst.msk [vmem:[#allocation2 + $0xe8] sm:$0xff] %vm169_vm2, %v6139_v52 }
  0x59   : > { %5701 = vmatprep.mubr.msk.f32.mxu0 %vm267_vm1, %v6551_v7  ;;  %v6586_v7 = vld [vmem:[%s6231_s7 + $0xca] sm:$0xff]  ;;  %8041 = vst [vmem:[#allocation25_spill] sm:$0xff] %v6591_v6  ;;  %200 = vst.msk [vmem:[#allocation2 + $0xf0] sm:$0xff] %vm169_vm2, %v6139_v52 }
  0x5a   : > { %5652 = vmatmul.mubr.msk.f32.gmra.mrb[30].mxu1 %vm267_vm1, %v6556_v8  ;;  %8040 = vst [vmem:[#allocation24_spill] sm:$0xff] %v6586_v7  ;;  %201 = vst.msk [vmem:[#allocation2 + $0xf8] sm:$0xff] %vm169_vm2, %v6139_v52  ;;  %v6703_v52 = vld [vmem:[%s6231_s7 + $0x13a] sm:$0xff] }
  0x5b   : > { %5654 = vmatprep.mubr.msk.f32.mxu1 %vm267_vm1, %v6559_v11  ;;  %8049 = vst [vmem:[#allocation33_spill] sm:$0xff] %v6703_v52 }
  0x5c   : > { %5702 = vmatmul.mubr.msk.f32.gmra.mrb[30].mxu0 %vm267_vm1, %v6566_v36  ;;  %v6611_v36 = vld [vmem:[%s6231_s7 + $0xf2] sm:$0xff] }
  0x5d   : > { %5704 = vmatprep.mubr.msk.f32.mxu0 %vm267_vm1, %v6571_v38  ;;  %v6606_v38 = vld [vmem:[%s6231_s7 + $0xe2] sm:$0xff]  ;;  %8043 = vst [vmem:[#allocation27_spill] sm:$0xff] %v6611_v36 }
  0x5e   : > { %5655 = vmatmul.mubr.msk.f32.gmra.mrb[32].mxu1 %vm267_vm1, %v6576_v39  ;;  %8042 = vst [vmem:[#allocation26_spill] sm:$0xff] %v6606_v38 }
  0x5f   : > { %5657 = vmatprep.mubr.msk.f32.mxu1 %vm267_vm1, %v6579_v41 }
  0x60   : > { %5705 = vmatmul.mubr.msk.f32.gmra.mrb[32].mxu0 %vm267_vm1, %v6586_v7  ;;  %v6631_v7 = vld [vmem:[%s6231_s7 + $0x10a] sm:$0xff] }
  0x61   : > { %5707 = vmatprep.mubr.msk.f32.mxu0 %vm267_vm1, %v6591_v6  ;;  %v6626_v6 = vld [vmem:[%s6231_s7 + $0xfa] sm:$0xff]  ;;  %8045 = vst [vmem:[#allocation29_spill] sm:$0xff] %v6631_v7 }
  0x62   : > { %5658 = vmatmul.mubr.msk.f32.gmra.mrb[34].mxu1 %vm267_vm1, %v6596_v0  ;;  %8044 = vst [vmem:[#allocation28_spill] sm:$0xff] %v6626_v6 }
  0x63   : > { %5660 = vmatprep.mubr.msk.f32.mxu1 %vm267_vm1, %v6599_v63 }
  0x64   : > { %5708 = vmatmul.mubr.msk.f32.gmra.mrb[34].mxu0 %vm267_vm1, %v6606_v38  ;;  %v6651_v38 = vld [vmem:[%s6231_s7 + $0x122] sm:$0xff] }
  0x65   : > { %5710 = vmatprep.mubr.msk.f32.mxu0 %vm267_vm1, %v6611_v36  ;;  %v6646_v36 = vld [vmem:[%s6231_s7 + $0x112] sm:$0xff]  ;;  %8047 = vst [vmem:[#allocation31_spill] sm:$0xff] %v6651_v38 }
  0x66   : > { %5661 = vmatmul.mubr.msk.f32.gmra.mrb[36].mxu1 %vm267_vm1, %v6616_v60  ;;  %8046 = vst [vmem:[#allocation30_spill] sm:$0xff] %v6646_v36 }
  0x67   : > { %5663 = vmatprep.mubr.msk.f32.mxu1 %vm267_vm1, %v6619_v59 }
  0x68   : > { %5711 = vmatmul.mubr.msk.f32.gmra.mrb[36].mxu0 %vm267_vm1, %v6626_v6  ;;  %v6691_v6 = vld [vmem:[%s6231_s7 + $0x139] sm:$0xff] }
  0x69   : > { %5713 = vmatprep.mubr.msk.f32.mxu0 %vm267_vm1, %v6631_v7  ;;  %v6688_v7 = vld [vmem:[%s6231_s7 + $0x129] sm:$0xff] }
  0x6a   : > { %5664 = vmatmul.mubr.msk.f32.gmra.mrb[38].mxu1 %vm267_vm1, %v6636_v56 }
  0x6b   : > { %5666 = vmatprep.mubr.msk.f32.mxu1 %vm267_vm1, %v6639_v55 }
  0x6c   : > { %5714 = vmatmul.mubr.msk.f32.gmra.mrb[38].mxu0 %vm267_vm1, %v6646_v36  ;;  %v6723_v36 = vld [vmem:[%s6231_s7 + $0x152] sm:$0xff] }
  0x6d   : > { %5716 = vmatprep.mubr.msk.f32.mxu0 %vm267_vm1, %v6651_v38  ;;  %v6718_v38 = vld [vmem:[%s6231_s7 + $0x142] sm:$0xff] }
  0x6e   : > { %5667 = vmatmul.mubr.msk.f32.gmra.mrb[40].mxu1 %vm267_vm1, %v6688_v7  ;;  %8050 = vst [vmem:[#allocation34_spill] sm:$0xff] %v6718_v38 }
  0x6f   : > { %5669 = vmatprep.mubr.msk.f32.mxu1 %vm267_vm1, %v6691_v6 }
  0x70   : > { %5717 = vmatmul.mubr.msk.f32.gmra.mrb[40].mxu0 %vm267_vm1, %v6698_v51  ;;  %v6743_v51 = vld [vmem:[%s6231_s7 + $0x16a] sm:$0xff] }
  0x71   : > { %5719 = vmatprep.mubr.msk.f32.mxu0 %vm267_vm1, %v6703_v52  ;;  %v6738_v52 = vld [vmem:[%s6231_s7 + $0x15a] sm:$0xff] }
  0x72   : > { %5670 = vmatmul.mubr.msk.f32.gmra.mrb[42].mxu1 %vm267_vm1, %v6708_v48  ;;  %8051 = vst [vmem:[#allocation35_spill] sm:$0xff] %v6738_v52 }
  0x73   : > { %5672 = vmatprep.mubr.msk.f32.mxu1 %vm267_vm1, %v6711_v47 }
  0x74   : > { %5720 = vmatmul.mubr.msk.f32.gmra.mrb[42].mxu0 %vm267_vm1, %v6718_v38  ;;  %v6755_v38 = vld [vmem:[%s6231_s7 + $0x172] sm:$0xff] }
  0x75   : > { %5722 = vmatprep.mubr.msk.f32.mxu0 %vm267_vm1, %v6723_v36 }
  0x76   : > { %5673 = vmatmul.mubr.msk.f32.gmra.mrb[44].mxu1 %vm267_vm1, %v6728_v43 }
  0x77   : > { %5675 = vmatprep.mubr.msk.f32.mxu1 %vm267_vm1, %v6731_v35 }
  0x78   : > { %5723 = vmatmul.mubr.msk.f32.gmra.mrb[44].mxu0 %vm267_vm1, %v6738_v52  ;;  %v6768_v52 = vld [vmem:[%s7983_s1 + $0x1c] sm:$0xf] }
  0x79   : > { %5725 = vmatprep.mubr.msk.f32.mxu0 %vm267_vm1, %v6743_v51 }
  0x7a   : > { %5676 = vmatmul.mubr.msk.f32.gmra.mrb[46].mxu1 %vm267_vm1, %v6748_v32 }
  0x7b   : > { %5730 = vmatprep.mubr.msk.f32.mxu1 %vm267_vm1, %v6261_v10  ;;  %v6779_v10 = vld [vmem:[%s7983_s1 + $0x20] sm:$0xf] }
  0x7c   : > { %5726 = vmatmul.mubr.msk.f32.gmra.mrb[46].mxu0 %vm267_vm1, %v6755_v38 }
  0x7d   : > { %5780 = vmatprep.mubr.msk.f32.mxu0 %vm267_vm1, %v6406_v40  ;;  %v6892_v40 = vld [vmem:[%s6231_s7 + $0x180] sm:$0xff] }
  0x7e   : > { %5731 = vmatmul.mubr.msk.f32.vlgmr.msra.gmra.mrb[48].mxu1 %vm267_vm1, %v6278_v13  ;;  %v8052_v13 = vld [vmem:[#allocation7_spill] sm:$0xff] }
  0x7f   : > { %5829 = vmatpush3.msk.msra.mxu1 %vm364_vm0, %v6415_v42  ;;  %5733 = vmatprep.mubr.msk.f32.mxu1 %vm267_vm1, %v6283_v14  ;;  %v8053_v42 = vld [vmem:[#allocation8_spill] sm:$0xff] }
  0x80   : > { %5781 = vmatmul.mubr.msk.f32.vlgmr.msra.gmra.mrb[48].mxu0 %vm267_vm1, %v6426_v44  ;;  %5928 = vmatprep.subr.msk.mxu1 %vm364_vm0, %v6768_v52  ;;  %v4979_v44 = vld [vmem:[%s6231_s7 + $0x181] sm:$0xff] }
  0x81   : > { %5879 = vmatpush3.msk.msra.mxu0 %vm364_vm0, %v6431_v45  ;;  %5783 = vmatprep.mubr.msk.f32.mxu0 %vm267_vm1, %v6434_v46  ;;  %v6904_v45 = vld [vmem:[%s6231_s7 + $0x188] sm:$0xff] }
  0x82   : > { %5734 = vmatmul.mubr.msk.f32.gmra.mrb[50].mxu1 %vm267_vm1, %v6300_v17  ;;  %5978 = vmatprep.subr.msk.mxu0 %vm364_vm0, %v6779_v10 }
  0x83   : > { %5736 = vmatprep.mubr.msk.f32.mxu1 %vm267_vm1, %v6305_v18 }
  0x84   : > { %5784 = vmatmul.mubr.msk.f32.gmra.mrb[50].mxu0 %vm267_vm1, %v6456_v49 }
  0x85   : > { %5786 = vmatprep.mubr.msk.f32.mxu0 %vm267_vm1, %v6459_v50 }
  0x86   : > { %5737 = vmatmul.mubr.msk.f32.gmra.mrb[52].mxu1 %vm267_vm1, %v6320_v21 }
  0x87   : > { %5739 = vmatprep.mubr.msk.f32.mxu1 %vm267_vm1, %v6325_v22 }
  0x88   : > { %5787 = vmatmul.mubr.msk.f32.gmra.mrb[52].mxu0 %vm267_vm1, %v6476_v53 }
  0x89   : > { %5789 = vmatprep.mubr.msk.f32.mxu0 %vm267_vm1, %v6479_v54 }
  0x8a   : > { %5740 = vmatmul.mubr.msk.f32.gmra.mrb[54].mxu1 %vm267_vm1, %v6340_v25 }
  0x8b   : > { %5742 = vmatprep.mubr.msk.f32.mxu1 %vm267_vm1, %v6345_v26 }
  0x8c   : > { %5790 = vmatmul.mubr.msk.f32.gmra.mrb[54].mxu0 %vm267_vm1, %v6496_v57 }
  0x8d   : > { %5792 = vmatprep.mubr.msk.f32.mxu0 %vm267_vm1, %v6499_v58 }
  0x8e   : > { %5743 = vmatmul.mubr.msk.f32.gmra.mrb[56].mxu1 %vm267_vm1, %v6360_v29 }
  0x8f   : > { %5745 = vmatprep.mubr.msk.f32.mxu1 %vm267_vm1, %v6365_v30 }
  0x90   : > { %5793 = vmatmul.mubr.msk.f32.gmra.mrb[56].mxu0 %vm267_vm1, %v6516_v61 }
  0x91   : > { %5795 = vmatprep.mubr.msk.f32.mxu0 %vm267_vm1, %v6519_v62  ;;  %v235_v62 = vld [vmem:[#allocation2] sm:$0xff] }
  0x92   : > { %5746 = vmatmul.mubr.msk.f32.gmra.mrb[58].mxu1 %vm267_vm1, %v6380_v33 }
  0x93   : > { %5748 = vmatprep.mubr.msk.f32.mxu1 %vm267_vm1, %v6385_v34 }
  0x94   : > { %5796 = vmatmul.mubr.msk.f32.gmra.mrb[58].mxu0 %vm267_vm1, %v6536_v1 }
  0x95   : > { %5798 = vmatprep.mubr.msk.f32.mxu0 %vm267_vm1, %v6539_v2  ;;  %v7031_v2 = vld [vmem:[%s6231_s7 + $0x182] sm:$0xff] }
  0x96   : > { %5749 = vmatmul.mubr.msk.f32.gmra.mrb[60].mxu1 %vm267_vm1, %v6398_v37 }
  0x97   : > { %5751 = vmatprep.mubr.msk.f32.mxu1 %vm267_vm1, %v6234_v3 }
  0x98   : > { %5799 = vmatmul.mubr.msk.f32.gmra.mrb[60].mxu0 %vm267_vm1, %v6556_v8 }
  0x99   : > { %5801 = vmatprep.mubr.msk.f32.mxu0 %vm267_vm1, %v6559_v11 }
  0x9a   : > { %5752 = vmatmul.mubr.msk.f32.gmra.mrb[62].mxu1 %vm267_vm1, %v6237_v4 }
  0x9b   : > { %5754 = vmatprep.mubr.msk.f32.mxu1 %vm267_vm1, %v6240_v5 }
  0x9c   : > { %5802 = vmatmul.mubr.msk.f32.gmra.mrb[62].mxu0 %vm267_vm1, %v6576_v39 }
  0x9d   : > { %5804 = vmatprep.mubr.msk.f32.mxu0 %vm267_vm1, %v6579_v41  ;;  %v237_v41 = vld [vmem:[#allocation2 + $0x10] sm:$0xff] }
  0x9e   : > { %5755 = vmatmul.mubr.msk.f32.gmra.mrb[64].mxu1 %vm267_vm1, %v6258_v9 }
  0x9f   : > { %5757 = vmatprep.mubr.msk.f32.mxu1 %vm267_vm1, %v6269_v12 }
  0xa0   : > { %5805 = vmatmul.mubr.msk.f32.gmra.mrb[64].mxu0 %vm267_vm1, %v6596_v0  ;;  %v254_v0 = vld [vmem:[#allocation2 + $0x98] sm:$0xff] }
  0xa1   : > { %5807 = vmatprep.mubr.msk.f32.mxu0 %vm267_vm1, %v6599_v63 }
  0xa2   : > { %5758 = vmatmul.mubr.msk.f32.gmra.mrb[66].mxu1 %vm267_vm1, %v6290_v15 }
  0xa3   : > { %5760 = vmatprep.mubr.msk.f32.mxu1 %vm267_vm1, %v6293_v16 }
  0xa4   : > { %5808 = vmatmul.mubr.msk.f32.gmra.mrb[66].mxu0 %vm267_vm1, %v6616_v60 }
  0xa5   : > { %5810 = vmatprep.mubr.msk.f32.mxu0 %vm267_vm1, %v6619_v59  ;;  %v236_v59 = vld [vmem:[#allocation2 + $0x8] sm:$0xff] }
  0xa6   : > { %5761 = vmatmul.mubr.msk.f32.gmra.mrb[68].mxu1 %vm267_vm1, %v6310_v19 }
  0xa7   : > { %5763 = vmatprep.mubr.msk.f32.mxu1 %vm267_vm1, %v6313_v20 }
  0xa8   : > { %5811 = vmatmul.mubr.msk.f32.gmra.mrb[68].mxu0 %vm267_vm1, %v6636_v56  ;;  %v8062_v56 = vld [vmem:[#allocation17_spill] sm:$0xff] }
  0xa9   : > { %5813 = vmatprep.mubr.msk.f32.mxu0 %vm267_vm1, %v6639_v55  ;;  %v8059_v55 = vld [vmem:[#allocation14_spill] sm:$0xff] }
  0xaa   : > { %5764 = vmatmul.mubr.msk.f32.gmra.mrb[70].mxu1 %vm267_vm1, %v6330_v23 }
  0xab   : > { %5766 = vmatprep.mubr.msk.f32.mxu1 %vm267_vm1, %v6333_v24 }
  0xac   : > { %5814 = vmatmul.mubr.msk.f32.gmra.mrb[70].mxu0 %vm267_vm1, %v6688_v7 }
  0xad   : > { %5816 = vmatprep.mubr.msk.f32.mxu0 %vm267_vm1, %v6691_v6 }
  0xae   : > { %5767 = vmatmul.mubr.msk.f32.gmra.mrb[72].mxu1 %vm267_vm1, %v6350_v27 }
  0xaf   : > { %5769 = vmatprep.mubr.msk.f32.mxu1 %vm267_vm1, %v6353_v28 }
  0xb0   : > { %5817 = vmatmul.mubr.msk.f32.gmra.mrb[72].mxu0 %vm267_vm1, %v6708_v48  ;;  %v8057_v48 = vld [vmem:[#allocation12_spill] sm:$0xff] }
  0xb1   : > { %5819 = vmatprep.mubr.msk.f32.mxu0 %vm267_vm1, %v6711_v47  ;;  %v4980_v47 = vld [vmem:[%s6231_s7 + $0x189] sm:$0xff] }
  0xb2   : > { %5770 = vmatmul.mubr.msk.f32.gmra.mrb[74].mxu1 %vm267_vm1, %v6370_v31 }
  0xb3   : > { %5772 = vmatprep.mubr.msk.f32.mxu1 %vm267_vm1, %v8052_v13 }
  0xb4   : > { %5820 = vmatmul.mubr.msk.f32.gmra.mrb[74].mxu0 %vm267_vm1, %v6728_v43  ;;  %v8054_v43 = vld [vmem:[#allocation9_spill] sm:$0xff] }
  0xb5   : > { %5822 = vmatprep.mubr.msk.f32.mxu0 %vm267_vm1, %v6731_v35  ;;  %v8055_v35 = vld [vmem:[#allocation10_spill] sm:$0xff] }
  0xb6   : > { %5773 = vmatmul.mubr.msk.f32.gmra.mrb[76].mxu1 %vm267_vm1, %v8053_v42 }
  0xb7   : > { %5775 = vmatprep.mubr.msk.f32.mxu1 %vm267_vm1, %v6892_v40 }
  0xb8   : > { %5823 = vmatmul.mubr.msk.f32.gmra.mrb[76].mxu0 %vm267_vm1, %v6748_v32  ;;  %v8056_v32 = vld [vmem:[#allocation11_spill] sm:$0xff] }
  0xb9   : > { %5825 = vmatprep.mubr.msk.f32.mxu0 %vm267_vm1, %v4979_v44  ;;  %v255_v44 = vld [vmem:[#allocation2 + $0xa0] sm:$0xff] }
  0xba   : > { %5776 = vmatmul.mubr.msk.f32.gmra.mrb[78].mxu1 %vm267_vm1, %v6904_v45 }
  0xbb   : > { %5830 = vmatprep.mubr.msk.f32.mxu1 %vm267_vm1, %v8054_v43 }
  0xbc   : > { %5826 = vmatmul.mubr.msk.f32.gmra.mrb[78].mxu0 %vm267_vm1, %v4980_v47 }
  0xbd   : > { %5880 = vmatprep.mubr.msk.f32.mxu0 %vm267_vm1, %v6283_v14  ;;  %v8058_v14 = vld [vmem:[#allocation13_spill] sm:$0xff] }
  0xbe   : > { %5831 = vmatmul.mubr.msk.f32.vlgmr.msra.gmra.mrb[80].mxu1 %vm267_vm1, %v8055_v35 }
  0xbf   : > { %5929 = vmatpush3.msk.msra.mxu1 %vm364_vm0, %v6768_v52  ;;  %5833 = vmatprep.mubr.msk.f32.mxu1 %vm267_vm1, %v8056_v32  ;;  %v5109_v52 = vld [vmem:[%s6231_s7 + $0x198] sm:$0xff] }
  0xc0   : > { %5881 = vmatmul.mubr.msk.f32.vlgmr.msra.gmra.mrb[80].mxu0 %vm267_vm1, %v6300_v17  ;;  %v8060_v17 = vld [vmem:[#allocation15_spill] sm:$0xff] }
  0xc1   : > { %5979 = vmatpush3.msk.msra.mxu0 %vm364_vm0, %v6779_v10  ;;  %5883 = vmatprep.mubr.msk.f32.mxu0 %vm267_vm1, %v6305_v18  ;;  %v8061_v18 = vld [vmem:[#allocation16_spill] sm:$0xff] }
  0xc2   : > { %5834 = vmatmul.mubr.msk.f32.gmra.mrb[82].mxu1 %vm267_vm1, %v8057_v48 }
  0xc3   : > { %5836 = vmatprep.mubr.msk.f32.mxu1 %vm267_vm1, %v8058_v14 }
  0xc4   : > { %5884 = vmatmul.mubr.msk.f32.gmra.mrb[82].mxu0 %vm267_vm1, %v6320_v21  ;;  %v8063_v21 = vld [vmem:[#allocation18_spill] sm:$0xff] }
  0xc5   : > { %5886 = vmatprep.mubr.msk.f32.mxu0 %vm267_vm1, %v6325_v22  ;;  %v8064_v22 = vld [vmem:[#allocation19_spill] sm:$0xff] }
  0xc6   : > { %5837 = vmatmul.mubr.msk.f32.gmra.mrb[84].mxu1 %vm267_vm1, %v8059_v55 }
  0xc7   : > { %5839 = vmatprep.mubr.msk.f32.mxu1 %vm267_vm1, %v8060_v17  ;;  %v240_v17 = vld [vmem:[#allocation2 + $0x28] sm:$0xff] }
  0xc8   : > { %5887 = vmatmul.mubr.msk.f32.gmra.mrb[84].mxu0 %vm267_vm1, %v6340_v25  ;;  %v8065_v25 = vld [vmem:[#allocation20_spill] sm:$0xff] }
  0xc9   : > { %5889 = vmatprep.mubr.msk.f32.mxu0 %vm267_vm1, %v6345_v26  ;;  %v8066_v26 = vld [vmem:[#allocation21_spill] sm:$0xff] }
  0xca   : > { %5840 = vmatmul.mubr.msk.f32.gmra.mrb[86].mxu1 %vm267_vm1, %v8061_v18  ;;  %v5110_v18 = vld [vmem:[%s6231_s7 + $0x1a0] sm:$0xff] }
  0xcb   : > { %5842 = vmatprep.mubr.msk.f32.mxu1 %vm267_vm1, %v8062_v56 }
  0xcc   : > { %5890 = vmatmul.mubr.msk.f32.gmra.mrb[86].mxu0 %vm267_vm1, %v6360_v29  ;;  %v8067_v29 = vld [vmem:[#allocation22_spill] sm:$0xff] }
  0xcd   : > { %5892 = vmatprep.mubr.msk.f32.mxu0 %vm267_vm1, %v6365_v30  ;;  %v8068_v30 = vld [vmem:[#allocation23_spill] sm:$0xff] }
  0xce   : > { %5843 = vmatmul.mubr.msk.f32.gmra.mrb[88].mxu1 %vm267_vm1, %v8063_v21 }
  0xcf   : > { %5845 = vmatprep.mubr.msk.f32.mxu1 %vm267_vm1, %v8064_v22  ;;  %v239_v22 = vld [vmem:[#allocation2 + $0x20] sm:$0xff] }
  0xd0   : > { %5893 = vmatmul.mubr.msk.f32.gmra.mrb[88].mxu0 %vm267_vm1, %v6380_v33  ;;  %v8069_v33 = vld [vmem:[#allocation24_spill] sm:$0xff] }
  0xd1   : > { %5895 = vmatprep.mubr.msk.f32.mxu0 %vm267_vm1, %v6385_v34  ;;  %v8070_v34 = vld [vmem:[#allocation25_spill] sm:$0xff] }
  0xd2   : > { %5846 = vmatmul.mubr.msk.f32.gmra.mrb[90].mxu1 %vm267_vm1, %v8065_v25 }
  0xd3   : > { %5848 = vmatprep.mubr.msk.f32.mxu1 %vm267_vm1, %v8066_v26  ;;  %v258_v26 = vld [vmem:[#allocation2 + $0xb8] sm:$0xff] }
  0xd4   : > { %5896 = vmatmul.mubr.msk.f32.gmra.mrb[90].mxu0 %vm267_vm1, %v6398_v37  ;;  %v8072_v37 = vld [vmem:[#allocation27_spill] sm:$0xff] }
  0xd5   : > { %5898 = vmatprep.mubr.msk.f32.mxu0 %vm267_vm1, %v6234_v3  ;;  %v8071_v3 = vld [vmem:[#allocation26_spill] sm:$0xff] }
  0xd6   : > { %5849 = vmatmul.mubr.msk.f32.gmra.mrb[92].mxu1 %vm267_vm1, %v8067_v29  ;;  %v257_v29 = vld [vmem:[#allocation2 + $0xb0] sm:$0xff] }
  0xd7   : > { %5851 = vmatprep.mubr.msk.f32.mxu1 %vm267_vm1, %v8068_v30 }
  0xd8   : > { %5899 = vmatmul.mubr.msk.f32.gmra.mrb[92].mxu0 %vm267_vm1, %v6237_v4  ;;  %v8073_v4 = vld [vmem:[#allocation28_spill] sm:$0xff] }
  0xd9   : > { %5901 = vmatprep.mubr.msk.f32.mxu0 %vm267_vm1, %v6240_v5  ;;  %v8074_v5 = vld [vmem:[#allocation29_spill] sm:$0xff] }
  0xda   : > { %5852 = vmatmul.mubr.msk.f32.gmra.mrb[94].mxu1 %vm267_vm1, %v8069_v33 }
  0xdb   : > { %5854 = vmatprep.mubr.msk.f32.mxu1 %vm267_vm1, %v8070_v34 }
  0xdc   : > { %5902 = vmatmul.mubr.msk.f32.gmra.mrb[94].mxu0 %vm267_vm1, %v6258_v9  ;;  %v8075_v9 = vld [vmem:[#allocation30_spill] sm:$0xff] }
  0xdd   : > { %5904 = vmatprep.mubr.msk.f32.mxu0 %vm267_vm1, %v6269_v12  ;;  %v8076_v12 = vld [vmem:[#allocation31_spill] sm:$0xff] }
  0xde   : > { %5855 = vmatmul.mubr.msk.f32.gmra.mrb[96].mxu1 %vm267_vm1, %v8071_v3 }
  0xdf   : > { %5857 = vmatprep.mubr.msk.f32.mxu1 %vm267_vm1, %v8072_v37  ;;  %v242_v37 = vld [vmem:[#allocation2 + $0x38] sm:$0xff] }
  0xe0   : > { %5905 = vmatmul.mubr.msk.f32.gmra.mrb[96].mxu0 %vm267_vm1, %v6290_v15  ;;  %v8077_v15 = vld [vmem:[#allocation32_spill] sm:$0xff] }
  0xe1   : > { %5907 = vmatprep.mubr.msk.f32.mxu0 %vm267_vm1, %v6293_v16  ;;  %v8078_v16 = vld [vmem:[#allocation33_spill] sm:$0xff] }
  0xe2   : > { %5858 = vmatmul.mubr.msk.f32.gmra.mrb[98].mxu1 %vm267_vm1, %v8073_v4 }
  0xe3   : > { %5860 = vmatprep.mubr.msk.f32.mxu1 %vm267_vm1, %v8074_v5  ;;  %v241_v5 = vld [vmem:[#allocation2 + $0x30] sm:$0xff] }
  0xe4   : > { %5908 = vmatmul.mubr.msk.f32.gmra.mrb[98].mxu0 %vm267_vm1, %v6310_v19  ;;  %v8079_v19 = vld [vmem:[#allocation34_spill] sm:$0xff] }
  0xe5   : > { %5910 = vmatprep.mubr.msk.f32.mxu0 %vm267_vm1, %v6313_v20  ;;  %v252_v20 = vld [vmem:[#allocation2 + $0x88] sm:$0xff] }
  0xe6   : > { %5861 = vmatmul.mubr.msk.f32.gmra.mrb[100].mxu1 %vm267_vm1, %v8075_v9 }
  0xe7   : > { %5863 = vmatprep.mubr.msk.f32.mxu1 %vm267_vm1, %v8076_v12  ;;  %v260_v12 = vld [vmem:[#allocation2 + $0xc8] sm:$0xff] }
  0xe8   : > { %5911 = vmatmul.mubr.msk.f32.gmra.mrb[100].mxu0 %vm267_vm1, %v6330_v23  ;;  %v251_v23 = vld [vmem:[#allocation2 + $0x80] sm:$0xff] }
  0xe9   : > { %5913 = vmatprep.mubr.msk.f32.mxu0 %vm267_vm1, %v6333_v24 }
  0xea   : > { %5864 = vmatmul.mubr.msk.f32.gmra.mrb[102].mxu1 %vm267_vm1, %v8077_v15 }
  0xeb   : > { %5866 = vmatprep.mubr.msk.f32.mxu1 %vm267_vm1, %v8078_v16 }
  0xec   : > { %5914 = vmatmul.mubr.msk.f32.gmra.mrb[102].mxu0 %vm267_vm1, %v6350_v27 }
  0xed   : > { %5916 = vmatprep.mubr.msk.f32.mxu0 %vm267_vm1, %v6353_v28  ;;  %v8080_v28 = vld [vmem:[#allocation35_spill] sm:$0xff] }
  0xee   : > { %5867 = vmatmul.mubr.msk.f32.gmra.mrb[104].mxu1 %vm267_vm1, %v8079_v19 }
  0xef   : > { %5869 = vmatprep.mubr.msk.f32.mxu1 %vm267_vm1, %v6723_v36  ;;  %v238_v36 = vld [vmem:[#allocation2 + $0x18] sm:$0xff] }
  0xf0   : > { %5917 = vmatmul.mubr.msk.f32.gmra.mrb[104].mxu0 %vm267_vm1, %v6370_v31  ;;  %v253_v31 = vld [vmem:[#allocation2 + $0x90] sm:$0xff] }
  0xf1   : > { %v5606_v24 = vpop.f32.mrb[0].mxu1  ;;  %5919 = vmatprep.mubr.msk.f32.mxu0 %vm267_vm1, %v8052_v13  ;;  %v256_v13 = vld [vmem:[#allocation2 + $0xa8] sm:$0xff] }
  0xf2   : > { %v610_v27 = vadd.f32 %v5606_v24, %v252_v20  ;;  %v514_v60 = vpop.f32.mrb[1].mxu1  ;;  %5870 = vmatmul.mubr.msk.f32.gmra.mrb[106].mxu1 %vm267_vm1, %v8080_v28 }
  0xf3   : > { %v609_v63 = vadd.f32 %v514_v60, %v251_v23  ;;  %5872 = vmatprep.mubr.msk.f32.mxu1 %vm267_vm1, %v6743_v51  ;;  %v5582_v1 = vpop.f32.mrb[0].mxu0  ;;  %v244_v23 = vld [vmem:[#allocation2 + $0x48] sm:$0xff] }
  0xf4   : > { %642 = vst.msk [vmem:[#allocation2 + $0x88] sm:$0xff] %vm169_vm2, %v610_v27  ;;  %v594_v6 = vadd.f32 %v5582_v1, %v236_v59  ;;  %v434_v7 = vpop.f32.mrb[1].mxu0  ;;  %5920 = vmatmul.mubr.msk.f32.gmra.mrb[106].mxu0 %vm267_vm1, %v8053_v42  ;;  %v7045_v42 = vld [vmem:[%s6231_s7 + $0x18a] sm:$0xff]  ;;  %v243_v59 = vld [vmem:[#allocation2 + $0x40] sm:$0xff]  ;;  %v246_v1 = vld [vmem:[#allocation2 + $0x58] sm:$0xff] }
  0xf5   : > { %641 = vst.msk [vmem:[#allocation2 + $0x80] sm:$0xff] %vm169_vm2, %v609_v63  ;;  %v5609_v8 = vpop.f32.mrb[2].mxu1  ;;  %v593_v11 = vadd.f32 %v434_v7, %v235_v62  ;;  %5922 = vmatprep.mubr.msk.f32.mxu0 %vm267_vm1, %v6892_v40  ;;  %v5213_v27 = vld [vmem:[%s6231_s7 + $0x62] sm:$0xff]  ;;  %v245_v7 = vld [vmem:[#allocation2 + $0x50] sm:$0xff] }
  0xf6   : > { %v612_v51 = vadd.f32 %v5609_v8, %v254_v0  ;;  %v524_v39 = vpop.f32.mrb[3].mxu1  ;;  %5873 = vmatmul.mubr.msk.f32.gmra.mrb[108].mxu1 %vm267_vm1, %v6755_v38  ;;  %626 = vst.msk [vmem:[#allocation2 + $0x8] sm:$0xff] %vm169_vm2, %v594_v6  ;;  %v5215_v8 = vld [vmem:[%s6231_s7 + $0x7a] sm:$0xff] }
  0xf7   : > { %v611_v10 = vadd.f32 %v524_v39, %v253_v31  ;;  %5875 = vmatprep.mubr.msk.f32.mxu1 %vm267_vm1, %v7031_v2  ;;  %625 = vst.msk [vmem:[#allocation2] sm:$0xff] %vm169_vm2, %v593_v11  ;;  %v5585_v40 = vpop.f32.mrb[2].mxu0  ;;  %v5152_v39 = vld [vmem:[%s6231_s7 + $0x91] sm:$0xff] }
  0xf8   : > { %644 = vst.msk [vmem:[#allocation2 + $0x98] sm:$0xff] %vm169_vm2, %v612_v51  ;;  %v596_v47 = vadd.f32 %v5585_v40, %v238_v36  ;;  %v444_v38 = vpop.f32.mrb[3].mxu0  ;;  %5923 = vmatmul.mubr.msk.f32.gmra.mrb[108].mxu0 %vm267_vm1, %v6904_v45  ;;  %v263_v51 = vld [vmem:[#allocation2 + $0xe0] sm:$0xff] }
  0xf9   : > { %643 = vst.msk [vmem:[#allocation2 + $0x90] sm:$0xff] %vm169_vm2, %v611_v10  ;;  %v5612_v43 = vpop.f32.mrb[4].mxu1  ;;  %v595_v35 = vadd.f32 %v444_v38, %v237_v41  ;;  %5925 = vmatprep.mubr.msk.f32.mxu0 %vm267_vm1, %v5109_v52  ;;  %v5217_v38 = vld [vmem:[%s6231_s7 + $0x92] sm:$0xff] }
  0xfa   : > { %v614_v56 = vadd.f32 %v5612_v43, %v256_v13  ;;  %v534_v21 = vpop.f32.mrb[5].mxu1  ;;  %5876 = vmatmul.mubr.msk.f32.gmra.mrb[110].mxu1 %vm267_vm1, %v7045_v42  ;;  %628 = vst.msk [vmem:[#allocation2 + $0x18] sm:$0xff] %vm169_vm2, %v596_v47  ;;  %v248_v13 = vld [vmem:[#allocation2 + $0x68] sm:$0xff]  ;;  %v247_v47 = vld [vmem:[#allocation2 + $0x60] sm:$0xff] }
  0xfb   : > { %v613_v25 = vadd.f32 %v534_v21, %v255_v44  ;;  %5930 = vmatprep.mubr.msk.f32.mxu1 %vm267_vm1, %v6434_v46  ;;  %627 = vst.msk [vmem:[#allocation2 + $0x10] sm:$0xff] %vm169_vm2, %v595_v35  ;;  %v5588_v45 = vpop.f32.mrb[4].mxu0  ;;  %v266_v35 = vld [vmem:[#allocation2 + $0xf8] sm:$0xff]  ;;  %v5154_v21 = vld [vmem:[%s6231_s7 + $0xa9] sm:$0xff] }
  0xfc   : > { %646 = vst.msk [vmem:[#allocation2 + $0xa8] sm:$0xff] %vm169_vm2, %v614_v56  ;;  %v598_v30 = vadd.f32 %v5588_v45, %v240_v17  ;;  %v454_v33 = vpop.f32.mrb[5].mxu0  ;;  %5926 = vmatmul.mubr.msk.f32.gmra.mrb[110].mxu0 %vm267_vm1, %v5110_v18  ;;  %v5153_v17 = vld [vmem:[%s6231_s7 + $0x99] sm:$0xff]  ;;  %v265_v56 = vld [vmem:[#allocation2 + $0xf0] sm:$0xff] }
  0xfd   : > { %645 = vst.msk [vmem:[#allocation2 + $0xa0] sm:$0xff] %vm169_vm2, %v613_v25  ;;  %v5615_v34 = vpop.f32.mrb[6].mxu1  ;;  %v597_v3 = vadd.f32 %v454_v33, %v239_v22  ;;  %5980 = vmatprep.mubr.msk.f32.mxu0 %vm267_vm1, %v8056_v32  ;;  %v259_v32 = vld [vmem:[#allocation2 + $0xc0] sm:$0xff]  ;;  %v250_v45 = vld [vmem:[#allocation2 + $0x78] sm:$0xff] }
  0xfe   : > { %v616_v4 = vadd.f32 %v5615_v34, %v258_v26  ;;  %v544_v46 = vpop.f32.mrb[7].mxu1  ;;  %5931 = vmatmul.mubr.msk.f32.vlgmr.msra.gmra.mrb[112].mxu1 %vm267_vm1, %v6456_v49  ;;  %630 = vst.msk [vmem:[#allocation2 + $0x28] sm:$0xff] %vm169_vm2, %v598_v30  ;;  %v249_v34 = vld [vmem:[#allocation2 + $0x70] sm:$0xff] }
  0xff   : > { %v615_v9 = vadd.f32 %v544_v46, %v257_v29  ;;  %5933 = vmatprep.mubr.msk.f32.mxu1 %vm267_vm1, %v6459_v50  ;;  %629 = vst.msk [vmem:[#allocation2 + $0x20] sm:$0xff] %vm169_vm2, %v597_v3  ;;  %v5591_v15 = vpop.f32.mrb[6].mxu0  ;;  %v5218_v29 = vld [vmem:[%s6231_s7 + $0x9a] sm:$0xff]  ;;  %v5219_v3 = vld [vmem:[%s6231_s7 + $0xaa] sm:$0xff] }
 0x100   : > { %648 = vst.msk [vmem:[#allocation2 + $0xb8] sm:$0xff] %vm169_vm2, %v616_v4  ;;  %v600_v16 = vadd.f32 %v5591_v15, %v242_v37  ;;  %v464_v19 = vpop.f32.mrb[7].mxu0  ;;  %5981 = vmatmul.mubr.msk.f32.vlgmr.msra.gmra.mrb[112].mxu0 %vm267_vm1, %v8057_v48  ;;  %v262_v48 = vld [vmem:[#allocation2 + $0xd8] sm:$0xff]  ;;  %v691_v15 = vld [vmem:[#allocation2 + $0x8] sm:$0xff] }
 0x101   : > { %647 = vst.msk [vmem:[#allocation2 + $0xb0] sm:$0xff] %vm169_vm2, %v615_v9  ;;  %v5618_v49 = vpop.f32.mrb[8].mxu1  ;;  %v599_v20 = vadd.f32 %v464_v19, %v241_v5  ;;  %5983 = vmatprep.mubr.msk.f32.mxu0 %vm267_vm1, %v8058_v14  ;;  %v261_v14 = vld [vmem:[#allocation2 + $0xd0] sm:$0xff]  ;;  %v5156_v5 = vld [vmem:[%s6231_s7 + $0xc1] sm:$0xff] }
 0x102   : > { %v618_v50 = vadd.f32 %v5618_v49, %v260_v12  ;;  %v554_v24 = vpop.f32.mrb[9].mxu1  ;;  %5934 = vmatmul.mubr.msk.f32.gmra.mrb[114].mxu1 %vm267_vm1, %v6476_v53  ;;  %632 = vst.msk [vmem:[#allocation2 + $0x38] sm:$0xff] %vm169_vm2, %v600_v16  ;;  %v5155_v4 = vld [vmem:[%s6231_s7 + $0xb1] sm:$0xff] }
 0x103   : > { %v617_v60 = vadd.f32 %v554_v24, %v259_v32  ;;  %5936 = vmatprep.mubr.msk.f32.mxu1 %vm267_vm1, %v6479_v54  ;;  %631 = vst.msk [vmem:[#allocation2 + $0x30] sm:$0xff] %vm169_vm2, %v599_v20  ;;  %v5594_v28 = vpop.f32.mrb[8].mxu0  ;;  %v5214_v54 = vld [vmem:[%s6231_s7 + $0x6a] sm:$0xff]  ;;  %v5220_v19 = vld [vmem:[%s6231_s7 + $0xb2] sm:$0xff]  ;;  %v690_v20 = vld [vmem:[#allocation2] sm:$0xff] }
 0x104   : > { %650 = vst.msk [vmem:[#allocation2 + $0xc8] sm:$0xff] %vm169_vm2, %v618_v50  ;;  %v602_v62 = vadd.f32 %v5594_v28, %v244_v23  ;;  %v474_v63 = vpop.f32.mrb[9].mxu0  ;;  %5984 = vmatmul.mubr.msk.f32.gmra.mrb[114].mxu0 %vm267_vm1, %v8059_v55  ;;  %v264_v55 = vld [vmem:[#allocation2 + $0xe8] sm:$0xff]  ;;  %v693_v28 = vld [vmem:[#allocation2 + $0x18] sm:$0xff] }
 0x105   : > { %649 = vst.msk [vmem:[#allocation2 + $0xc0] sm:$0xff] %vm169_vm2, %v617_v60  ;;  %v5621_v53 = vpop.f32.mrb[10].mxu1  ;;  %v601_v0 = vadd.f32 %v474_v63, %v243_v59  ;;  %5986 = vmatprep.mubr.msk.f32.mxu0 %vm267_vm1, %v5213_v27  ;;  %v5221_v50 = vld [vmem:[%s6231_s7 + $0xc2] sm:$0xff]  ;;  %v5158_v60 = vld [vmem:[%s6231_s7 + $0xd9] sm:$0xff] }
 0x106   : > { %v620_v31 = vadd.f32 %v5621_v53, %v262_v48  ;;  %v564_v6 = vpop.f32.mrb[11].mxu1  ;;  %5937 = vmatmul.mubr.msk.f32.gmra.mrb[116].mxu1 %vm267_vm1, %v6496_v57  ;;  %634 = vst.msk [vmem:[#allocation2 + $0x48] sm:$0xff] %vm169_vm2, %v602_v62  ;;  %v5157_v59 = vld [vmem:[%s6231_s7 + $0xc9] sm:$0xff] }
 0x107   : > { %v619_v11 = vadd.f32 %v564_v6, %v261_v14  ;;  %5939 = vmatprep.mubr.msk.f32.mxu1 %vm267_vm1, %v6499_v58  ;;  %633 = vst.msk [vmem:[#allocation2 + $0x40] sm:$0xff] %vm169_vm2, %v601_v0  ;;  %v5597_v36 = vpop.f32.mrb[10].mxu0  ;;  %v5216_v58 = vld [vmem:[%s6231_s7 + $0x82] sm:$0xff]  ;;  %v5222_v62 = vld [vmem:[%s6231_s7 + $0xca] sm:$0xff] }
 0x108   : > { %652 = vst.msk [vmem:[#allocation2 + $0xd8] sm:$0xff] %vm169_vm2, %v620_v31  ;;  %v604_v41 = vadd.f32 %v5597_v36, %v246_v1  ;;  %v484_v57 = vpop.f32.mrb[11].mxu0  ;;  %5987 = vmatmul.mubr.msk.f32.gmra.mrb[116].mxu0 %vm267_vm1, %v5214_v54  ;;  %v692_v53 = vld [vmem:[#allocation2 + $0x10] sm:$0xff]  ;;  %v5223_v1 = vld [vmem:[%s6231_s7 + $0xda] sm:$0xff]  ;;  %v5224_v36 = vld [vmem:[%s6231_s7 + $0xe2] sm:$0xff] }
 0x109   : > { %651 = vst.msk [vmem:[#allocation2 + $0xd0] sm:$0xff] %vm169_vm2, %v619_v11  ;;  %v5624_v52 = vpop.f32.mrb[12].mxu1  ;;  %v603_v10 = vadd.f32 %v484_v57, %v245_v7  ;;  %5989 = vmatprep.mubr.msk.f32.mxu0 %vm267_vm1, %v5215_v8  ;;  %v5159_v31 = vld [vmem:[%s6231_s7 + $0xe1] sm:$0xff]  ;;  %v5160_v7 = vld [vmem:[%s6231_s7 + $0xf1] sm:$0xff] }
 0x10a   : > { %v622_v40 = vadd.f32 %v5624_v52, %v264_v55  ;;  %v574_v44 = vpop.f32.mrb[13].mxu1  ;;  %5940 = vmatmul.mubr.msk.f32.gmra.mrb[118].mxu1 %vm267_vm1, %v6516_v61  ;;  %636 = vst.msk [vmem:[#allocation2 + $0x58] sm:$0xff] %vm169_vm2, %v604_v41  ;;  %v695_v11 = vld [vmem:[#allocation2 + $0x28] sm:$0xff]  ;;  %v5225_v57 = vld [vmem:[%s6231_s7 + $0xf2] sm:$0xff] }
 0x10b   : > { %v621_v43 = vadd.f32 %v574_v44, %v263_v51  ;;  %5942 = vmatprep.mubr.msk.f32.mxu1 %vm267_vm1, %v5152_v39  ;;  %635 = vst.msk [vmem:[#allocation2 + $0x50] sm:$0xff] %vm169_vm2, %v603_v10  ;;  %v5600_v18 = vpop.f32.mrb[12].mxu0  ;;  %v694_v39 = vld [vmem:[#allocation2 + $0x20] sm:$0xff] }
 0x10c   : > { %654 = vst.msk [vmem:[#allocation2 + $0xe8] sm:$0xff] %vm169_vm2, %v622_v40  ;;  %v606_v22 = vadd.f32 %v5600_v18, %v248_v13  ;;  %v494_v61 = vpop.f32.mrb[13].mxu0  ;;  %5990 = vmatmul.mubr.msk.f32.gmra.mrb[118].mxu0 %vm267_vm1, %v5216_v58  ;;  %v5161_v13 = vld [vmem:[%s6231_s7 + $0xf9] sm:$0xff] }
 0x10d   : > { %653 = vst.msk [vmem:[#allocation2 + $0xe0] sm:$0xff] %vm169_vm2, %v621_v43  ;;  %v5627_v25 = vpop.f32.mrb[14].mxu1  ;;  %v605_v26 = vadd.f32 %v494_v61, %v247_v47  ;;  %5992 = vmatprep.mubr.msk.f32.mxu0 %vm267_vm1, %v5217_v38  ;;  %v5162_v47 = vld [vmem:[%s6231_s7 + $0x109] sm:$0xff]  ;;  %v5226_v18 = vld [vmem:[%s6231_s7 + $0xfa] sm:$0xff] }
 0x10e   : > { %v624_v30 = vadd.f32 %v5627_v25, %v266_v35  ;;  %v584_v33 = vpop.f32.mrb[15].mxu1  ;;  %5943 = vmatmul.mubr.msk.f32.gmra.mrb[120].mxu1 %vm267_vm1, %v5153_v17  ;;  %638 = vst.msk [vmem:[#allocation2 + $0x68] sm:$0xff] %vm169_vm2, %v606_v22  ;;  %v697_v35 = vld [vmem:[#allocation2 + $0x38] sm:$0xff]  ;;  %v5227_v61 = vld [vmem:[%s6231_s7 + $0x10a] sm:$0xff] }
 0x10f   : > { %v623_v37 = vadd.f32 %v584_v33, %v265_v56  ;;  %5945 = vmatprep.mubr.msk.f32.mxu1 %vm267_vm1, %v5154_v21  ;;  %637 = vst.msk [vmem:[#allocation2 + $0x60] sm:$0xff] %vm169_vm2, %v605_v26  ;;  %v5603_v46 = vpop.f32.mrb[14].mxu0  ;;  %v696_v21 = vld [vmem:[#allocation2 + $0x30] sm:$0xff] }
 0x110   : > { %656 = vst.msk [vmem:[#allocation2 + $0xf8] sm:$0xff] %vm169_vm2, %v624_v30  ;;  %v608_v9 = vadd.f32 %v5603_v46, %v250_v45  ;;  %v504_v12 = vpop.f32.mrb[15].mxu0  ;;  %5993 = vmatmul.mubr.msk.f32.gmra.mrb[120].mxu0 %vm267_vm1, %v5218_v29  ;;  %v5163_v45 = vld [vmem:[%s6231_s7 + $0x111] sm:$0xff] }
 0x111   : > { %655 = vst.msk [vmem:[#allocation2 + $0xf0] sm:$0xff] %vm169_vm2, %v623_v37  ;;  %v5632_v32 = vpop.f32.mrb[16].mxu1  ;;  %v607_v16 = vadd.f32 %v504_v12, %v249_v34  ;;  %5995 = vmatprep.mubr.msk.f32.mxu0 %vm267_vm1, %v5219_v3  ;;  %v5164_v34 = vld [vmem:[%s6231_s7 + $0x121] sm:$0xff] }
 0x112   : > { %v1047_v49 = vadd.f32 %v5632_v32, %v691_v15  ;;  %v887_v23 = vpop.f32.mrb[17].mxu1  ;;  %5946 = vmatmul.mubr.msk.f32.gmra.mrb[122].mxu1 %vm267_vm1, %v5155_v4  ;;  %640 = vst.msk [vmem:[#allocation2 + $0x78] sm:$0xff] %vm169_vm2, %v608_v9  ;;  %v699_v4 = vld [vmem:[#allocation2 + $0x48] sm:$0xff]  ;;  %v698_v12 = vld [vmem:[#allocation2 + $0x40] sm:$0xff] }
 0x113   : > { %v1046_v24 = vadd.f32 %v887_v23, %v690_v20  ;;  %5948 = vmatprep.mubr.msk.f32.mxu1 %vm267_vm1, %v5156_v5  ;;  %639 = vst.msk [vmem:[#allocation2 + $0x70] sm:$0xff] %vm169_vm2, %v607_v16  ;;  %v5682_v27 = vpop.f32.mrb[16].mxu0  ;;  %v5228_v5 = vld [vmem:[%s6231_s7 + $0x112] sm:$0xff]  ;;  %v5229_v32 = vld [vmem:[%s6231_s7 + $0x122] sm:$0xff] }
 0x114   : > { %1079 = vst.msk [vmem:[#allocation2 + $0x8] sm:$0xff] %vm169_vm2, %v1047_v49  ;;  %v1340_v48 = vpop.f32.mrb[17].mxu0  ;;  %5996 = vmatmul.mubr.msk.f32.gmra.mrb[122].mxu0 %vm267_vm1, %v5220_v19  ;;  %v5165_v49 = vld [vmem:[%s6231_s7 + $0x129] sm:$0xff] }
 0x115   : > { %1078 = vst.msk [vmem:[#allocation2] sm:$0xff] %vm169_vm2, %v1046_v24  ;;  %v5635_v14 = vpop.f32.mrb[18].mxu1  ;;  %5998 = vmatprep.mubr.msk.f32.mxu0 %vm267_vm1, %v5221_v50  ;;  %v5166_v24 = vld [vmem:[%s6231_s7 + $0x139] sm:$0xff] }
 0x116   : > { %v1049_v63 = vadd.f32 %v5635_v14, %v693_v28  ;;  %v897_v0 = vpop.f32.mrb[19].mxu1  ;;  %5949 = vmatmul.mubr.msk.f32.gmra.mrb[124].mxu1 %vm267_vm1, %v5157_v59  ;;  %v5230_v28 = vld [vmem:[%s6231_s7 + $0x12a] sm:$0xff] }
 0x117   : > { %v1048_v54 = vadd.f32 %v897_v0, %v692_v53  ;;  %5951 = vmatprep.mubr.msk.f32.mxu1 %vm267_vm1, %v5158_v60  ;;  %v5685_v6 = vpop.f32.mrb[18].mxu0  ;;  %v701_v60 = vld [vmem:[#allocation2 + $0x58] sm:$0xff] }
 0x118   : > { %1081 = vst.msk [vmem:[#allocation2 + $0x18] sm:$0xff] %vm169_vm2, %v1049_v63  ;;  %v1350_v8 = vpop.f32.mrb[19].mxu0  ;;  %5999 = vmatmul.mubr.msk.f32.gmra.mrb[124].mxu0 %vm267_vm1, %v5222_v62  ;;  %v700_v62 = vld [vmem:[#allocation2 + $0x50] sm:$0xff]  ;;  %v5231_v53 = vld [vmem:[%s6231_s7 + $0x13a] sm:$0xff] }
 0x119   : > { %1080 = vst.msk [vmem:[#allocation2 + $0x10] sm:$0xff] %vm169_vm2, %v1048_v54  ;;  %v5638_v55 = vpop.f32.mrb[20].mxu1  ;;  %6001 = vmatprep.mubr.msk.f32.mxu0 %vm267_vm1, %v5223_v1  ;;  %v5167_v54 = vld [vmem:[%s6231_s7 + $0x141] sm:$0xff] }
 0x11a   : > { %v1051_v51 = vadd.f32 %v5638_v55, %v695_v11  ;;  %v907_v41 = vpop.f32.mrb[21].mxu1  ;;  %5952 = vmatmul.mubr.msk.f32.gmra.mrb[126].mxu1 %vm267_vm1, %v5159_v31 }
 0x11b   : > { %v1050_v52 = vadd.f32 %v907_v41, %v694_v39  ;;  %v1144_v10 = vld [vmem:[#allocation2 + $0x8] sm:$0xff]  ;;  %5954 = vmatprep.mubr.msk.f32.mxu1 %vm267_vm1, %v5160_v7  ;;  %v5688_v58 = vpop.f32.mrb[20].mxu0 }
 0x11c   : > { %1083 = vst.msk [vmem:[#allocation2 + $0x28] sm:$0xff] %vm169_vm2, %v1051_v51  ;;  %v1500_v40 = vadd.f32 %v5682_v27, %v1144_v10  ;;  %v1143_v44 = vld [vmem:[#allocation2] sm:$0xff]  ;;  %v1360_v38 = vpop.f32.mrb[21].mxu0  ;;  %6002 = vmatmul.mubr.msk.f32.gmra.mrb[126].mxu0 %vm267_vm1, %v5224_v36  ;;  %v703_v36 = vld [vmem:[#allocation2 + $0x68] sm:$0xff]  ;;  %v5233_v10 = vld [vmem:[%s6231_s7 + $0x152] sm:$0xff] }
 0x11d   : > { %1082 = vst.msk [vmem:[#allocation2 + $0x20] sm:$0xff] %vm169_vm2, %v1050_v52  ;;  %v1499_v43 = vadd.f32 %v1340_v48, %v1143_v44  ;;  %v5641_v17 = vpop.f32.mrb[22].mxu1  ;;  %6004 = vmatprep.mubr.msk.f32.mxu0 %vm267_vm1, %v5225_v57  ;;  %v5232_v39 = vld [vmem:[%s6231_s7 + $0x142] sm:$0xff] }
 0x11e   : > { %1532 = vst.msk [vmem:[#allocation2 + $0x8] sm:$0xff] %vm169_vm2, %v1500_v40  ;;  %v1053_v56 = vadd.f32 %v5641_v17, %v697_v35  ;;  %v917_v22 = vpop.f32.mrb[23].mxu1  ;;  %5955 = vmatmul.mubr.msk.f32.gmra.mrb[128].mxu1 %vm267_vm1, %v5161_v13  ;;  %v702_v57 = vld [vmem:[#allocation2 + $0x60] sm:$0xff] }
 0x11f   : > { %1531 = vst.msk [vmem:[#allocation2] sm:$0xff] %vm169_vm2, %v1499_v43  ;;  %v1052_v25 = vadd.f32 %v917_v22, %v696_v21  ;;  %v1146_v26 = vld [vmem:[#allocation2 + $0x18] sm:$0xff]  ;;  %5957 = vmatprep.mubr.msk.f32.mxu1 %vm267_vm1, %v5162_v47  ;;  %v5691_v29 = vpop.f32.mrb[22].mxu0  ;;  %v5170_v43 = vld [vmem:[%s6231_s7 + $0x169] sm:$0xff] }
 0x120   : > { %1085 = vst.msk [vmem:[#allocation2 + $0x38] sm:$0xff] %vm169_vm2, %v1053_v56  ;;  %v1502_v30 = vadd.f32 %v5685_v6, %v1146_v26  ;;  %v1145_v33 = vld [vmem:[#allocation2 + $0x10] sm:$0xff]  ;;  %v1370_v3 = vpop.f32.mrb[23].mxu0  ;;  %6005 = vmatmul.mubr.msk.f32.gmra.mrb[128].mxu0 %vm267_vm1, %v5226_v18  ;;  %v5169_v40 = vld [vmem:[%s6231_s7 + $0x159] sm:$0xff] }
 0x121   : > { %1084 = vst.msk [vmem:[#allocation2 + $0x30] sm:$0xff] %vm169_vm2, %v1052_v25  ;;  %v1501_v37 = vadd.f32 %v1350_v8, %v1145_v33  ;;  %v5644_v46 = vpop.f32.mrb[24].mxu1  ;;  %6007 = vmatprep.mubr.msk.f32.mxu0 %vm267_vm1, %v5227_v61  ;;  %v5168_v8 = vld [vmem:[%s6231_s7 + $0x151] sm:$0xff]  ;;  %v5234_v21 = vld [vmem:[%s6231_s7 + $0x15a] sm:$0xff] }
 0x122   : > { %1534 = vst.msk [vmem:[#allocation2 + $0x18] sm:$0xff] %vm169_vm2, %v1502_v30  ;;  %v1055_v9 = vadd.f32 %v5644_v46, %v699_v4  ;;  %v927_v15 = vpop.f32.mrb[25].mxu1  ;;  %5958 = vmatmul.mubr.msk.f32.gmra.mrb[130].mxu1 %vm267_vm1, %v5163_v45  ;;  %v705_v18 = vld [vmem:[#allocation2 + $0x78] sm:$0xff]  ;;  %v704_v61 = vld [vmem:[#allocation2 + $0x70] sm:$0xff] }
 0x123   : > { %1533 = vst.msk [vmem:[#allocation2 + $0x10] sm:$0xff] %vm169_vm2, %v1501_v37  ;;  %v1054_v16 = vadd.f32 %v927_v15, %v698_v12  ;;  %v1148_v19 = vld [vmem:[#allocation2 + $0x28] sm:$0xff]  ;;  %5960 = vmatprep.mubr.msk.f32.mxu1 %vm267_vm1, %v5164_v34  ;;  %v5694_v20 = vpop.f32.mrb[24].mxu0  ;;  %v5171_v30 = vld [vmem:[%s6231_s7 + $0x171] sm:$0xff] }
 0x124   : > { %1087 = vst.msk [vmem:[#allocation2 + $0x48] sm:$0xff] %vm169_vm2, %v1055_v9  ;;  %v1504_v23 = vadd.f32 %v5688_v58, %v1148_v19  ;;  %v1147_v50 = vld [vmem:[#allocation2 + $0x20] sm:$0xff]  ;;  %v1380_v59 = vpop.f32.mrb[25].mxu0  ;;  %6008 = vmatmul.mubr.msk.f32.gmra.mrb[130].mxu0 %vm267_vm1, %v5228_v5  ;;  %v5235_v26 = vld [vmem:[%s6231_s7 + $0x16a] sm:$0xff]  ;;  %v5236_v12 = vld [vmem:[%s6231_s7 + $0x172] sm:$0xff] }
 0x125   : > { %1086 = vst.msk [vmem:[#allocation2 + $0x40] sm:$0xff] %vm169_vm2, %v1054_v16  ;;  %v1503_v27 = vadd.f32 %v1360_v38, %v1147_v50  ;;  %v5647_v48 = vpop.f32.mrb[26].mxu1  ;;  %6010 = vmatprep.mubr.msk.f32.mxu0 %vm267_vm1, %v5229_v32  ;;  %v5172_v37 = vld [vmem:[%s6231_s7 + $0x181] sm:$0xff] }
 0x126   : > { %1536 = vst.msk [vmem:[#allocation2 + $0x28] sm:$0xff] %vm169_vm2, %v1504_v23  ;;  %v1057_v14 = vadd.f32 %v5647_v48, %v701_v60  ;;  %v937_v63 = vpop.f32.mrb[27].mxu1  ;;  %5961 = vmatmul.mubr.msk.f32.gmra.mrb[132].mxu1 %vm267_vm1, %v5165_v49  ;;  %v707_v5 = vld [vmem:[#allocation2 + $0x88] sm:$0xff]  ;;  %v706_v32 = vld [vmem:[#allocation2 + $0x80] sm:$0xff]  ;;  %v709_v48 = vld [vmem:[#allocation2 + $0x98] sm:$0xff] }
 0x127   : > { %1535 = vst.msk [vmem:[#allocation2 + $0x20] sm:$0xff] %vm169_vm2, %v1503_v27  ;;  %v1056_v0 = vadd.f32 %v937_v63, %v700_v62  ;;  %v1150_v1 = vld [vmem:[#allocation2 + $0x38] sm:$0xff]  ;;  %5963 = vmatprep.mubr.msk.f32.mxu1 %vm267_vm1, %v5166_v24  ;;  %v5697_v31 = vpop.f32.mrb[26].mxu0  ;;  %v708_v62 = vld [vmem:[#allocation2 + $0x90] sm:$0xff] }
 0x128   : > { %1089 = vst.msk [vmem:[#allocation2 + $0x58] sm:$0xff] %vm169_vm2, %v1057_v14  ;;  %v1506_v6 = vadd.f32 %v5691_v29, %v1150_v1  ;;  %v1149_v7 = vld [vmem:[#allocation2 + $0x30] sm:$0xff]  ;;  %v1390_v11 = vpop.f32.mrb[27].mxu0  ;;  %6011 = vmatmul.mubr.msk.f32.gmra.mrb[132].mxu0 %vm267_vm1, %v5230_v28 }
 0x129   : > { %1088 = vst.msk [vmem:[#allocation2 + $0x50] sm:$0xff] %vm169_vm2, %v1056_v0  ;;  %v1505_v55 = vadd.f32 %v1370_v3, %v1149_v7  ;;  %v5650_v51 = vpop.f32.mrb[28].mxu1  ;;  %6013 = vmatprep.mubr.msk.f32.mxu0 %vm267_vm1, %v5231_v53  ;;  %v5239_v53 = vld [vmem:[%s6231_s7 + $0x19a] sm:$0xff] }
 0x12a   : > { %1538 = vst.msk [vmem:[#allocation2 + $0x38] sm:$0xff] %vm169_vm2, %v1506_v6  ;;  %v1059_v41 = vadd.f32 %v5650_v51, %v703_v36  ;;  %v947_v52 = vpop.f32.mrb[29].mxu1  ;;  %5964 = vmatmul.mubr.msk.f32.gmra.mrb[134].mxu1 %vm267_vm1, %v5167_v54  ;;  %v5175_v54 = vld [vmem:[%s6231_s7 + $0x1a1] sm:$0xff] }
 0x12b   : > { %1537 = vst.msk [vmem:[#allocation2 + $0x30] sm:$0xff] %vm169_vm2, %v1505_v55  ;;  %v1058_v13 = vadd.f32 %v947_v52, %v702_v57  ;;  %v1152_v58 = vld [vmem:[#allocation2 + $0x48] sm:$0xff]  ;;  %5966 = vmatprep.mubr.msk.f32.mxu1 %vm267_vm1, %v5168_v8  ;;  %v5700_v44 = vpop.f32.mrb[28].mxu0 }
 0x12c   : > { %1091 = vst.msk [vmem:[#allocation2 + $0x68] sm:$0xff] %vm169_vm2, %v1059_v41  ;;  %v1508_v47 = vadd.f32 %v5694_v20, %v1152_v58  ;;  %v1151_v38 = vld [vmem:[#allocation2 + $0x40] sm:$0xff]  ;;  %v1400_v35 = vpop.f32.mrb[29].mxu0  ;;  %6014 = vmatmul.mubr.msk.f32.gmra.mrb[134].mxu0 %vm267_vm1, %v5232_v39  ;;  %v5173_v20 = vld [vmem:[%s6231_s7 + $0x189] sm:$0xff] }
 0x12d   : > { %1090 = vst.msk [vmem:[#allocation2 + $0x60] sm:$0xff] %vm169_vm2, %v1058_v13  ;;  %v1507_v17 = vadd.f32 %v1380_v59, %v1151_v38  ;;  %v5653_v56 = vpop.f32.mrb[30].mxu1  ;;  %6016 = vmatprep.mubr.msk.f32.mxu0 %vm267_vm1, %v5233_v10  ;;  %v5174_v59 = vld [vmem:[%s6231_s7 + $0x199] sm:$0xff]  ;;  %v5240_v36 = vld [vmem:[%s6231_s7 + $0x1a2] sm:$0xff]  ;;  %s7913_s7 = scalar_lea.vmem [#allocation4], %s4783_s5 }
 0x12e   : > { %1540 = vst.msk [vmem:[#allocation2 + $0x48] sm:$0xff] %vm169_vm2, %v1508_v47  ;;  %v1061_v22 = vadd.f32 %v5653_v56, %v705_v18  ;;  %v957_v25 = vpop.f32.mrb[31].mxu1  ;;  %5967 = vmatmul.mubr.msk.f32.gmra.mrb[136].mxu1 %vm267_vm1, %v5169_v40  ;;  %v710_v39 = vld [vmem:[#allocation2 + $0xa0] sm:$0xff]  ;;  %s4717_s8 = sshll.u32 %s7913_s7, 4  ;;  %s7927_s8 = int_to_ptr.vmem [resolvable:$true] %s4717_s8 }
 0x12f   : > { %1539 = vst.msk [vmem:[#allocation2 + $0x40] sm:$0xff] %vm169_vm2, %v1507_v17  ;;  %v1060_v45 = vadd.f32 %v957_v25, %v704_v61  ;;  %v1154_v29 = vld [vmem:[#allocation2 + $0x58] sm:$0xff]  ;;  %5969 = vmatprep.mubr.msk.f32.mxu1 %vm267_vm1, %v5170_v43  ;;  %v5703_v33 = vpop.f32.mrb[30].mxu0  ;;  %v712_v43 = vld [vmem:[#allocation2 + $0xb0] sm:$0xff]  ;;  %s6075_s17 = scalar_lea.vmem %s7927_s8, 1024  ;;  %p6082_p0 = scmp.lt.s32.totalorder %s7927_s8, %s6080_s20 }
 0x130   : > { %1093 = vst.msk [vmem:[#allocation2 + $0x78] sm:$0xff] %vm169_vm2, %v1061_v22  ;;  %v1510_v34 = vadd.f32 %v5697_v31, %v1154_v29  ;;  %v1153_v3 = vld [vmem:[#allocation2 + $0x50] sm:$0xff]  ;;  %v1410_v4 = vpop.f32.mrb[31].mxu0  ;;  %6017 = vmatmul.mubr.msk.f32.gmra.mrb[136].mxu0 %vm267_vm1, %v5234_v21  ;;  %p6076_p11 = scmp.ne.s32.totalorder %s7927_s8, %s6075_s17  ;;  %p6083_p1 = scmp.lt.s32.totalorder %s6081_s24, %s6075_s17 }
 0x131   : > { %1092 = vst.msk [vmem:[#allocation2 + $0x70] sm:$0xff] %vm169_vm2, %v1060_v45  ;;  %v1509_v46 = vadd.f32 %v1390_v11, %v1153_v3  ;;  %v5656_v9 = vpop.f32.mrb[32].mxu1  ;;  %6019 = vmatprep.mubr.msk.f32.mxu0 %vm267_vm1, %v5235_v26  ;;  %v711_v11 = vld [vmem:[#allocation2 + $0xa8] sm:$0xff] }
 0x132   : > { %1542 = vst.msk [vmem:[#allocation2 + $0x58] sm:$0xff] %vm169_vm2, %v1510_v34  ;;  %v1063_v15 = vadd.f32 %v5656_v9, %v707_v5  ;;  %v967_v16 = vpop.f32.mrb[33].mxu1  ;;  %5970 = vmatmul.mubr.msk.f32.gmra.mrb[138].mxu1 %vm267_vm1, %v5171_v30  ;;  %v715_v26 = vld [vmem:[#allocation2 + $0xc8] sm:$0xff]  ;;  %v714_v30 = vld [vmem:[#allocation2 + $0xc0] sm:$0xff]  ;;  %p6077_p12 = pnand %p6076_p11, %p6201_p5  ;;  %p6084_p2 = por %p6083_p1, %p6082_p0 }
 0x133   : > { %1541 = vst.msk [vmem:[#allocation2 + $0x50] sm:$0xff] %vm169_vm2, %v1509_v46  ;;  %v1062_v19 = vadd.f32 %v967_v16, %v706_v32  ;;  %v1156_v49 = vld [vmem:[#allocation2 + $0x68] sm:$0xff]  ;;  %5972 = vmatprep.mubr.msk.f32.mxu1 %vm267_vm1, %v5172_v37  ;;  %v5706_v23 = vpop.f32.mrb[32].mxu0  ;;  %v716_v16 = vld [vmem:[#allocation2 + $0xd0] sm:$0xff] }
 0x134   : > { %1095 = vst.msk [vmem:[#allocation2 + $0x88] sm:$0xff] %vm169_vm2, %v1063_v15  ;;  %v1512_v50 = vadd.f32 %v5700_v44, %v1156_v49  ;;  %v1155_v24 = vld [vmem:[#allocation2 + $0x60] sm:$0xff]  ;;  %v1420_v27 = vpop.f32.mrb[33].mxu0  ;;  %6020 = vmatmul.mubr.msk.f32.gmra.mrb[138].mxu0 %vm267_vm1, %v5236_v12  ;;  %v713_v44 = vld [vmem:[#allocation2 + $0xb8] sm:$0xff]  ;;  %p6078_p13 = pneg %p6077_p12 }
 0x135   : > { %1094 = vst.msk [vmem:[#allocation2 + $0x80] sm:$0xff] %vm169_vm2, %v1062_v19  ;;  %v1511_v60 = vadd.f32 %v1400_v35, %v1155_v24  ;;  %v5659_v28 = vpop.f32.mrb[34].mxu1  ;;  %6022 = vmatprep.mubr.msk.f32.mxu0 %vm267_vm1, %v7031_v2  ;;  %v717_v12 = vld [vmem:[#allocation2 + $0xd8] sm:$0xff] }
 0x136   : > { %1544 = vst.msk [vmem:[#allocation2 + $0x68] sm:$0xff] %vm169_vm2, %v1512_v50  ;;  %v1065_v14 = vadd.f32 %v5659_v28, %v709_v48  ;;  %v977_v63 = vpop.f32.mrb[35].mxu1  ;;  %5973 = vmatmul.mubr.msk.f32.gmra.mrb[140].mxu1 %vm267_vm1, %v5173_v20  ;;  %p6085_p3 = pnand %p6084_p2, %p6078_p13 }
 0x137   : > { %1543 = vst.msk [vmem:[#allocation2 + $0x60] sm:$0xff] %vm169_vm2, %v1511_v60  ;;  %v1064_v0 = vadd.f32 %v977_v63, %v708_v62  ;;  %v1158_v1 = vld [vmem:[#allocation2 + $0x78] sm:$0xff]  ;;  %5975 = vmatprep.mubr.msk.f32.mxu1 %vm267_vm1, %v5174_v59  ;;  %v5709_v31 = vpop.f32.mrb[34].mxu0  ;;  %v719_v60 = vld [vmem:[#allocation2 + $0xe8] sm:$0xff] }
 0x138   : > { %1097 = vst.msk [vmem:[#allocation2 + $0x98] sm:$0xff] %vm169_vm2, %v1065_v14  ;;  %v1514_v2 = vadd.f32 %v5703_v33, %v1158_v1  ;;  %v1157_v6 = vld [vmem:[#allocation2 + $0x70] sm:$0xff]  ;;  %v1430_v7 = vpop.f32.mrb[35].mxu0  ;;  %6023 = vmatmul.mubr.msk.f32.gmra.mrb[140].mxu0 %vm267_vm1, %v7045_v42  ;;  %v718_v14 = vld [vmem:[#allocation2 + $0xe0] sm:$0xff] }
 0x139   : > { %1096 = vst.msk [vmem:[#allocation2 + $0x90] sm:$0xff] %vm169_vm2, %v1064_v0  ;;  %v1513_v8 = vadd.f32 %v1410_v4, %v1157_v6  ;;  %v5662_v55 = vpop.f32.mrb[36].mxu1  ;;  %6025 = vmatprep.mubr.msk.f32.mxu0 %vm267_vm1, %v5239_v53  ;;  %v721_v6 = vld [vmem:[#allocation2 + $0xf8] sm:$0xff] }
 0x13a   : > { %1546 = vst.msk [vmem:[#allocation2 + $0x78] sm:$0xff] %vm169_vm2, %v1514_v2  ;;  %v1067_v51 = vadd.f32 %v5662_v55, %v711_v11  ;;  %v987_v41 = vpop.f32.mrb[37].mxu1  ;;  %5976 = vmatmul.mubr.msk.f32.gmra.mrb[142].mxu1 %vm267_vm1, %v5175_v54  ;;  %v720_v11 = vld [vmem:[#allocation2 + $0xf0] sm:$0xff] }
 0x13b   : > { %1545 = vst.msk [vmem:[#allocation2 + $0x70] sm:$0xff] %vm169_vm2, %v1513_v8  ;;  %v1066_v57 = vadd.f32 %v987_v41, %v710_v39  ;;  %v1160_v52 = vld [vmem:[#allocation2 + $0x88] sm:$0xff]  ;;  %v5712_v42 = vpop.f32.mrb[36].mxu0 }
 0x13c   : > { %1099 = vst.msk [vmem:[#allocation2 + $0xa8] sm:$0xff] %vm169_vm2, %v1067_v51  ;;  %v1516_v10 = vadd.f32 %v5706_v23, %v1160_v52  ;;  %v1159_v13 = vld [vmem:[#allocation2 + $0x80] sm:$0xff]  ;;  %v1440_v58 = vpop.f32.mrb[37].mxu0  ;;  %6026 = vmatmul.mubr.msk.f32.gmra.mrb[142].mxu0 %vm267_vm1, %v5240_v36 }
 0x13d   : > { %1098 = vst.msk [vmem:[#allocation2 + $0xa0] sm:$0xff] %vm169_vm2, %v1066_v57  ;;  %v1515_v40 = vadd.f32 %v1420_v27, %v1159_v13  ;;  %v5665_v47 = vpop.f32.mrb[38].mxu1 }
 0x13e   : > { %1548 = vst.msk [vmem:[#allocation2 + $0x88] sm:$0xff] %vm169_vm2, %v1516_v10  ;;  %v1069_v38 = vadd.f32 %v5665_v47, %v713_v44  ;;  %v997_v35 = vpop.f32.mrb[39].mxu1  ;;  %v1598_v10 = vld [vmem:[#allocation2 + $0x8] sm:$0xff] }
 0x13f   : > { %1547 = vst.msk [vmem:[#allocation2 + $0x80] sm:$0xff] %vm169_vm2, %v1515_v40  ;;  %v1068_v17 = vadd.f32 %v997_v35, %v712_v43  ;;  %v1162_v18 = vld [vmem:[#allocation2 + $0x98] sm:$0xff]  ;;  %v5715_v56 = vpop.f32.mrb[38].mxu0  ;;  %v1597_v40 = vld [vmem:[#allocation2] sm:$0xff] }
 0x140   : > { %1101 = vst.msk [vmem:[#allocation2 + $0xb8] sm:$0xff] %vm169_vm2, %v1069_v38  ;;  %v1518_v21 = vadd.f32 %v5709_v31, %v1162_v18  ;;  %v1161_v22 = vld [vmem:[#allocation2 + $0x90] sm:$0xff]  ;;  %v1450_v61 = vpop.f32.mrb[39].mxu0 }
 0x141   : > { %1100 = vst.msk [vmem:[#allocation2 + $0xb0] sm:$0xff] %vm169_vm2, %v1068_v17  ;;  %v1517_v25 = vadd.f32 %v1430_v7, %v1161_v22  ;;  %v5668_v45 = vpop.f32.mrb[40].mxu1 }
 0x142   : > { %1550 = vst.msk [vmem:[#allocation2 + $0x98] sm:$0xff] %vm169_vm2, %v1518_v21  ;;  %v1071_v29 = vadd.f32 %v5668_v45, %v715_v26  ;;  %v1007_v33 = vpop.f32.mrb[41].mxu1  ;;  %v1600_v21 = vld [vmem:[#allocation2 + $0x18] sm:$0xff] }
 0x143   : > { %1549 = vst.msk [vmem:[#allocation2 + $0x90] sm:$0xff] %vm169_vm2, %v1517_v25  ;;  %v1070_v34 = vadd.f32 %v1007_v33, %v714_v30  ;;  %v1164_v3 = vld [vmem:[#allocation2 + $0xa8] sm:$0xff]  ;;  %v5718_v37 = vpop.f32.mrb[40].mxu0  ;;  %v1599_v25 = vld [vmem:[#allocation2 + $0x10] sm:$0xff] }
 0x144   : > { %1103 = vst.msk [vmem:[#allocation2 + $0xc8] sm:$0xff] %vm169_vm2, %v1071_v29  ;;  %v1520_v4 = vadd.f32 %v5712_v42, %v1164_v3  ;;  %v1163_v46 = vld [vmem:[#allocation2 + $0xa0] sm:$0xff]  ;;  %v1460_v5 = vpop.f32.mrb[41].mxu0 }
 0x145   : > { %1102 = vst.msk [vmem:[#allocation2 + $0xc0] sm:$0xff] %vm169_vm2, %v1070_v34  ;;  %v1519_v9 = vadd.f32 %v1440_v58, %v1163_v46  ;;  %v5671_v15 = vpop.f32.mrb[42].mxu1 }
 0x146   : > { %1552 = vst.msk [vmem:[#allocation2 + $0xa8] sm:$0xff] %vm169_vm2, %v1520_v4  ;;  %v1073_v32 = vadd.f32 %v5671_v15, %v717_v12  ;;  %v1017_v19 = vpop.f32.mrb[43].mxu1  ;;  %v1602_v4 = vld [vmem:[#allocation2 + $0x28] sm:$0xff] }
 0x147   : > { %1551 = vst.msk [vmem:[#allocation2 + $0xa0] sm:$0xff] %vm169_vm2, %v1519_v9  ;;  %v1072_v49 = vadd.f32 %v1017_v19, %v716_v16  ;;  %v1166_v20 = vld [vmem:[#allocation2 + $0xb8] sm:$0xff]  ;;  %v5721_v23 = vpop.f32.mrb[42].mxu0  ;;  %v1601_v9 = vld [vmem:[#allocation2 + $0x20] sm:$0xff] }
 0x148   : > { %1105 = vst.msk [vmem:[#allocation2 + $0xd8] sm:$0xff] %vm169_vm2, %v1073_v32  ;;  %v1522_v50 = vadd.f32 %v5715_v56, %v1166_v20  ;;  %v1165_v24 = vld [vmem:[#allocation2 + $0xb0] sm:$0xff]  ;;  %v1470_v59 = vpop.f32.mrb[43].mxu0 }
 0x149   : > { %1104 = vst.msk [vmem:[#allocation2 + $0xd0] sm:$0xff] %vm169_vm2, %v1072_v49  ;;  %v1521_v27 = vadd.f32 %v1450_v61, %v1165_v24  ;;  %v5674_v48 = vpop.f32.mrb[44].mxu1 }
 0x14a   : > { %1554 = vst.msk [vmem:[#allocation2 + $0xb8] sm:$0xff] %vm169_vm2, %v1522_v50  ;;  %v1075_v28 = vadd.f32 %v5674_v48, %v719_v60  ;;  %v1027_v62 = vpop.f32.mrb[45].mxu1  ;;  %v1604_v50 = vld [vmem:[#allocation2 + $0x38] sm:$0xff] }
 0x14b   : > { %1553 = vst.msk [vmem:[#allocation2 + $0xb0] sm:$0xff] %vm169_vm2, %v1521_v27  ;;  %v1074_v63 = vadd.f32 %v1027_v62, %v718_v14  ;;  %v1168_v53 = vld [vmem:[#allocation2 + $0xc8] sm:$0xff]  ;;  %v5724_v0 = vpop.f32.mrb[44].mxu0  ;;  %v1603_v27 = vld [vmem:[#allocation2 + $0x30] sm:$0xff] }
 0x14c   : > { %1107 = vst.msk [vmem:[#allocation2 + $0xe8] sm:$0xff] %vm169_vm2, %v1075_v28  ;;  %v1524_v1 = vadd.f32 %v5718_v37, %v1168_v53  ;;  %v1167_v54 = vld [vmem:[#allocation2 + $0xc0] sm:$0xff]  ;;  %v1480_v31 = vpop.f32.mrb[45].mxu0 }
 0x14d   : > { %1106 = vst.msk [vmem:[#allocation2 + $0xe0] sm:$0xff] %vm169_vm2, %v1074_v63  ;;  %v1523_v2 = vadd.f32 %v1460_v5, %v1167_v54  ;;  %v5677_v7 = vpop.f32.mrb[46].mxu1 }
 0x14e   : > { %1556 = vst.msk [vmem:[#allocation2 + $0xc8] sm:$0xff] %vm169_vm2, %v1524_v1  ;;  %v1077_v8 = vadd.f32 %v5677_v7, %v721_v6  ;;  %v1037_v55 = vpop.f32.mrb[47].mxu1  ;;  %v1606_v1 = vld [vmem:[#allocation2 + $0x48] sm:$0xff] }
 0x14f   : > { %1555 = vst.msk [vmem:[#allocation2 + $0xc0] sm:$0xff] %vm169_vm2, %v1523_v2  ;;  %v1076_v36 = vadd.f32 %v1037_v55, %v720_v11  ;;  %v1170_v51 = vld [vmem:[#allocation2 + $0xd8] sm:$0xff]  ;;  %v5727_v39 = vpop.f32.mrb[46].mxu0  ;;  %v1605_v2 = vld [vmem:[#allocation2 + $0x40] sm:$0xff] }
 0x150   : > { %1109 = vst.msk [vmem:[#allocation2 + $0xf8] sm:$0xff] %vm169_vm2, %v1077_v8  ;;  %v1526_v41 = vadd.f32 %v5721_v23, %v1170_v51  ;;  %v1169_v57 = vld [vmem:[#allocation2 + $0xd0] sm:$0xff]  ;;  %v1490_v52 = vpop.f32.mrb[47].mxu0 }
 0x151   : > { %1108 = vst.msk [vmem:[#allocation2 + $0xf0] sm:$0xff] %vm169_vm2, %v1076_v36  ;;  %v1525_v42 = vadd.f32 %v1470_v59, %v1169_v57  ;;  %v5732_v13 = vpop.f32.mrb[48].mxu1 }
 0x152   : > { %1558 = vst.msk [vmem:[#allocation2 + $0xd8] sm:$0xff] %vm169_vm2, %v1526_v41  ;;  %v1954_v58 = vadd.f32 %v5732_v13, %v1598_v10  ;;  %v1794_v44 = vpop.f32.mrb[49].mxu1  ;;  %v1608_v41 = vld [vmem:[#allocation2 + $0x58] sm:$0xff] }
 0x153   : > { %1557 = vst.msk [vmem:[#allocation2 + $0xd0] sm:$0xff] %vm169_vm2, %v1525_v42  ;;  %v1172_v47 = vld [vmem:[#allocation2 + $0xe8] sm:$0xff]  ;;  %v1953_v38 = vadd.f32 %v1794_v44, %v1597_v40  ;;  %v5782_v43 = vpop.f32.mrb[48].mxu0  ;;  %v1607_v42 = vld [vmem:[#allocation2 + $0x50] sm:$0xff] }
 0x154   : > { %1986 = vst.msk [vmem:[#allocation2 + $0x8] sm:$0xff] %vm169_vm2, %v1954_v58  ;;  %v1528_v35 = vadd.f32 %v5724_v0, %v1172_v47  ;;  %v1171_v17 = vld [vmem:[#allocation2 + $0xe0] sm:$0xff]  ;;  %v2247_v18 = vpop.f32.mrb[49].mxu0 }
 0x155   : > { %1985 = vst.msk [vmem:[#allocation2] sm:$0xff] %vm169_vm2, %v1953_v38  ;;  %v1527_v56 = vadd.f32 %v1480_v31, %v1171_v17  ;;  %v5735_v22 = vpop.f32.mrb[50].mxu1 }
 0x156   : > { %1560 = vst.msk [vmem:[#allocation2 + $0xe8] sm:$0xff] %vm169_vm2, %v1528_v35  ;;  %v1956_v61 = vadd.f32 %v5735_v22, %v1600_v21  ;;  %v1804_v26 = vpop.f32.mrb[51].mxu1  ;;  %v1610_v35 = vld [vmem:[#allocation2 + $0x68] sm:$0xff] }
 0x157   : > { %1559 = vst.msk [vmem:[#allocation2 + $0xe0] sm:$0xff] %vm169_vm2, %v1527_v56  ;;  %v1174_v45 = vld [vmem:[#allocation2 + $0xf8] sm:$0xff]  ;;  %v1955_v29 = vadd.f32 %v1804_v26, %v1599_v25  ;;  %v5785_v30 = vpop.f32.mrb[50].mxu0  ;;  %v1609_v56 = vld [vmem:[#allocation2 + $0x60] sm:$0xff] }
 0x158   : > { %1988 = vst.msk [vmem:[#allocation2 + $0x18] sm:$0xff] %vm169_vm2, %v1956_v61  ;;  %v1530_v33 = vadd.f32 %v5727_v39, %v1174_v45  ;;  %v1173_v34 = vld [vmem:[#allocation2 + $0xf0] sm:$0xff]  ;;  %v2257_v3 = vpop.f32.mrb[51].mxu0 }
 0x159   : > { %1987 = vst.msk [vmem:[#allocation2 + $0x10] sm:$0xff] %vm169_vm2, %v1955_v29  ;;  %v1529_v37 = vadd.f32 %v1490_v52, %v1173_v34  ;;  %v5738_v46 = vpop.f32.mrb[52].mxu1 }
 0x15a   : > { %1562 = vst.msk [vmem:[#allocation2 + $0xf8] sm:$0xff] %vm169_vm2, %v1530_v33  ;;  %v1958_v5 = vadd.f32 %v5738_v46, %v1602_v4  ;;  %v1814_v12 = vpop.f32.mrb[53].mxu1  ;;  %v1612_v33 = vld [vmem:[#allocation2 + $0x78] sm:$0xff] }
 0x15b   : > { %1561 = vst.msk [vmem:[#allocation2 + $0xf0] sm:$0xff] %vm169_vm2, %v1529_v37  ;;  %v1957_v15 = vadd.f32 %v1814_v12, %v1601_v9  ;;  %v2051_v32 = vld [vmem:[#allocation2 + $0x8] sm:$0xff]  ;;  %v5788_v16 = vpop.f32.mrb[52].mxu0  ;;  %v1611_v37 = vld [vmem:[#allocation2 + $0x70] sm:$0xff] }
 0x15c   : > { %1990 = vst.msk [vmem:[#allocation2 + $0x28] sm:$0xff] %vm169_vm2, %v1958_v5  ;;  %v2407_v19 = vadd.f32 %v5782_v43, %v2051_v32  ;;  %v2050_v49 = vld [vmem:[#allocation2] sm:$0xff]  ;;  %v2267_v20 = vpop.f32.mrb[53].mxu0 }
 0x15d   : > { %1989 = vst.msk [vmem:[#allocation2 + $0x20] sm:$0xff] %vm169_vm2, %v1957_v15  ;;  %v2406_v23 = vadd.f32 %v2247_v18, %v2050_v49  ;;  %v5741_v24 = vpop.f32.mrb[54].mxu1 }
 0x15e   : > { %2439 = vst.msk [vmem:[#allocation2 + $0x8] sm:$0xff] %vm169_vm2, %v2407_v19  ;;  %v1960_v59 = vadd.f32 %v5741_v24, %v1604_v50  ;;  %v1824_v60 = vpop.f32.mrb[55].mxu1  ;;  %v1614_v19 = vld [vmem:[#allocation2 + $0x88] sm:$0xff] }
 0x15f   : > { %2438 = vst.msk [vmem:[#allocation2] sm:$0xff] %vm169_vm2, %v2406_v23  ;;  %v1959_v48 = vadd.f32 %v1824_v60, %v1603_v27  ;;  %v2053_v28 = vld [vmem:[#allocation2 + $0x18] sm:$0xff]  ;;  %v5791_v14 = vpop.f32.mrb[54].mxu0  ;;  %v1613_v23 = vld [vmem:[#allocation2 + $0x80] sm:$0xff] }
 0x160   : > { %1992 = vst.msk [vmem:[#allocation2 + $0x38] sm:$0xff] %vm169_vm2, %v1960_v59  ;;  %v2409_v62 = vadd.f32 %v5785_v30, %v2053_v28  ;;  %v2052_v63 = vld [vmem:[#allocation2 + $0x10] sm:$0xff]  ;;  %v2277_v53 = vpop.f32.mrb[55].mxu0 }
 0x161   : > { %1991 = vst.msk [vmem:[#allocation2 + $0x30] sm:$0xff] %vm169_vm2, %v1959_v48  ;;  %v2408_v0 = vadd.f32 %v2257_v3, %v2052_v63  ;;  %v5744_v54 = vpop.f32.mrb[56].mxu1 }
 0x162   : > { %2441 = vst.msk [vmem:[#allocation2 + $0x18] sm:$0xff] %vm169_vm2, %v2409_v62  ;;  %v1962_v31 = vadd.f32 %v5744_v54, %v1606_v1  ;;  %v1834_v6 = vpop.f32.mrb[57].mxu1  ;;  %v1616_v62 = vld [vmem:[#allocation2 + $0x98] sm:$0xff] }
 0x163   : > { %2440 = vst.msk [vmem:[#allocation2 + $0x10] sm:$0xff] %vm169_vm2, %v2408_v0  ;;  %v1961_v7 = vadd.f32 %v1834_v6, %v1605_v2  ;;  %v2055_v8 = vld [vmem:[#allocation2 + $0x28] sm:$0xff]  ;;  %v5794_v11 = vpop.f32.mrb[56].mxu0  ;;  %v1615_v0 = vld [vmem:[#allocation2 + $0x90] sm:$0xff] }
 0x164   : > { %1994 = vst.msk [vmem:[#allocation2 + $0x48] sm:$0xff] %vm169_vm2, %v1962_v31  ;;  %v2411_v55 = vadd.f32 %v5788_v16, %v2055_v8  ;;  %v2054_v36 = vld [vmem:[#allocation2 + $0x20] sm:$0xff]  ;;  %v2287_v51 = vpop.f32.mrb[57].mxu0 }
 0x165   : > { %1993 = vst.msk [vmem:[#allocation2 + $0x40] sm:$0xff] %vm169_vm2, %v1961_v7  ;;  %v2410_v39 = vadd.f32 %v2267_v20, %v2054_v36  ;;  %v5747_v57 = vpop.f32.mrb[58].mxu1 }
 0x166   : > { %2443 = vst.msk [vmem:[#allocation2 + $0x28] sm:$0xff] %vm169_vm2, %v2411_v55  ;;  %v1964_v52 = vadd.f32 %v5747_v57, %v1608_v41  ;;  %v1844_v10 = vpop.f32.mrb[59].mxu1  ;;  %v1618_v55 = vld [vmem:[#allocation2 + $0xa8] sm:$0xff] }
 0x167   : > { %2442 = vst.msk [vmem:[#allocation2 + $0x20] sm:$0xff] %vm169_vm2, %v2410_v39  ;;  %v1963_v13 = vadd.f32 %v1844_v10, %v1607_v42  ;;  %v2057_v58 = vld [vmem:[#allocation2 + $0x38] sm:$0xff]  ;;  %v5797_v40 = vpop.f32.mrb[58].mxu0  ;;  %v1617_v39 = vld [vmem:[#allocation2 + $0xa0] sm:$0xff] }
 0x168   : > { %1996 = vst.msk [vmem:[#allocation2 + $0x58] sm:$0xff] %vm169_vm2, %v1964_v52  ;;  %v2413_v44 = vadd.f32 %v5791_v14, %v2057_v58  ;;  %v2056_v47 = vld [vmem:[#allocation2 + $0x30] sm:$0xff]  ;;  %v2297_v38 = vpop.f32.mrb[59].mxu0 }
 0x169   : > { %1995 = vst.msk [vmem:[#allocation2 + $0x50] sm:$0xff] %vm169_vm2, %v1963_v13  ;;  %v2412_v43 = vadd.f32 %v2277_v53, %v2056_v47  ;;  %v5750_v17 = vpop.f32.mrb[60].mxu1 }
 0x16a   : > { %2445 = vst.msk [vmem:[#allocation2 + $0x38] sm:$0xff] %vm169_vm2, %v2413_v44  ;;  %v1966_v18 = vadd.f32 %v5750_v17, %v1610_v35  ;;  %v1854_v21 = vpop.f32.mrb[61].mxu1  ;;  %v1620_v44 = vld [vmem:[#allocation2 + $0xb8] sm:$0xff] }
 0x16b   : > { %2444 = vst.msk [vmem:[#allocation2 + $0x30] sm:$0xff] %vm169_vm2, %v2412_v43  ;;  %v1965_v22 = vadd.f32 %v1854_v21, %v1609_v56  ;;  %v2059_v61 = vld [vmem:[#allocation2 + $0x48] sm:$0xff]  ;;  %v5800_v25 = vpop.f32.mrb[60].mxu0  ;;  %v1619_v43 = vld [vmem:[#allocation2 + $0xb0] sm:$0xff] }
 0x16c   : > { %1998 = vst.msk [vmem:[#allocation2 + $0x68] sm:$0xff] %vm169_vm2, %v1966_v18  ;;  %v2415_v26 = vadd.f32 %v5794_v11, %v2059_v61  ;;  %v2058_v45 = vld [vmem:[#allocation2 + $0x40] sm:$0xff]  ;;  %v2307_v29 = vpop.f32.mrb[61].mxu0 }
 0x16d   : > { %1997 = vst.msk [vmem:[#allocation2 + $0x60] sm:$0xff] %vm169_vm2, %v1965_v22  ;;  %v2414_v30 = vadd.f32 %v2287_v51, %v2058_v45  ;;  %v5753_v34 = vpop.f32.mrb[62].mxu1 }
 0x16e   : > { %2447 = vst.msk [vmem:[#allocation2 + $0x48] sm:$0xff] %vm169_vm2, %v2415_v26  ;;  %v1968_v3 = vadd.f32 %v5753_v34, %v1612_v33  ;;  %v1864_v4 = vpop.f32.mrb[63].mxu1  ;;  %v1622_v26 = vld [vmem:[#allocation2 + $0xc8] sm:$0xff] }
 0x16f   : > { %2446 = vst.msk [vmem:[#allocation2 + $0x40] sm:$0xff] %vm169_vm2, %v2414_v30  ;;  %v1967_v46 = vadd.f32 %v1864_v4, %v1611_v37  ;;  %v2061_v5 = vld [vmem:[#allocation2 + $0x58] sm:$0xff]  ;;  %v5803_v9 = vpop.f32.mrb[62].mxu0  ;;  %v1621_v30 = vld [vmem:[#allocation2 + $0xc0] sm:$0xff] }
 0x170   : > { %2000 = vst.msk [vmem:[#allocation2 + $0x78] sm:$0xff] %vm169_vm2, %v1968_v3  ;;  %v2417_v12 = vadd.f32 %v5797_v40, %v2061_v5  ;;  %v2060_v15 = vld [vmem:[#allocation2 + $0x50] sm:$0xff]  ;;  %v2317_v32 = vpop.f32.mrb[63].mxu0 }
 0x171   : > { %1999 = vst.msk [vmem:[#allocation2 + $0x70] sm:$0xff] %vm169_vm2, %v1967_v46  ;;  %v2416_v16 = vadd.f32 %v2297_v38, %v2060_v15  ;;  %v5756_v49 = vpop.f32.mrb[64].mxu1 }
 0x172   : > { %2449 = vst.msk [vmem:[#allocation2 + $0x58] sm:$0xff] %vm169_vm2, %v2417_v12  ;;  %v1970_v20 = vadd.f32 %v5756_v49, %v1614_v19  ;;  %v1874_v50 = vpop.f32.mrb[65].mxu1  ;;  %v1624_v12 = vld [vmem:[#allocation2 + $0xd8] sm:$0xff] }
 0x173   : > { %2448 = vst.msk [vmem:[#allocation2 + $0x50] sm:$0xff] %vm169_vm2, %v2416_v16  ;;  %v1969_v24 = vadd.f32 %v1874_v50, %v1613_v23  ;;  %v2063_v59 = vld [vmem:[#allocation2 + $0x68] sm:$0xff]  ;;  %v5806_v27 = vpop.f32.mrb[64].mxu0  ;;  %v1623_v16 = vld [vmem:[#allocation2 + $0xd0] sm:$0xff] }
 0x174   : > { %2002 = vst.msk [vmem:[#allocation2 + $0x88] sm:$0xff] %vm169_vm2, %v1970_v20  ;;  %v2419_v60 = vadd.f32 %v5800_v25, %v2063_v59  ;;  %v2062_v48 = vld [vmem:[#allocation2 + $0x60] sm:$0xff]  ;;  %v2327_v28 = vpop.f32.mrb[65].mxu0 }
 0x175   : > { %2001 = vst.msk [vmem:[#allocation2 + $0x80] sm:$0xff] %vm169_vm2, %v1969_v24  ;;  %v2418_v14 = vadd.f32 %v2307_v29, %v2062_v48  ;;  %v5759_v63 = vpop.f32.mrb[66].mxu1 }
 0x176   : > { %2451 = vst.msk [vmem:[#allocation2 + $0x68] sm:$0xff] %vm169_vm2, %v2419_v60  ;;  %v1972_v53 = vadd.f32 %v5759_v63, %v1616_v62  ;;  %v1884_v1 = vpop.f32.mrb[67].mxu1  ;;  %v1626_v60 = vld [vmem:[#allocation2 + $0xe8] sm:$0xff] }
 0x177   : > { %2450 = vst.msk [vmem:[#allocation2 + $0x60] sm:$0xff] %vm169_vm2, %v2418_v14  ;;  %v1971_v54 = vadd.f32 %v1884_v1, %v1615_v0  ;;  %v2065_v31 = vld [vmem:[#allocation2 + $0x78] sm:$0xff]  ;;  %v5809_v2 = vpop.f32.mrb[66].mxu0  ;;  %v1625_v14 = vld [vmem:[#allocation2 + $0xe0] sm:$0xff] }
 0x178   : > { %2004 = vst.msk [vmem:[#allocation2 + $0x98] sm:$0xff] %vm169_vm2, %v1972_v53  ;;  %v2421_v6 = vadd.f32 %v5803_v9, %v2065_v31  ;;  %v2064_v7 = vld [vmem:[#allocation2 + $0x70] sm:$0xff]  ;;  %v2337_v8 = vpop.f32.mrb[67].mxu0 }
 0x179   : > { %2003 = vst.msk [vmem:[#allocation2 + $0x90] sm:$0xff] %vm169_vm2, %v1971_v54  ;;  %v2420_v11 = vadd.f32 %v2317_v32, %v2064_v7  ;;  %v5762_v36 = vpop.f32.mrb[68].mxu1 }
 0x17a   : > { %2453 = vst.msk [vmem:[#allocation2 + $0x78] sm:$0xff] %vm169_vm2, %v2421_v6  ;;  %v1974_v51 = vadd.f32 %v5762_v36, %v1618_v55  ;;  %v1894_v41 = vpop.f32.mrb[69].mxu1  ;;  %v1628_v6 = vld [vmem:[#allocation2 + $0xf8] sm:$0xff] }
 0x17b   : > { %2452 = vst.msk [vmem:[#allocation2 + $0x70] sm:$0xff] %vm169_vm2, %v2420_v11  ;;  %v1973_v57 = vadd.f32 %v1894_v41, %v1617_v39  ;;  %v2067_v52 = vld [vmem:[#allocation2 + $0x88] sm:$0xff]  ;;  %v5812_v42 = vpop.f32.mrb[68].mxu0  ;;  %v1627_v11 = vld [vmem:[#allocation2 + $0xf0] sm:$0xff] }
 0x17c   : > { %2006 = vst.msk [vmem:[#allocation2 + $0xa8] sm:$0xff] %vm169_vm2, %v1974_v51  ;;  %v2423_v10 = vadd.f32 %v5806_v27, %v2067_v52  ;;  %v2066_v13 = vld [vmem:[#allocation2 + $0x80] sm:$0xff]  ;;  %v2347_v58 = vpop.f32.mrb[69].mxu0 }
 0x17d   : > { %2005 = vst.msk [vmem:[#allocation2 + $0xa0] sm:$0xff] %vm169_vm2, %v1973_v57  ;;  %v2422_v40 = vadd.f32 %v2327_v28, %v2066_v13  ;;  %v5765_v47 = vpop.f32.mrb[70].mxu1 }
 0x17e   : > { %2455 = vst.msk [vmem:[#allocation2 + $0x88] sm:$0xff] %vm169_vm2, %v2423_v10  ;;  %v1976_v38 = vadd.f32 %v5765_v47, %v1620_v44  ;;  %v1904_v35 = vpop.f32.mrb[71].mxu1  ;;  %v2504_v10 = vld [vmem:[#allocation2 + $0x8] sm:$0xff] }
 0x17f   : > { %2454 = vst.msk [vmem:[#allocation2 + $0x80] sm:$0xff] %vm169_vm2, %v2422_v40  ;;  %v1975_v17 = vadd.f32 %v1904_v35, %v1619_v43  ;;  %v2069_v18 = vld [vmem:[#allocation2 + $0x98] sm:$0xff]  ;;  %v5815_v56 = vpop.f32.mrb[70].mxu0  ;;  %v2503_v40 = vld [vmem:[#allocation2] sm:$0xff] }
 0x180   : > { %2008 = vst.msk [vmem:[#allocation2 + $0xb8] sm:$0xff] %vm169_vm2, %v1976_v38  ;;  %v2425_v21 = vadd.f32 %v5809_v2, %v2069_v18  ;;  %v2068_v22 = vld [vmem:[#allocation2 + $0x90] sm:$0xff]  ;;  %v2357_v61 = vpop.f32.mrb[71].mxu0 }
 0x181   : > { %2007 = vst.msk [vmem:[#allocation2 + $0xb0] sm:$0xff] %vm169_vm2, %v1975_v17  ;;  %v2424_v25 = vadd.f32 %v2337_v8, %v2068_v22  ;;  %v5768_v45 = vpop.f32.mrb[72].mxu1 }
 0x182   : > { %2457 = vst.msk [vmem:[#allocation2 + $0x98] sm:$0xff] %vm169_vm2, %v2425_v21  ;;  %v1978_v29 = vadd.f32 %v5768_v45, %v1622_v26  ;;  %v1914_v33 = vpop.f32.mrb[73].mxu1  ;;  %v2506_v21 = vld [vmem:[#allocation2 + $0x18] sm:$0xff] }
 0x183   : > { %2456 = vst.msk [vmem:[#allocation2 + $0x90] sm:$0xff] %vm169_vm2, %v2424_v25  ;;  %v1977_v34 = vadd.f32 %v1914_v33, %v1621_v30  ;;  %v2071_v3 = vld [vmem:[#allocation2 + $0xa8] sm:$0xff]  ;;  %v5818_v37 = vpop.f32.mrb[72].mxu0  ;;  %v2505_v25 = vld [vmem:[#allocation2 + $0x10] sm:$0xff] }
 0x184   : > { %2010 = vst.msk [vmem:[#allocation2 + $0xc8] sm:$0xff] %vm169_vm2, %v1978_v29  ;;  %v2427_v4 = vadd.f32 %v5812_v42, %v2071_v3  ;;  %v2070_v46 = vld [vmem:[#allocation2 + $0xa0] sm:$0xff]  ;;  %v2367_v5 = vpop.f32.mrb[73].mxu0 }
 0x185   : > { %2009 = vst.msk [vmem:[#allocation2 + $0xc0] sm:$0xff] %vm169_vm2, %v1977_v34  ;;  %v2426_v9 = vadd.f32 %v2347_v58, %v2070_v46  ;;  %v5771_v15 = vpop.f32.mrb[74].mxu1 }
 0x186   : > { %2459 = vst.msk [vmem:[#allocation2 + $0xa8] sm:$0xff] %vm169_vm2, %v2427_v4  ;;  %v1980_v32 = vadd.f32 %v5771_v15, %v1624_v12  ;;  %v1924_v19 = vpop.f32.mrb[75].mxu1  ;;  %v2508_v4 = vld [vmem:[#allocation2 + $0x28] sm:$0xff] }
 0x187   : > { %2458 = vst.msk [vmem:[#allocation2 + $0xa0] sm:$0xff] %vm169_vm2, %v2426_v9  ;;  %v1979_v49 = vadd.f32 %v1924_v19, %v1623_v16  ;;  %v2073_v20 = vld [vmem:[#allocation2 + $0xb8] sm:$0xff]  ;;  %v5821_v23 = vpop.f32.mrb[74].mxu0  ;;  %v2507_v9 = vld [vmem:[#allocation2 + $0x20] sm:$0xff] }
 0x188   : > { %2012 = vst.msk [vmem:[#allocation2 + $0xd8] sm:$0xff] %vm169_vm2, %v1980_v32  ;;  %v2429_v50 = vadd.f32 %v5815_v56, %v2073_v20  ;;  %v2072_v24 = vld [vmem:[#allocation2 + $0xb0] sm:$0xff]  ;;  %v2377_v59 = vpop.f32.mrb[75].mxu0 }
 0x189   : > { %2011 = vst.msk [vmem:[#allocation2 + $0xd0] sm:$0xff] %vm169_vm2, %v1979_v49  ;;  %v2428_v27 = vadd.f32 %v2357_v61, %v2072_v24  ;;  %v5774_v48 = vpop.f32.mrb[76].mxu1 }
 0x18a   : > { %2461 = vst.msk [vmem:[#allocation2 + $0xb8] sm:$0xff] %vm169_vm2, %v2429_v50  ;;  %v1982_v28 = vadd.f32 %v5774_v48, %v1626_v60  ;;  %v1934_v62 = vpop.f32.mrb[77].mxu1  ;;  %v2510_v50 = vld [vmem:[#allocation2 + $0x38] sm:$0xff] }
 0x18b   : > { %2460 = vst.msk [vmem:[#allocation2 + $0xb0] sm:$0xff] %vm169_vm2, %v2428_v27  ;;  %v1981_v63 = vadd.f32 %v1934_v62, %v1625_v14  ;;  %v2075_v53 = vld [vmem:[#allocation2 + $0xc8] sm:$0xff]  ;;  %v5824_v0 = vpop.f32.mrb[76].mxu0  ;;  %v2509_v27 = vld [vmem:[#allocation2 + $0x30] sm:$0xff] }
 0x18c   : > { %2014 = vst.msk [vmem:[#allocation2 + $0xe8] sm:$0xff] %vm169_vm2, %v1982_v28  ;;  %v2431_v1 = vadd.f32 %v5818_v37, %v2075_v53  ;;  %v2074_v54 = vld [vmem:[#allocation2 + $0xc0] sm:$0xff]  ;;  %v2387_v31 = vpop.f32.mrb[77].mxu0 }
 0x18d   : > { %2013 = vst.msk [vmem:[#allocation2 + $0xe0] sm:$0xff] %vm169_vm2, %v1981_v63  ;;  %v2430_v2 = vadd.f32 %v2367_v5, %v2074_v54  ;;  %v5777_v7 = vpop.f32.mrb[78].mxu1 }
 0x18e   : > { %2463 = vst.msk [vmem:[#allocation2 + $0xc8] sm:$0xff] %vm169_vm2, %v2431_v1  ;;  %v1984_v8 = vadd.f32 %v5777_v7, %v1628_v6  ;;  %v1944_v55 = vpop.f32.mrb[79].mxu1  ;;  %v2512_v1 = vld [vmem:[#allocation2 + $0x48] sm:$0xff] }
 0x18f   : > { %2462 = vst.msk [vmem:[#allocation2 + $0xc0] sm:$0xff] %vm169_vm2, %v2430_v2  ;;  %v1983_v36 = vadd.f32 %v1944_v55, %v1627_v11  ;;  %v2077_v51 = vld [vmem:[#allocation2 + $0xd8] sm:$0xff]  ;;  %v5827_v39 = vpop.f32.mrb[78].mxu0  ;;  %v2511_v2 = vld [vmem:[#allocation2 + $0x40] sm:$0xff] }
 0x190   : > { %2016 = vst.msk [vmem:[#allocation2 + $0xf8] sm:$0xff] %vm169_vm2, %v1984_v8  ;;  %v2433_v41 = vadd.f32 %v5821_v23, %v2077_v51  ;;  %v2076_v57 = vld [vmem:[#allocation2 + $0xd0] sm:$0xff]  ;;  %v2397_v52 = vpop.f32.mrb[79].mxu0 }
 0x191   : > { %2015 = vst.msk [vmem:[#allocation2 + $0xf0] sm:$0xff] %vm169_vm2, %v1983_v36  ;;  %v2432_v42 = vadd.f32 %v2377_v59, %v2076_v57  ;;  %v5832_v13 = vpop.f32.mrb[80].mxu1 }
 0x192   : > { %2465 = vst.msk [vmem:[#allocation2 + $0xd8] sm:$0xff] %vm169_vm2, %v2433_v41  ;;  %v2860_v58 = vadd.f32 %v5832_v13, %v2504_v10  ;;  %v2700_v44 = vpop.f32.mrb[81].mxu1  ;;  %v2514_v41 = vld [vmem:[#allocation2 + $0x58] sm:$0xff] }
 0x193   : > { %2464 = vst.msk [vmem:[#allocation2 + $0xd0] sm:$0xff] %vm169_vm2, %v2432_v42  ;;  %v2079_v47 = vld [vmem:[#allocation2 + $0xe8] sm:$0xff]  ;;  %v2859_v38 = vadd.f32 %v2700_v44, %v2503_v40  ;;  %v5882_v43 = vpop.f32.mrb[80].mxu0  ;;  %v2513_v42 = vld [vmem:[#allocation2 + $0x50] sm:$0xff] }
 0x194   : > { %2892 = vst.msk [vmem:[#allocation2 + $0x8] sm:$0xff] %vm169_vm2, %v2860_v58  ;;  %v2435_v35 = vadd.f32 %v5824_v0, %v2079_v47  ;;  %v2078_v17 = vld [vmem:[#allocation2 + $0xe0] sm:$0xff]  ;;  %v3154_v18 = vpop.f32.mrb[81].mxu0 }
 0x195   : > { %2891 = vst.msk [vmem:[#allocation2] sm:$0xff] %vm169_vm2, %v2859_v38  ;;  %v2434_v56 = vadd.f32 %v2387_v31, %v2078_v17  ;;  %v5835_v22 = vpop.f32.mrb[82].mxu1 }
 0x196   : > { %2467 = vst.msk [vmem:[#allocation2 + $0xe8] sm:$0xff] %vm169_vm2, %v2435_v35  ;;  %v2862_v61 = vadd.f32 %v5835_v22, %v2506_v21  ;;  %v2710_v26 = vpop.f32.mrb[83].mxu1  ;;  %v2516_v35 = vld [vmem:[#allocation2 + $0x68] sm:$0xff] }
 0x197   : > { %2466 = vst.msk [vmem:[#allocation2 + $0xe0] sm:$0xff] %vm169_vm2, %v2434_v56  ;;  %v2081_v45 = vld [vmem:[#allocation2 + $0xf8] sm:$0xff]  ;;  %v2861_v29 = vadd.f32 %v2710_v26, %v2505_v25  ;;  %v5885_v30 = vpop.f32.mrb[82].mxu0  ;;  %v2515_v56 = vld [vmem:[#allocation2 + $0x60] sm:$0xff] }
 0x198   : > { %2894 = vst.msk [vmem:[#allocation2 + $0x18] sm:$0xff] %vm169_vm2, %v2862_v61  ;;  %v2437_v33 = vadd.f32 %v5827_v39, %v2081_v45  ;;  %v2080_v34 = vld [vmem:[#allocation2 + $0xf0] sm:$0xff]  ;;  %v3164_v3 = vpop.f32.mrb[83].mxu0 }
 0x199   : > { %2893 = vst.msk [vmem:[#allocation2 + $0x10] sm:$0xff] %vm169_vm2, %v2861_v29  ;;  %v2436_v37 = vadd.f32 %v2397_v52, %v2080_v34  ;;  %v5838_v46 = vpop.f32.mrb[84].mxu1 }
 0x19a   : > { %2469 = vst.msk [vmem:[#allocation2 + $0xf8] sm:$0xff] %vm169_vm2, %v2437_v33  ;;  %v2864_v5 = vadd.f32 %v5838_v46, %v2508_v4  ;;  %v2720_v12 = vpop.f32.mrb[85].mxu1  ;;  %v2518_v33 = vld [vmem:[#allocation2 + $0x78] sm:$0xff] }
 0x19b   : > { %2468 = vst.msk [vmem:[#allocation2 + $0xf0] sm:$0xff] %vm169_vm2, %v2436_v37  ;;  %v2863_v15 = vadd.f32 %v2720_v12, %v2507_v9  ;;  %v2958_v32 = vld [vmem:[#allocation2 + $0x8] sm:$0xff]  ;;  %v5888_v16 = vpop.f32.mrb[84].mxu0  ;;  %v2517_v37 = vld [vmem:[#allocation2 + $0x70] sm:$0xff] }
 0x19c   : > { %2896 = vst.msk [vmem:[#allocation2 + $0x28] sm:$0xff] %vm169_vm2, %v2864_v5  ;;  %v3314_v19 = vadd.f32 %v5882_v43, %v2958_v32  ;;  %v2957_v49 = vld [vmem:[#allocation2] sm:$0xff]  ;;  %v3174_v20 = vpop.f32.mrb[85].mxu0 }
 0x19d   : > { %2895 = vst.msk [vmem:[#allocation2 + $0x20] sm:$0xff] %vm169_vm2, %v2863_v15  ;;  %v3313_v23 = vadd.f32 %v3154_v18, %v2957_v49  ;;  %v5841_v24 = vpop.f32.mrb[86].mxu1 }
 0x19e   : > { %3346 = vst.msk [vmem:[#allocation2 + $0x8] sm:$0xff] %vm169_vm2, %v3314_v19  ;;  %v2866_v59 = vadd.f32 %v5841_v24, %v2510_v50  ;;  %v2730_v60 = vpop.f32.mrb[87].mxu1  ;;  %v2520_v19 = vld [vmem:[#allocation2 + $0x88] sm:$0xff] }
 0x19f   : > { %3345 = vst.msk [vmem:[#allocation2] sm:$0xff] %vm169_vm2, %v3313_v23  ;;  %v2865_v48 = vadd.f32 %v2730_v60, %v2509_v27  ;;  %v2960_v28 = vld [vmem:[#allocation2 + $0x18] sm:$0xff]  ;;  %v5891_v14 = vpop.f32.mrb[86].mxu0  ;;  %v2519_v23 = vld [vmem:[#allocation2 + $0x80] sm:$0xff] }
 0x1a0   : > { %2898 = vst.msk [vmem:[#allocation2 + $0x38] sm:$0xff] %vm169_vm2, %v2866_v59  ;;  %v3316_v62 = vadd.f32 %v5885_v30, %v2960_v28  ;;  %v2959_v63 = vld [vmem:[#allocation2 + $0x10] sm:$0xff]  ;;  %v3184_v53 = vpop.f32.mrb[87].mxu0 }
 0x1a1   : > { %2897 = vst.msk [vmem:[#allocation2 + $0x30] sm:$0xff] %vm169_vm2, %v2865_v48  ;;  %v3315_v0 = vadd.f32 %v3164_v3, %v2959_v63  ;;  %v5844_v54 = vpop.f32.mrb[88].mxu1 }
 0x1a2   : > { %3348 = vst.msk [vmem:[#allocation2 + $0x18] sm:$0xff] %vm169_vm2, %v3316_v62  ;;  %v2868_v31 = vadd.f32 %v5844_v54, %v2512_v1  ;;  %v2740_v6 = vpop.f32.mrb[89].mxu1  ;;  %v2522_v62 = vld [vmem:[#allocation2 + $0x98] sm:$0xff] }
 0x1a3   : > { %3347 = vst.msk [vmem:[#allocation2 + $0x10] sm:$0xff] %vm169_vm2, %v3315_v0  ;;  %v2867_v7 = vadd.f32 %v2740_v6, %v2511_v2  ;;  %v2962_v8 = vld [vmem:[#allocation2 + $0x28] sm:$0xff]  ;;  %v5894_v11 = vpop.f32.mrb[88].mxu0  ;;  %v2521_v0 = vld [vmem:[#allocation2 + $0x90] sm:$0xff] }
 0x1a4   : > { %2900 = vst.msk [vmem:[#allocation2 + $0x48] sm:$0xff] %vm169_vm2, %v2868_v31  ;;  %v3318_v55 = vadd.f32 %v5888_v16, %v2962_v8  ;;  %v2961_v36 = vld [vmem:[#allocation2 + $0x20] sm:$0xff]  ;;  %v3194_v51 = vpop.f32.mrb[89].mxu0 }
 0x1a5   : > { %2899 = vst.msk [vmem:[#allocation2 + $0x40] sm:$0xff] %vm169_vm2, %v2867_v7  ;;  %v3317_v39 = vadd.f32 %v3174_v20, %v2961_v36  ;;  %v5847_v57 = vpop.f32.mrb[90].mxu1 }
 0x1a6   : > { %3350 = vst.msk [vmem:[#allocation2 + $0x28] sm:$0xff] %vm169_vm2, %v3318_v55  ;;  %v2870_v52 = vadd.f32 %v5847_v57, %v2514_v41  ;;  %v2750_v10 = vpop.f32.mrb[91].mxu1  ;;  %v2524_v55 = vld [vmem:[#allocation2 + $0xa8] sm:$0xff] }
 0x1a7   : > { %3349 = vst.msk [vmem:[#allocation2 + $0x20] sm:$0xff] %vm169_vm2, %v3317_v39  ;;  %v2869_v13 = vadd.f32 %v2750_v10, %v2513_v42  ;;  %v2964_v58 = vld [vmem:[#allocation2 + $0x38] sm:$0xff]  ;;  %v5897_v40 = vpop.f32.mrb[90].mxu0  ;;  %v2523_v39 = vld [vmem:[#allocation2 + $0xa0] sm:$0xff] }
 0x1a8   : > { %2902 = vst.msk [vmem:[#allocation2 + $0x58] sm:$0xff] %vm169_vm2, %v2870_v52  ;;  %v3320_v44 = vadd.f32 %v5891_v14, %v2964_v58  ;;  %v2963_v47 = vld [vmem:[#allocation2 + $0x30] sm:$0xff]  ;;  %v3204_v38 = vpop.f32.mrb[91].mxu0 }
 0x1a9   : > { %2901 = vst.msk [vmem:[#allocation2 + $0x50] sm:$0xff] %vm169_vm2, %v2869_v13  ;;  %v3319_v43 = vadd.f32 %v3184_v53, %v2963_v47  ;;  %v5850_v17 = vpop.f32.mrb[92].mxu1 }
 0x1aa   : > { %3352 = vst.msk [vmem:[#allocation2 + $0x38] sm:$0xff] %vm169_vm2, %v3320_v44  ;;  %v2872_v18 = vadd.f32 %v5850_v17, %v2516_v35  ;;  %v2760_v21 = vpop.f32.mrb[93].mxu1  ;;  %v2526_v44 = vld [vmem:[#allocation2 + $0xb8] sm:$0xff] }
 0x1ab   : > { %3351 = vst.msk [vmem:[#allocation2 + $0x30] sm:$0xff] %vm169_vm2, %v3319_v43  ;;  %v2871_v22 = vadd.f32 %v2760_v21, %v2515_v56  ;;  %v2966_v61 = vld [vmem:[#allocation2 + $0x48] sm:$0xff]  ;;  %v5900_v25 = vpop.f32.mrb[92].mxu0  ;;  %v2525_v43 = vld [vmem:[#allocation2 + $0xb0] sm:$0xff] }
 0x1ac   : > { %2904 = vst.msk [vmem:[#allocation2 + $0x68] sm:$0xff] %vm169_vm2, %v2872_v18  ;;  %v3322_v26 = vadd.f32 %v5894_v11, %v2966_v61  ;;  %v2965_v45 = vld [vmem:[#allocation2 + $0x40] sm:$0xff]  ;;  %v3214_v29 = vpop.f32.mrb[93].mxu0 }
 0x1ad   : > { %2903 = vst.msk [vmem:[#allocation2 + $0x60] sm:$0xff] %vm169_vm2, %v2871_v22  ;;  %v3321_v30 = vadd.f32 %v3194_v51, %v2965_v45  ;;  %v5853_v34 = vpop.f32.mrb[94].mxu1 }
 0x1ae   : > { %3354 = vst.msk [vmem:[#allocation2 + $0x48] sm:$0xff] %vm169_vm2, %v3322_v26  ;;  %v2874_v3 = vadd.f32 %v5853_v34, %v2518_v33  ;;  %v2770_v4 = vpop.f32.mrb[95].mxu1  ;;  %v2528_v26 = vld [vmem:[#allocation2 + $0xc8] sm:$0xff] }
 0x1af   : > { %3353 = vst.msk [vmem:[#allocation2 + $0x40] sm:$0xff] %vm169_vm2, %v3321_v30  ;;  %v2873_v46 = vadd.f32 %v2770_v4, %v2517_v37  ;;  %v2968_v5 = vld [vmem:[#allocation2 + $0x58] sm:$0xff]  ;;  %v5903_v9 = vpop.f32.mrb[94].mxu0  ;;  %v2527_v30 = vld [vmem:[#allocation2 + $0xc0] sm:$0xff] }
 0x1b0   : > { %2906 = vst.msk [vmem:[#allocation2 + $0x78] sm:$0xff] %vm169_vm2, %v2874_v3  ;;  %v3324_v12 = vadd.f32 %v5897_v40, %v2968_v5  ;;  %v2967_v15 = vld [vmem:[#allocation2 + $0x50] sm:$0xff]  ;;  %v3224_v32 = vpop.f32.mrb[95].mxu0 }
 0x1b1   : > { %2905 = vst.msk [vmem:[#allocation2 + $0x70] sm:$0xff] %vm169_vm2, %v2873_v46  ;;  %v3323_v16 = vadd.f32 %v3204_v38, %v2967_v15  ;;  %v5856_v49 = vpop.f32.mrb[96].mxu1 }
 0x1b2   : > { %3356 = vst.msk [vmem:[#allocation2 + $0x58] sm:$0xff] %vm169_vm2, %v3324_v12  ;;  %v2876_v20 = vadd.f32 %v5856_v49, %v2520_v19  ;;  %v2780_v50 = vpop.f32.mrb[97].mxu1  ;;  %v2530_v12 = vld [vmem:[#allocation2 + $0xd8] sm:$0xff] }
 0x1b3   : > { %3355 = vst.msk [vmem:[#allocation2 + $0x50] sm:$0xff] %vm169_vm2, %v3323_v16  ;;  %v2875_v24 = vadd.f32 %v2780_v50, %v2519_v23  ;;  %v2970_v59 = vld [vmem:[#allocation2 + $0x68] sm:$0xff]  ;;  %v5906_v27 = vpop.f32.mrb[96].mxu0  ;;  %v2529_v16 = vld [vmem:[#allocation2 + $0xd0] sm:$0xff] }
 0x1b4   : > { %2908 = vst.msk [vmem:[#allocation2 + $0x88] sm:$0xff] %vm169_vm2, %v2876_v20  ;;  %v3326_v60 = vadd.f32 %v5900_v25, %v2970_v59  ;;  %v2969_v48 = vld [vmem:[#allocation2 + $0x60] sm:$0xff]  ;;  %v3234_v28 = vpop.f32.mrb[97].mxu0 }
 0x1b5   : > { %2907 = vst.msk [vmem:[#allocation2 + $0x80] sm:$0xff] %vm169_vm2, %v2875_v24  ;;  %v3325_v14 = vadd.f32 %v3214_v29, %v2969_v48  ;;  %v5859_v63 = vpop.f32.mrb[98].mxu1 }
 0x1b6   : > { %3358 = vst.msk [vmem:[#allocation2 + $0x68] sm:$0xff] %vm169_vm2, %v3326_v60  ;;  %v2878_v53 = vadd.f32 %v5859_v63, %v2522_v62  ;;  %v2790_v1 = vpop.f32.mrb[99].mxu1  ;;  %v2532_v60 = vld [vmem:[#allocation2 + $0xe8] sm:$0xff] }
 0x1b7   : > { %3357 = vst.msk [vmem:[#allocation2 + $0x60] sm:$0xff] %vm169_vm2, %v3325_v14  ;;  %v2877_v54 = vadd.f32 %v2790_v1, %v2521_v0  ;;  %v2972_v31 = vld [vmem:[#allocation2 + $0x78] sm:$0xff]  ;;  %v5909_v2 = vpop.f32.mrb[98].mxu0  ;;  %v2531_v14 = vld [vmem:[#allocation2 + $0xe0] sm:$0xff] }
 0x1b8   : > { %2910 = vst.msk [vmem:[#allocation2 + $0x98] sm:$0xff] %vm169_vm2, %v2878_v53  ;;  %v3328_v6 = vadd.f32 %v5903_v9, %v2972_v31  ;;  %v2971_v7 = vld [vmem:[#allocation2 + $0x70] sm:$0xff]  ;;  %v3244_v8 = vpop.f32.mrb[99].mxu0 }
 0x1b9   : > { %2909 = vst.msk [vmem:[#allocation2 + $0x90] sm:$0xff] %vm169_vm2, %v2877_v54  ;;  %v3327_v11 = vadd.f32 %v3224_v32, %v2971_v7  ;;  %v5862_v36 = vpop.f32.mrb[100].mxu1 }
 0x1ba   : > { %3360 = vst.msk [vmem:[#allocation2 + $0x78] sm:$0xff] %vm169_vm2, %v3328_v6  ;;  %v2880_v51 = vadd.f32 %v5862_v36, %v2524_v55  ;;  %v2800_v41 = vpop.f32.mrb[101].mxu1  ;;  %v2534_v6 = vld [vmem:[#allocation2 + $0xf8] sm:$0xff] }
 0x1bb   : > { %3359 = vst.msk [vmem:[#allocation2 + $0x70] sm:$0xff] %vm169_vm2, %v3327_v11  ;;  %v2879_v57 = vadd.f32 %v2800_v41, %v2523_v39  ;;  %v2974_v52 = vld [vmem:[#allocation2 + $0x88] sm:$0xff]  ;;  %v5912_v42 = vpop.f32.mrb[100].mxu0  ;;  %v2533_v11 = vld [vmem:[#allocation2 + $0xf0] sm:$0xff] }
 0x1bc   : > { %2912 = vst.msk [vmem:[#allocation2 + $0xa8] sm:$0xff] %vm169_vm2, %v2880_v51  ;;  %v3330_v10 = vadd.f32 %v5906_v27, %v2974_v52  ;;  %v2973_v13 = vld [vmem:[#allocation2 + $0x80] sm:$0xff]  ;;  %v3254_v58 = vpop.f32.mrb[101].mxu0 }
 0x1bd   : > { %2911 = vst.msk [vmem:[#allocation2 + $0xa0] sm:$0xff] %vm169_vm2, %v2879_v57  ;;  %v3329_v40 = vadd.f32 %v3234_v28, %v2973_v13  ;;  %v5865_v47 = vpop.f32.mrb[102].mxu1 }
 0x1be   : > { %3362 = vst.msk [vmem:[#allocation2 + $0x88] sm:$0xff] %vm169_vm2, %v3330_v10  ;;  %v2882_v38 = vadd.f32 %v5865_v47, %v2526_v44  ;;  %v2810_v35 = vpop.f32.mrb[103].mxu1  ;;  %v3411_v10 = vld [vmem:[#allocation2 + $0x8] sm:$0xff] }
 0x1bf   : > { %3361 = vst.msk [vmem:[#allocation2 + $0x80] sm:$0xff] %vm169_vm2, %v3329_v40  ;;  %v2881_v17 = vadd.f32 %v2810_v35, %v2525_v43  ;;  %v2976_v18 = vld [vmem:[#allocation2 + $0x98] sm:$0xff]  ;;  %v5915_v56 = vpop.f32.mrb[102].mxu0  ;;  %v3410_v40 = vld [vmem:[#allocation2] sm:$0xff] }
 0x1c0   : > { %2914 = vst.msk [vmem:[#allocation2 + $0xb8] sm:$0xff] %vm169_vm2, %v2882_v38  ;;  %v3332_v21 = vadd.f32 %v5909_v2, %v2976_v18  ;;  %v2975_v22 = vld [vmem:[#allocation2 + $0x90] sm:$0xff]  ;;  %v3264_v61 = vpop.f32.mrb[103].mxu0 }
 0x1c1   : > { %2913 = vst.msk [vmem:[#allocation2 + $0xb0] sm:$0xff] %vm169_vm2, %v2881_v17  ;;  %v3331_v25 = vadd.f32 %v3244_v8, %v2975_v22  ;;  %v5868_v45 = vpop.f32.mrb[104].mxu1 }
 0x1c2   : > { %3364 = vst.msk [vmem:[#allocation2 + $0x98] sm:$0xff] %vm169_vm2, %v3332_v21  ;;  %v2884_v29 = vadd.f32 %v5868_v45, %v2528_v26  ;;  %v2820_v33 = vpop.f32.mrb[105].mxu1  ;;  %v3413_v21 = vld [vmem:[#allocation2 + $0x18] sm:$0xff] }
 0x1c3   : > { %3363 = vst.msk [vmem:[#allocation2 + $0x90] sm:$0xff] %vm169_vm2, %v3331_v25  ;;  %v2883_v34 = vadd.f32 %v2820_v33, %v2527_v30  ;;  %v2978_v3 = vld [vmem:[#allocation2 + $0xa8] sm:$0xff]  ;;  %v5918_v37 = vpop.f32.mrb[104].mxu0  ;;  %v3412_v25 = vld [vmem:[#allocation2 + $0x10] sm:$0xff] }
 0x1c4   : > { %2916 = vst.msk [vmem:[#allocation2 + $0xc8] sm:$0xff] %vm169_vm2, %v2884_v29  ;;  %v3334_v4 = vadd.f32 %v5912_v42, %v2978_v3  ;;  %v2977_v46 = vld [vmem:[#allocation2 + $0xa0] sm:$0xff]  ;;  %v3274_v5 = vpop.f32.mrb[105].mxu0 }
 0x1c5   : > { %2915 = vst.msk [vmem:[#allocation2 + $0xc0] sm:$0xff] %vm169_vm2, %v2883_v34  ;;  %v3333_v9 = vadd.f32 %v3254_v58, %v2977_v46  ;;  %v5871_v15 = vpop.f32.mrb[106].mxu1 }
 0x1c6   : > { %3366 = vst.msk [vmem:[#allocation2 + $0xa8] sm:$0xff] %vm169_vm2, %v3334_v4  ;;  %v2886_v32 = vadd.f32 %v5871_v15, %v2530_v12  ;;  %v2830_v19 = vpop.f32.mrb[107].mxu1  ;;  %v3415_v4 = vld [vmem:[#allocation2 + $0x28] sm:$0xff] }
 0x1c7   : > { %3365 = vst.msk [vmem:[#allocation2 + $0xa0] sm:$0xff] %vm169_vm2, %v3333_v9  ;;  %v2885_v49 = vadd.f32 %v2830_v19, %v2529_v16  ;;  %v2980_v20 = vld [vmem:[#allocation2 + $0xb8] sm:$0xff]  ;;  %v5921_v23 = vpop.f32.mrb[106].mxu0  ;;  %v3414_v9 = vld [vmem:[#allocation2 + $0x20] sm:$0xff] }
 0x1c8   : > { %2918 = vst.msk [vmem:[#allocation2 + $0xd8] sm:$0xff] %vm169_vm2, %v2886_v32  ;;  %v3336_v50 = vadd.f32 %v5915_v56, %v2980_v20  ;;  %v2979_v24 = vld [vmem:[#allocation2 + $0xb0] sm:$0xff]  ;;  %v3284_v59 = vpop.f32.mrb[107].mxu0 }
 0x1c9   : > { %2917 = vst.msk [vmem:[#allocation2 + $0xd0] sm:$0xff] %vm169_vm2, %v2885_v49  ;;  %v3335_v27 = vadd.f32 %v3264_v61, %v2979_v24  ;;  %v5874_v48 = vpop.f32.mrb[108].mxu1 }
 0x1ca   : > { %3368 = vst.msk [vmem:[#allocation2 + $0xb8] sm:$0xff] %vm169_vm2, %v3336_v50  ;;  %v2888_v28 = vadd.f32 %v5874_v48, %v2532_v60  ;;  %v2840_v62 = vpop.f32.mrb[109].mxu1  ;;  %v3417_v50 = vld [vmem:[#allocation2 + $0x38] sm:$0xff] }
 0x1cb   : > { %3367 = vst.msk [vmem:[#allocation2 + $0xb0] sm:$0xff] %vm169_vm2, %v3335_v27  ;;  %v2887_v63 = vadd.f32 %v2840_v62, %v2531_v14  ;;  %v2982_v53 = vld [vmem:[#allocation2 + $0xc8] sm:$0xff]  ;;  %v5924_v0 = vpop.f32.mrb[108].mxu0  ;;  %v3416_v27 = vld [vmem:[#allocation2 + $0x30] sm:$0xff] }
 0x1cc   : > { %2920 = vst.msk [vmem:[#allocation2 + $0xe8] sm:$0xff] %vm169_vm2, %v2888_v28  ;;  %v3338_v1 = vadd.f32 %v5918_v37, %v2982_v53  ;;  %v2981_v54 = vld [vmem:[#allocation2 + $0xc0] sm:$0xff]  ;;  %v3294_v31 = vpop.f32.mrb[109].mxu0 }
 0x1cd   : > { %2919 = vst.msk [vmem:[#allocation2 + $0xe0] sm:$0xff] %vm169_vm2, %v2887_v63  ;;  %v3337_v2 = vadd.f32 %v3274_v5, %v2981_v54  ;;  %v5877_v7 = vpop.f32.mrb[110].mxu1 }
 0x1ce   : > { %3370 = vst.msk [vmem:[#allocation2 + $0xc8] sm:$0xff] %vm169_vm2, %v3338_v1  ;;  %v2890_v8 = vadd.f32 %v5877_v7, %v2534_v6  ;;  %v2850_v55 = vpop.f32.mrb[111].mxu1  ;;  %v3419_v1 = vld [vmem:[#allocation2 + $0x48] sm:$0xff]  ;;  %v7417_v7 = vld [vmem:[%s7984_s2] ss:$0 sm:$0xff] }
 0x1cf   : > { %3369 = vst.msk [vmem:[#allocation2 + $0xc0] sm:$0xff] %vm169_vm2, %v3337_v2  ;;  %v2889_v36 = vadd.f32 %v2850_v55, %v2533_v11  ;;  %v2984_v51 = vld [vmem:[#allocation2 + $0xd8] sm:$0xff]  ;;  %v5927_v39 = vpop.f32.mrb[110].mxu0  ;;  %v3418_v2 = vld [vmem:[#allocation2 + $0x40] sm:$0xff] }
 0x1d0   : > { %2922 = vst.msk [vmem:[#allocation2 + $0xf8] sm:$0xff] %vm169_vm2, %v2890_v8  ;;  %v3340_v41 = vadd.f32 %v5921_v23, %v2984_v51  ;;  %v2983_v57 = vld [vmem:[#allocation2 + $0xd0] sm:$0xff]  ;;  %v3304_v52 = vpop.f32.mrb[111].mxu0 }
 0x1d1   : > { %2921 = vst.msk [vmem:[#allocation2 + $0xf0] sm:$0xff] %vm169_vm2, %v2889_v36  ;;  %v3339_v42 = vadd.f32 %v3284_v59, %v2983_v57  ;;  %v5932_v13 = vpop.f32.mrb[112].mxu1 }
 0x1d2   : > { %3372 = vst.msk [vmem:[#allocation2 + $0xd8] sm:$0xff] %vm169_vm2, %v3340_v41  ;;  %v3767_v58 = vadd.f32 %v5932_v13, %v3411_v10  ;;  %v3607_v44 = vpop.f32.mrb[113].mxu1 }
 0x1d3   : > { %3371 = vst.msk [vmem:[#allocation2 + $0xd0] sm:$0xff] %vm169_vm2, %v3339_v42  ;;  %v2986_v47 = vld [vmem:[#allocation2 + $0xe8] sm:$0xff]  ;;  %v3766_v38 = vadd.f32 %v3607_v44, %v3410_v40  ;;  %v5982_v43 = vpop.f32.mrb[112].mxu0  ;;  %v3420_v40 = vld [vmem:[#allocation2 + $0x50] sm:$0xff] }
 0x1d4   : > { %3799 = vst.msk [vmem:[#allocation2 + $0x8] sm:$0xff] %vm169_vm2, %v3767_v58  ;;  %v3342_v35 = vadd.f32 %v5924_v0, %v2986_v47  ;;  %v2985_v17 = vld [vmem:[#allocation2 + $0xe0] sm:$0xff]  ;;  %v4060_v18 = vpop.f32.mrb[113].mxu0 }
 0x1d5   : > { %3798 = vst.msk [vmem:[#allocation2] sm:$0xff] %vm169_vm2, %v3766_v38  ;;  %v3341_v56 = vadd.f32 %v3294_v31, %v2985_v17  ;;  %v5935_v22 = vpop.f32.mrb[114].mxu1 }
 0x1d6   : > { %3374 = vst.msk [vmem:[#allocation2 + $0xe8] sm:$0xff] %vm169_vm2, %v3342_v35  ;;  %v3769_v61 = vadd.f32 %v5935_v22, %v3413_v21  ;;  %v3617_v26 = vpop.f32.mrb[115].mxu1 }
 0x1d7   : > { %3373 = vst.msk [vmem:[#allocation2 + $0xe0] sm:$0xff] %vm169_vm2, %v3341_v56  ;;  %v2988_v45 = vld [vmem:[#allocation2 + $0xf8] sm:$0xff]  ;;  %v3768_v29 = vadd.f32 %v3617_v26, %v3412_v25  ;;  %v5985_v30 = vpop.f32.mrb[114].mxu0  ;;  %v3423_v26 = vld [vmem:[#allocation2 + $0x68] sm:$0xff] }
 0x1d8   : > { %3801 = vst.msk [vmem:[#allocation2 + $0x18] sm:$0xff] %vm169_vm2, %v3769_v61  ;;  %v3344_v33 = vadd.f32 %v5927_v39, %v2988_v45  ;;  %v2987_v34 = vld [vmem:[#allocation2 + $0xf0] sm:$0xff]  ;;  %v4070_v3 = vpop.f32.mrb[115].mxu0 }
 0x1d9   : > { %3800 = vst.msk [vmem:[#allocation2 + $0x10] sm:$0xff] %vm169_vm2, %v3768_v29  ;;  %v3343_v37 = vadd.f32 %v3304_v52, %v2987_v34  ;;  %v5938_v46 = vpop.f32.mrb[116].mxu1  ;;  %v3421_v52 = vld [vmem:[#allocation2 + $0x58] sm:$0xff] }
 0x1da   : > { %3376 = vst.msk [vmem:[#allocation2 + $0xf8] sm:$0xff] %vm169_vm2, %v3344_v33  ;;  %v3771_v5 = vadd.f32 %v5938_v46, %v3415_v4  ;;  %v3627_v12 = vpop.f32.mrb[117].mxu1  ;;  %v3422_v33 = vld [vmem:[#allocation2 + $0x60] sm:$0xff] }
 0x1db   : > { %3375 = vst.msk [vmem:[#allocation2 + $0xf0] sm:$0xff] %vm169_vm2, %v3343_v37  ;;  %v3770_v15 = vadd.f32 %v3627_v12, %v3414_v9  ;;  %v3864_v32 = vld [vmem:[#allocation2 + $0x8] sm:$0xff]  ;;  %v5988_v16 = vpop.f32.mrb[116].mxu0 }
 0x1dc   : > { %3803 = vst.msk [vmem:[#allocation2 + $0x28] sm:$0xff] %vm169_vm2, %v3771_v5  ;;  %v4220_v19 = vadd.f32 %v5982_v43, %v3864_v32  ;;  %v3863_v49 = vld [vmem:[#allocation2] sm:$0xff]  ;;  %v4080_v20 = vpop.f32.mrb[117].mxu0 }
 0x1dd   : > { %3802 = vst.msk [vmem:[#allocation2 + $0x20] sm:$0xff] %vm169_vm2, %v3770_v15  ;;  %v4219_v23 = vadd.f32 %v4060_v18, %v3863_v49  ;;  %v5941_v24 = vpop.f32.mrb[118].mxu1 }
 0x1de   : > { %4252 = vst.msk [vmem:[#allocation2 + $0x8] sm:$0xff] %vm169_vm2, %v4220_v19  ;;  %v3773_v59 = vadd.f32 %v5941_v24, %v3417_v50  ;;  %v3637_v60 = vpop.f32.mrb[119].mxu1 }
 0x1df   : > { %4251 = vst.msk [vmem:[#allocation2] sm:$0xff] %vm169_vm2, %v4219_v23  ;;  %v3772_v48 = vadd.f32 %v3637_v60, %v3416_v27  ;;  %v3866_v28 = vld [vmem:[#allocation2 + $0x18] sm:$0xff]  ;;  %v5991_v14 = vpop.f32.mrb[118].mxu0  ;;  %v3424_v27 = vld [vmem:[#allocation2 + $0x70] sm:$0xff] }
 0x1e0   : > { %3805 = vst.msk [vmem:[#allocation2 + $0x38] sm:$0xff] %vm169_vm2, %v3773_v59  ;;  %v4222_v62 = vadd.f32 %v5985_v30, %v3866_v28  ;;  %v3865_v63 = vld [vmem:[#allocation2 + $0x10] sm:$0xff]  ;;  %v4090_v53 = vpop.f32.mrb[119].mxu0 }
 0x1e1   : > { %3804 = vst.msk [vmem:[#allocation2 + $0x30] sm:$0xff] %vm169_vm2, %v3772_v48  ;;  %v4221_v0 = vadd.f32 %v4070_v3, %v3865_v63  ;;  %v5944_v54 = vpop.f32.mrb[120].mxu1 }
 0x1e2   : > { %4254 = vst.msk [vmem:[#allocation2 + $0x18] sm:$0xff] %vm169_vm2, %v4222_v62  ;;  %v3775_v31 = vadd.f32 %v5944_v54, %v3419_v1  ;;  %v3647_v6 = vpop.f32.mrb[121].mxu1 }
 0x1e3   : > { %4253 = vst.msk [vmem:[#allocation2 + $0x10] sm:$0xff] %vm169_vm2, %v4221_v0  ;;  %v3774_v8 = vadd.f32 %v3647_v6, %v3418_v2  ;;  %v3868_v11 = vld [vmem:[#allocation2 + $0x28] sm:$0xff]  ;;  %v5994_v55 = vpop.f32.mrb[120].mxu0 }
 0x1e4   : > { %3807 = vst.msk [vmem:[#allocation2 + $0x48] sm:$0xff] %vm169_vm2, %v3775_v31  ;;  %v4224_v36 = vadd.f32 %v5988_v16, %v3868_v11  ;;  %v3867_v51 = vld [vmem:[#allocation2 + $0x20] sm:$0xff]  ;;  %v4100_v39 = vpop.f32.mrb[121].mxu0  ;;  %v3427_v11 = vld [vmem:[#allocation2 + $0x88] sm:$0xff] }
 0x1e5   : > { %v4284_v41 = vld [vmem:[#allocation2 + $0x8] sm:$0xff]  ;;  %3806 = vst.msk [vmem:[#allocation2 + $0x40] sm:$0xff] %vm169_vm2, %v3774_v8  ;;  %v4223_v57 = vadd.f32 %v4080_v20, %v3867_v51  ;;  %v5947_v42 = vpop.f32.mrb[122].mxu1  ;;  %v3425_v20 = vld [vmem:[#allocation2 + $0x78] sm:$0xff] }
 0x1e6   : > { %v7423_v10 = vadd.f32 %v7417_v7, %v4284_v41  ;;  %v4283_v13 = vld [vmem:[#allocation2] sm:$0xff]  ;;  %4256 = vst.msk [vmem:[#allocation2 + $0x28] sm:$0xff] %vm169_vm2, %v4224_v36  ;;  %v3777_v58 = vadd.f32 %v5947_v42, %v3421_v52  ;;  %v3657_v44 = vpop.f32.mrb[123].mxu1 }
 0x1e7   : > { %v7427_v47 = vadd.f32 %v7417_v7, %v4283_v13  ;;  %4255 = vst.msk [vmem:[#allocation2 + $0x20] sm:$0xff] %vm169_vm2, %v4223_v57  ;;  %v3776_v38 = vadd.f32 %v3657_v44, %v3420_v40  ;;  %v3870_v43 = vld [vmem:[#allocation2 + $0x38] sm:$0xff]  ;;  %v5997_v35 = vpop.f32.mrb[122].mxu0  ;;  %v3426_v41 = vld [vmem:[#allocation2 + $0x80] sm:$0xff] }
 0x1e8   : > { %3809 = vst.msk [vmem:[#allocation2 + $0x58] sm:$0xff] %vm169_vm2, %v3777_v58  ;;  %v4226_v17 = vadd.f32 %v5991_v14, %v3870_v43  ;;  %v3869_v18 = vld [vmem:[#allocation2 + $0x30] sm:$0xff]  ;;  %v4110_v56 = vpop.f32.mrb[123].mxu0  ;;  %v4355_v21 = vsel %vm169_vm2, %v7423_v10, 0.0 }
 0x1e9   : > { %v4354_v22 = vsel %vm169_vm2, %v7427_v47, 0.0  ;;  %v4286_v61 = vld [vmem:[#allocation2 + $0x18] sm:$0xff]  ;;  %3808 = vst.msk [vmem:[#allocation2 + $0x50] sm:$0xff] %vm169_vm2, %v3776_v38  ;;  %v4225_v25 = vadd.f32 %v4090_v53, %v3869_v18  ;;  %v5950_v45 = vpop.f32.mrb[124].mxu1 }
 0x1ea   : > { %v4285_v29 = vld [vmem:[#allocation2 + $0x10] sm:$0xff]  ;;  %4258 = vst.msk [vmem:[#allocation2 + $0x38] sm:$0xff] %vm169_vm2, %v4226_v17  ;;  %v3779_v30 = vadd.f32 %v5950_v45, %v3423_v26  ;;  %v3667_v34 = vpop.f32.mrb[125].mxu1  ;;  %v7438_v3 = vadd.f32 %v7417_v7, %v4286_v61  ;;  %v4356_v9 = vadd.f32 %v4355_v21, %v4354_v22  ;;  %v3429_v22 = vld [vmem:[#allocation2 + $0x98] sm:$0xff] }
 0x1eb   : > { %v7441_v37 = vadd.f32 %v7417_v7, %v4285_v29  ;;  %4257 = vst.msk [vmem:[#allocation2 + $0x30] sm:$0xff] %vm169_vm2, %v4225_v25  ;;  %v3778_v4 = vadd.f32 %v3667_v34, %v3422_v33  ;;  %v3872_v46 = vld [vmem:[#allocation2 + $0x48] sm:$0xff]  ;;  %v6000_v5 = vpop.f32.mrb[124].mxu0  ;;  %v3428_v29 = vld [vmem:[#allocation2 + $0x90] sm:$0xff] }
 0x1ec   : > { %3811 = vst.msk [vmem:[#allocation2 + $0x68] sm:$0xff] %vm169_vm2, %v3779_v30  ;;  %v4228_v12 = vadd.f32 %v5994_v55, %v3872_v46  ;;  %v3871_v15 = vld [vmem:[#allocation2 + $0x40] sm:$0xff]  ;;  %v4120_v32 = vpop.f32.mrb[125].mxu0  ;;  %v4359_v48 = vsel %vm169_vm2, %v7438_v3, 0.0 }
 0x1ed   : > { %v4357_v16 = vsel %vm169_vm2, %v7441_v37, 0.0  ;;  %v4288_v19 = vld [vmem:[#allocation2 + $0x28] sm:$0xff]  ;;  %3810 = vst.msk [vmem:[#allocation2 + $0x60] sm:$0xff] %vm169_vm2, %v3778_v4  ;;  %v4227_v49 = vadd.f32 %v4100_v39, %v3871_v15  ;;  %v5953_v23 = vpop.f32.mrb[126].mxu1 }
 0x1ee   : > { %v4358_v50 = vadd.f32 %v4357_v16, %v4356_v9  ;;  %v4287_v24 = vld [vmem:[#allocation2 + $0x20] sm:$0xff]  ;;  %4260 = vst.msk [vmem:[#allocation2 + $0x48] sm:$0xff] %vm169_vm2, %v4228_v12  ;;  %v3781_v59 = vadd.f32 %v5953_v23, %v3425_v20  ;;  %v3677_v60 = vpop.f32.mrb[127].mxu1  ;;  %v7452_v28 = vadd.f32 %v7417_v7, %v4288_v19  ;;  %v3431_v23 = vld [vmem:[#allocation2 + $0xa8] sm:$0xff] }
 0x1ef   : > { %v7455_v14 = vadd.f32 %v7417_v7, %v4287_v24  ;;  %4259 = vst.msk [vmem:[#allocation2 + $0x40] sm:$0xff] %vm169_vm2, %v4227_v49  ;;  %v3780_v62 = vadd.f32 %v3677_v60, %v3424_v27  ;;  %v3874_v63 = vld [vmem:[#allocation2 + $0x58] sm:$0xff]  ;;  %v6003_v53 = vpop.f32.mrb[126].mxu0  ;;  %v3430_v60 = vld [vmem:[#allocation2 + $0xa0] sm:$0xff] }
 0x1f0   : > { %v4360_v0 = vadd.f32 %v4359_v48, %v4358_v50  ;;  %3813 = vst.msk [vmem:[#allocation2 + $0x78] sm:$0xff] %vm169_vm2, %v3781_v59  ;;  %v4230_v1 = vadd.f32 %v5997_v35, %v3874_v63  ;;  %v3873_v54 = vld [vmem:[#allocation2 + $0x50] sm:$0xff]  ;;  %v4130_v31 = vpop.f32.mrb[127].mxu0  ;;  %v4363_v52 = vsel %vm169_vm2, %v7452_v28, 0.0 }
 0x1f1   : > { %v4361_v2 = vsel %vm169_vm2, %v7455_v14, 0.0  ;;  %v4290_v6 = vld [vmem:[#allocation2 + $0x38] sm:$0xff]  ;;  %3812 = vst.msk [vmem:[#allocation2 + $0x70] sm:$0xff] %vm169_vm2, %v3780_v62  ;;  %v4229_v8 = vadd.f32 %v4110_v56, %v3873_v54  ;;  %v5956_v55 = vpop.f32.mrb[128].mxu1 }
 0x1f2   : > { %v4362_v36 = vadd.f32 %v4361_v2, %v4360_v0  ;;  %v4289_v51 = vld [vmem:[#allocation2 + $0x30] sm:$0xff]  ;;  %4262 = vst.msk [vmem:[#allocation2 + $0x58] sm:$0xff] %vm169_vm2, %v4230_v1  ;;  %v3783_v39 = vadd.f32 %v5956_v55, %v3427_v11  ;;  %v3687_v57 = vpop.f32.mrb[129].mxu1  ;;  %v7466_v42 = vadd.f32 %v7417_v7, %v4290_v6 }
 0x1f3   : > { %v7469_v13 = vadd.f32 %v7417_v7, %v4289_v51  ;;  %4261 = vst.msk [vmem:[#allocation2 + $0x50] sm:$0xff] %vm169_vm2, %v4229_v8  ;;  %v3782_v58 = vadd.f32 %v3687_v57, %v3426_v41  ;;  %v3876_v40 = vld [vmem:[#allocation2 + $0x68] sm:$0xff]  ;;  %v6006_v44 = vpop.f32.mrb[128].mxu0  ;;  %v3433_v51 = vld [vmem:[#allocation2 + $0xb8] sm:$0xff] }
 0x1f4   : > { %v4364_v38 = vadd.f32 %v4363_v52, %v4362_v36  ;;  %3815 = vst.msk [vmem:[#allocation2 + $0x88] sm:$0xff] %vm169_vm2, %v3783_v39  ;;  %v4232_v43 = vadd.f32 %v6000_v5, %v3876_v40  ;;  %v3875_v35 = vld [vmem:[#allocation2 + $0x60] sm:$0xff]  ;;  %v4140_v17 = vpop.f32.mrb[129].mxu0  ;;  %v4367_v33 = vsel %vm169_vm2, %v7466_v42, 0.0 }
 0x1f5   : > { %v4365_v18 = vsel %vm169_vm2, %v7469_v13, 0.0  ;;  %v4292_v56 = vld [vmem:[#allocation2 + $0x48] sm:$0xff]  ;;  %3814 = vst.msk [vmem:[#allocation2 + $0x80] sm:$0xff] %vm169_vm2, %v3782_v58  ;;  %v4231_v21 = vadd.f32 %v4120_v32, %v3875_v35  ;;  %v5959_v61 = vpop.f32.mrb[130].mxu1  ;;  %v3432_v58 = vld [vmem:[#allocation2 + $0xb0] sm:$0xff] }
 0x1f6   : > { %v4366_v25 = vadd.f32 %v4365_v18, %v4364_v38  ;;  %v4291_v26 = vld [vmem:[#allocation2 + $0x40] sm:$0xff]  ;;  %4264 = vst.msk [vmem:[#allocation2 + $0x68] sm:$0xff] %vm169_vm2, %v4232_v43  ;;  %v3785_v45 = vadd.f32 %v5959_v61, %v3429_v22  ;;  %v3697_v30 = vpop.f32.mrb[131].mxu1  ;;  %v7480_v34 = vadd.f32 %v7417_v7, %v4292_v56 }
 0x1f7   : > { %v7483_v4 = vadd.f32 %v7417_v7, %v4291_v26  ;;  %4263 = vst.msk [vmem:[#allocation2 + $0x60] sm:$0xff] %vm169_vm2, %v4231_v21  ;;  %v3784_v46 = vadd.f32 %v3697_v30, %v3428_v29  ;;  %v3878_v5 = vld [vmem:[#allocation2 + $0x78] sm:$0xff]  ;;  %v6009_v9 = vpop.f32.mrb[130].mxu0  ;;  %v3435_v29 = vld [vmem:[#allocation2 + $0xc8] sm:$0xff] }
 0x1f8   : > { %v4368_v12 = vadd.f32 %v4367_v33, %v4366_v25  ;;  %3817 = vst.msk [vmem:[#allocation2 + $0x98] sm:$0xff] %vm169_vm2, %v3785_v45  ;;  %v4234_v15 = vadd.f32 %v6003_v53, %v3878_v5  ;;  %v3877_v32 = vld [vmem:[#allocation2 + $0x70] sm:$0xff]  ;;  %v4150_v16 = vpop.f32.mrb[131].mxu0  ;;  %v4371_v62 = vsel %vm169_vm2, %v7480_v34, 0.0 }
 0x1f9   : > { %v4369_v19 = vsel %vm169_vm2, %v7483_v4, 0.0  ;;  %v4294_v49 = vld [vmem:[#allocation2 + $0x58] sm:$0xff]  ;;  %3816 = vst.msk [vmem:[#allocation2 + $0x90] sm:$0xff] %vm169_vm2, %v3784_v46  ;;  %v4233_v20 = vadd.f32 %v4130_v31, %v3877_v32  ;;  %v5962_v50 = vpop.f32.mrb[132].mxu1 }
 0x1fa   : > { %v4370_v24 = vadd.f32 %v4369_v19, %v4368_v12  ;;  %v4293_v59 = vld [vmem:[#allocation2 + $0x50] sm:$0xff]  ;;  %4266 = vst.msk [vmem:[#allocation2 + $0x78] sm:$0xff] %vm169_vm2, %v4234_v15  ;;  %v3787_v27 = vadd.f32 %v5962_v50, %v3431_v23  ;;  %v3707_v48 = vpop.f32.mrb[133].mxu1  ;;  %v7494_v63 = vadd.f32 %v7417_v7, %v4294_v49  ;;  %v3434_v12 = vld [vmem:[#allocation2 + $0xc0] sm:$0xff] }
 0x1fb   : > { %v7497_v53 = vadd.f32 %v7417_v7, %v4293_v59  ;;  %4265 = vst.msk [vmem:[#allocation2 + $0x70] sm:$0xff] %vm169_vm2, %v4233_v20  ;;  %v3786_v0 = vadd.f32 %v3707_v48, %v3430_v60  ;;  %v3880_v1 = vld [vmem:[#allocation2 + $0x88] sm:$0xff]  ;;  %v6012_v54 = vpop.f32.mrb[132].mxu0 }
 0x1fc   : > { %v4372_v31 = vadd.f32 %v4371_v62, %v4370_v24  ;;  %3819 = vst.msk [vmem:[#allocation2 + $0xa8] sm:$0xff] %vm169_vm2, %v3787_v27  ;;  %v4236_v2 = vadd.f32 %v6006_v44, %v3880_v1  ;;  %v3879_v6 = vld [vmem:[#allocation2 + $0x80] sm:$0xff]  ;;  %v4160_v8 = vpop.f32.mrb[133].mxu0  ;;  %v4375_v44 = vsel %vm169_vm2, %v7494_v63, 0.0  ;;  %v3437_v62 = vld [vmem:[#allocation2 + $0xd8] sm:$0xff] }
 0x1fd   : > { %v4373_v11 = vsel %vm169_vm2, %v7497_v53, 0.0  ;;  %v4296_v55 = vld [vmem:[#allocation2 + $0x68] sm:$0xff]  ;;  %3818 = vst.msk [vmem:[#allocation2 + $0xa0] sm:$0xff] %vm169_vm2, %v3786_v0  ;;  %v4235_v36 = vadd.f32 %v4140_v17, %v3879_v6  ;;  %v5965_v39 = vpop.f32.mrb[134].mxu1  ;;  %v3436_v6 = vld [vmem:[#allocation2 + $0xd0] sm:$0xff] }
 0x1fe   : > { %v4374_v41 = vadd.f32 %v4373_v11, %v4372_v31  ;;  %v4295_v57 = vld [vmem:[#allocation2 + $0x60] sm:$0xff]  ;;  %4268 = vst.msk [vmem:[#allocation2 + $0x88] sm:$0xff] %vm169_vm2, %v4236_v2  ;;  %v3789_v52 = vadd.f32 %v5965_v39, %v3433_v51  ;;  %v3717_v40 = vpop.f32.mrb[135].mxu1  ;;  %v7508_v38 = vadd.f32 %v7417_v7, %v4296_v55 }
 0x1ff   : > { %v7511_v43 = vadd.f32 %v7417_v7, %v4295_v57  ;;  %4267 = vst.msk [vmem:[#allocation2 + $0x80] sm:$0xff] %vm169_vm2, %v4235_v36  ;;  %v3788_v35 = vadd.f32 %v3717_v40, %v3432_v58  ;;  %v3882_v17 = vld [vmem:[#allocation2 + $0x98] sm:$0xff]  ;;  %v6015_v18 = vpop.f32.mrb[134].mxu0 }
 0x200   : > { %v4376_v56 = vadd.f32 %v4375_v44, %v4374_v41  ;;  %3821 = vst.msk [vmem:[#allocation2 + $0xb8] sm:$0xff] %vm169_vm2, %v3789_v52  ;;  %v4238_v21 = vadd.f32 %v6009_v9, %v3882_v17  ;;  %v3881_v22 = vld [vmem:[#allocation2 + $0x90] sm:$0xff]  ;;  %v4170_v61 = vpop.f32.mrb[135].mxu0  ;;  %v4379_v9 = vsel %vm169_vm2, %v7508_v38, 0.0  ;;  %v3439_v17 = vld [vmem:[#allocation2 + $0xe8] sm:$0xff] }
 0x201   : > { %v4377_v25 = vsel %vm169_vm2, %v7511_v43, 0.0  ;;  %v4298_v26 = vld [vmem:[#allocation2 + $0x78] sm:$0xff]  ;;  %3820 = vst.msk [vmem:[#allocation2 + $0xb0] sm:$0xff] %vm169_vm2, %v3788_v35  ;;  %v4237_v45 = vadd.f32 %v4150_v16, %v3881_v22  ;;  %v5968_v30 = vpop.f32.mrb[136].mxu1 }
 0x202   : > { %v4378_v33 = vadd.f32 %v4377_v25, %v4376_v56  ;;  %v4297_v46 = vld [vmem:[#allocation2 + $0x70] sm:$0xff]  ;;  %4270 = vst.msk [vmem:[#allocation2 + $0x98] sm:$0xff] %vm169_vm2, %v4238_v21  ;;  %v3791_v5 = vadd.f32 %v5968_v30, %v3435_v29  ;;  %v3727_v15 = vpop.f32.mrb[137].mxu1  ;;  %v7522_v32 = vadd.f32 %v7417_v7, %v4298_v26  ;;  %v3438_v26 = vld [vmem:[#allocation2 + $0xe0] sm:$0xff] }
 0x203   : > { %v7525_v19 = vadd.f32 %v7417_v7, %v4297_v46  ;;  %4269 = vst.msk [vmem:[#allocation2 + $0x90] sm:$0xff] %vm169_vm2, %v4237_v45  ;;  %v3790_v16 = vadd.f32 %v3727_v15, %v3434_v12  ;;  %v3884_v49 = vld [vmem:[#allocation2 + $0xa8] sm:$0xff]  ;;  %v6018_v20 = vpop.f32.mrb[136].mxu0 }
 0x204   : > { %v4380_v23 = vadd.f32 %v4379_v9, %v4378_v33  ;;  %3823 = vst.msk [vmem:[#allocation2 + $0xc8] sm:$0xff] %vm169_vm2, %v3791_v5  ;;  %v4240_v50 = vadd.f32 %v6012_v54, %v3884_v49  ;;  %v3883_v24 = vld [vmem:[#allocation2 + $0xa0] sm:$0xff]  ;;  %v4180_v59 = vpop.f32.mrb[137].mxu0  ;;  %v4383_v54 = vsel %vm169_vm2, %v7522_v32, 0.0 }
 0x205   : > { %v4381_v27 = vsel %vm169_vm2, %v7525_v19, 0.0  ;;  %v4300_v60 = vld [vmem:[#allocation2 + $0x88] sm:$0xff]  ;;  %3822 = vst.msk [vmem:[#allocation2 + $0xc0] sm:$0xff] %vm169_vm2, %v3790_v16  ;;  %v4239_v48 = vadd.f32 %v4160_v8, %v3883_v24  ;;  %v5971_v0 = vpop.f32.mrb[138].mxu1 }
 0x206   : > { %v4382_v1 = vadd.f32 %v4381_v27, %v4380_v23  ;;  %v4299_v31 = vld [vmem:[#allocation2 + $0x80] sm:$0xff]  ;;  %4272 = vst.msk [vmem:[#allocation2 + $0xa8] sm:$0xff] %vm169_vm2, %v4240_v50  ;;  %v3793_v2 = vadd.f32 %v5971_v0, %v3437_v62  ;;  %v3737_v11 = vpop.f32.mrb[139].mxu1  ;;  %v7536_v55 = vadd.f32 %v7417_v7, %v4300_v60  ;;  %v3441_v50 = vld [vmem:[#allocation2 + $0xf8] sm:$0xff]  ;;  %v3440_v62 = vld [vmem:[#allocation2 + $0xf0] sm:$0xff] }
 0x207   : > { %v7539_v36 = vadd.f32 %v7417_v7, %v4299_v31  ;;  %4271 = vst.msk [vmem:[#allocation2 + $0xa0] sm:$0xff] %vm169_vm2, %v4239_v48  ;;  %v3792_v8 = vadd.f32 %v3737_v11, %v3436_v6  ;;  %v3886_v51 = vld [vmem:[#allocation2 + $0xb8] sm:$0xff]  ;;  %v6021_v39 = vpop.f32.mrb[138].mxu0 }
 0x208   : > { %v4384_v41 = vadd.f32 %v4383_v54, %v4382_v1  ;;  %3825 = vst.msk [vmem:[#allocation2 + $0xd8] sm:$0xff] %vm169_vm2, %v3793_v2  ;;  %v4242_v57 = vadd.f32 %v6015_v18, %v3886_v51  ;;  %v3885_v52 = vld [vmem:[#allocation2 + $0xb0] sm:$0xff]  ;;  %v4190_v58 = vpop.f32.mrb[139].mxu0  ;;  %v4387_v18 = vsel %vm169_vm2, %v7536_v55, 0.0 }
 0x209   : > { %v4385_v40 = vsel %vm169_vm2, %v7539_v36, 0.0  ;;  %v4302_v44 = vld [vmem:[#allocation2 + $0x98] sm:$0xff]  ;;  %3824 = vst.msk [vmem:[#allocation2 + $0xd0] sm:$0xff] %vm169_vm2, %v3792_v8  ;;  %v4241_v35 = vadd.f32 %v4170_v61, %v3885_v52  ;;  %v5974_v56 = vpop.f32.mrb[140].mxu1 }
 0x20a   : > { %v4386_v21 = vadd.f32 %v4385_v40, %v4384_v41  ;;  %v4301_v22 = vld [vmem:[#allocation2 + $0x90] sm:$0xff]  ;;  %4274 = vst.msk [vmem:[#allocation2 + $0xb8] sm:$0xff] %vm169_vm2, %v4242_v57  ;;  %v3795_v25 = vadd.f32 %v5974_v56, %v3439_v17  ;;  %v3747_v45 = vpop.f32.mrb[141].mxu1  ;;  %v7550_v29 = vadd.f32 %v7417_v7, %v4302_v44 }
 0x20b   : > { %v7553_v30 = vadd.f32 %v7417_v7, %v4301_v22  ;;  %4273 = vst.msk [vmem:[#allocation2 + $0xb0] sm:$0xff] %vm169_vm2, %v4241_v35  ;;  %v3794_v61 = vadd.f32 %v3747_v45, %v3438_v26  ;;  %v3888_v33 = vld [vmem:[#allocation2 + $0xc8] sm:$0xff]  ;;  %v6024_v46 = vpop.f32.mrb[140].mxu0 }
 0x20c   : > { %v4388_v5 = vadd.f32 %v4387_v18, %v4386_v21  ;;  %3827 = vst.msk [vmem:[#allocation2 + $0xe8] sm:$0xff] %vm169_vm2, %v3795_v25  ;;  %v4244_v12 = vadd.f32 %v6018_v20, %v3888_v33  ;;  %v3887_v15 = vld [vmem:[#allocation2 + $0xc0] sm:$0xff]  ;;  %v4200_v9 = vpop.f32.mrb[141].mxu0  ;;  %v4391_v20 = vsel %vm169_vm2, %v7550_v29, 0.0 }
 0x20d   : > { %v4389_v16 = vsel %vm169_vm2, %v7553_v30, 0.0  ;;  %v4304_v49 = vld [vmem:[#allocation2 + $0xa8] sm:$0xff]  ;;  %3826 = vst.msk [vmem:[#allocation2 + $0xe0] sm:$0xff] %vm169_vm2, %v3794_v61  ;;  %v4243_v23 = vadd.f32 %v4180_v59, %v3887_v15  ;;  %v5977_v24 = vpop.f32.mrb[142].mxu1 }
 0x20e   : > { %v4390_v27 = vadd.f32 %v4389_v16, %v4388_v5  ;;  %v4303_v60 = vld [vmem:[#allocation2 + $0xa0] sm:$0xff]  ;;  %4276 = vst.msk [vmem:[#allocation2 + $0xc8] sm:$0xff] %vm169_vm2, %v4244_v12  ;;  %v3797_v48 = vadd.f32 %v5977_v24, %v3441_v50  ;;  %v3757_v0 = vpop.f32.mrb[143].mxu1  ;;  %v7564_v1 = vadd.f32 %v7417_v7, %v4304_v49 }
 0x20f   : > { %v7567_v31 = vadd.f32 %v7417_v7, %v4303_v60  ;;  %4275 = vst.msk [vmem:[#allocation2 + $0xc0] sm:$0xff] %vm169_vm2, %v4243_v23  ;;  %v3796_v59 = vadd.f32 %v3757_v0, %v3440_v62  ;;  %v3890_v2 = vld [vmem:[#allocation2 + $0xd8] sm:$0xff]  ;;  %v6027_v6 = vpop.f32.mrb[142].mxu0 }
 0x210   : > { %v4392_v11 = vadd.f32 %v4391_v20, %v4390_v27  ;;  %3829 = vst.msk [vmem:[#allocation2 + $0xf8] sm:$0xff] %vm169_vm2, %v3797_v48  ;;  %v4246_v54 = vadd.f32 %v6021_v39, %v3890_v2  ;;  %v3889_v8 = vld [vmem:[#allocation2 + $0xd0] sm:$0xff]  ;;  %v4210_v51 = vpop.f32.mrb[143].mxu0  ;;  %v4395_v35 = vsel %vm169_vm2, %v7564_v1, 0.0 }
 0x211   : > { %v4393_v41 = vsel %vm169_vm2, %v7567_v31, 0.0  ;;  %v4306_v57 = vld [vmem:[#allocation2 + $0xb8] sm:$0xff]  ;;  %3828 = vst.msk [vmem:[#allocation2 + $0xf0] sm:$0xff] %vm169_vm2, %v3796_v59  ;;  %v4245_v52 = vadd.f32 %v4190_v58, %v3889_v8 }
 0x212   : > { %v4394_v40 = vadd.f32 %v4393_v41, %v4392_v11  ;;  %v4305_v44 = vld [vmem:[#allocation2 + $0xb0] sm:$0xff]  ;;  %4278 = vst.msk [vmem:[#allocation2 + $0xd8] sm:$0xff] %vm169_vm2, %v4246_v54  ;;  %v7578_v17 = vadd.f32 %v7417_v7, %v4306_v57 }
 0x213   : > { %v7581_v39 = vadd.f32 %v7417_v7, %v4305_v44  ;;  %4277 = vst.msk [vmem:[#allocation2 + $0xd0] sm:$0xff] %vm169_vm2, %v4245_v52  ;;  %v3892_v56 = vld [vmem:[#allocation2 + $0xe8] sm:$0xff] }
 0x214   : > { %v4396_v21 = vadd.f32 %v4395_v35, %v4394_v40  ;;  %v4248_v22 = vadd.f32 %v6024_v46, %v3892_v56  ;;  %v3891_v25 = vld [vmem:[#allocation2 + $0xe0] sm:$0xff]  ;;  %v4399_v33 = vsel %vm169_vm2, %v7578_v17, 0.0 }
 0x215   : > { %v4397_v58 = vsel %vm169_vm2, %v7581_v39, 0.0  ;;  %v4308_v26 = vld [vmem:[#allocation2 + $0xc8] sm:$0xff]  ;;  %v4247_v45 = vadd.f32 %v4200_v9, %v3891_v25 }
 0x216   : > { %v4398_v18 = vadd.f32 %v4397_v58, %v4396_v21  ;;  %v4307_v61 = vld [vmem:[#allocation2 + $0xc0] sm:$0xff]  ;;  %4280 = vst.msk [vmem:[#allocation2 + $0xe8] sm:$0xff] %vm169_vm2, %v4248_v22  ;;  %v7590_v5 = vadd.f32 %v7417_v7, %v4308_v26 }
 0x217   : > { %v7593_v12 = vadd.f32 %v7417_v7, %v4307_v61  ;;  %4279 = vst.msk [vmem:[#allocation2 + $0xe0] sm:$0xff] %vm169_vm2, %v4247_v45  ;;  %v3894_v46 = vld [vmem:[#allocation2 + $0xf8] sm:$0xff] }
 0x218   : > { %v4400_v15 = vadd.f32 %v4399_v33, %v4398_v18  ;;  %v4250_v16 = vadd.f32 %v6027_v6, %v3894_v46  ;;  %v3893_v49 = vld [vmem:[#allocation2 + $0xf0] sm:$0xff]  ;;  %v4403_v60 = vsel %vm169_vm2, %v7590_v5, 0.0 }
 0x219   : > { %v4401_v9 = vsel %vm169_vm2, %v7593_v12, 0.0  ;;  %v4310_v23 = vld [vmem:[#allocation2 + $0xd8] sm:$0xff]  ;;  %v4249_v50 = vadd.f32 %v4210_v51, %v3893_v49 }
 0x21a   : > { %v4402_v24 = vadd.f32 %v4401_v9, %v4400_v15  ;;  %v4309_v27 = vld [vmem:[#allocation2 + $0xd0] sm:$0xff]  ;;  %4282 = vst.msk [vmem:[#allocation2 + $0xf8] sm:$0xff] %vm169_vm2, %v4250_v16  ;;  %v7602_v48 = vadd.f32 %v7417_v7, %v4310_v23 }
 0x21b   : > { %v7605_v62 = vadd.f32 %v7417_v7, %v4309_v27  ;;  %4281 = vst.msk [vmem:[#allocation2 + $0xf0] sm:$0xff] %vm169_vm2, %v4249_v50 }
 0x21c   : > { %v4404_v0 = vadd.f32 %v4403_v60, %v4402_v24  ;;  %v4407_v11 = vsel %vm169_vm2, %v7602_v48, 0.0 }
 0x21d   : > { %v4405_v20 = vsel %vm169_vm2, %v7605_v62, 0.0  ;;  %v4312_v59 = vld [vmem:[#allocation2 + $0xe8] sm:$0xff] }
 0x21e   : > { %v4406_v2 = vadd.f32 %v4405_v20, %v4404_v0  ;;  %v4311_v6 = vld [vmem:[#allocation2 + $0xe0] sm:$0xff]  ;;  %v7613_v54 = vadd.f32 %v7417_v7, %v4312_v59 }
 0x21f   : > { %v7616_v8 = vadd.f32 %v7417_v7, %v4311_v6 }
 0x220   : > { %v4408_v51 = vadd.f32 %v4407_v11, %v4406_v2  ;;  %v4411_v44 = vsel %vm169_vm2, %v7613_v54, 0.0 }
 0x221   : > { %v4409_v41 = vsel %vm169_vm2, %v7616_v8, 0.0  ;;  %v4314_v57 = vld [vmem:[#allocation2 + $0xf8] sm:$0xff] }
 0x222   : > { %v4410_v52 = vadd.f32 %v4409_v41, %v4408_v51  ;;  %v4313_v40 = vld [vmem:[#allocation2 + $0xf0] sm:$0xff]  ;;  %v7623_v35 = vadd.f32 %v7417_v7, %v4314_v57 }
 0x223   : > { %v7626_v56 = vadd.f32 %v7417_v7, %v4313_v40 }
 0x224   : > { %v4412_v21 = vadd.f32 %v4411_v44, %v4410_v52  ;;  %v4415_v58 = vsel %vm169_vm2, %v7623_v35, 0.0 }
 0x225   : > { %v4413_v22 = vsel %vm169_vm2, %v7626_v56, 0.0 }
 0x226   : > { %v4414_v25 = vadd.f32 %v4413_v22, %v4412_v21 }
 0x228   : > { %v4416_v26 = vadd.f32 %v4415_v58, %v4414_v25 }
 0x22a   : > { %v4417_v45 = vrot.slane %v4416_v26, 4 }
 0x22c   : > { %v4418_v18 = vadd.f32 %v4417_v45, %v4416_v26 }
 0x22e   : > { %v4419_v61 = vrot.slane %v4418_v18, 2 }
 0x230   : > { %v4420_v33 = vadd.f32 %v4419_v61, %v4418_v18 }
 0x232   : > { %v4421_v46 = vrot.slane %v4420_v33, 1 }
 0x234   : > { %v4422_v15 = vadd.f32 %v4421_v46, %v4420_v33 }
 0x236   : > { %v7632_v16 = vmul.f32 0.00390625, %v4422_v15 }
 0x238   : > { %v7636_v7 = vsub.f32 %v7427_v47, %v7632_v16  ;;  %v7640_v49 = vsub.f32 %v7423_v10, %v7632_v16  ;;  %v7644_v9 = vsub.f32 %v7441_v37, %v7632_v16  ;;  %v7648_v23 = vsub.f32 %v7438_v3, %v7632_v16 }
 0x239   : > { %v7656_v47 = vsub.f32 %v7455_v14, %v7632_v16  ;;  %v7662_v37 = vsub.f32 %v7452_v28, %v7632_v16  ;;  %v7670_v20 = vsub.f32 %v7469_v13, %v7632_v16  ;;  %v7677_v28 = vsub.f32 %v7466_v42, %v7632_v16 }
 0x23a   : > { %v4456_v50 = vmul.f32 %v7636_v7, %v7636_v7  ;;  %v4457_v24 = vmul.f32 %v7640_v49, %v7640_v49  ;;  %v4458_v10 = vmul.f32 %v7644_v9, %v7644_v9  ;;  %v4459_v3 = vmul.f32 %v7648_v23, %v7648_v23 }
 0x23b   : > { %v4460_v14 = vmul.f32 %v7656_v47, %v7656_v47  ;;  %v4461_v6 = vmul.f32 %v7662_v37, %v7662_v37  ;;  %v7684_v13 = vsub.f32 %v7483_v4, %v7632_v16  ;;  %v4462_v41 = vmul.f32 %v7670_v20, %v7670_v20 }
 0x23c   : > { %v4488_v27 = vsel %vm169_vm2, %v4456_v50, 0.0  ;;  %v4489_v60 = vsel %vm169_vm2, %v4457_v24, 0.0  ;;  %v4491_v59 = vsel %vm169_vm2, %v4458_v10, 0.0  ;;  %v4493_v11 = vsel %vm169_vm2, %v4459_v3, 0.0 }
 0x23d   : > { %v4490_v0 = vadd.f32 %v4489_v60, %v4488_v27  ;;  %v4495_v57 = vsel %vm169_vm2, %v4460_v14, 0.0  ;;  %v7691_v42 = vsub.f32 %v7480_v34, %v7632_v16  ;;  %v4463_v40 = vmul.f32 %v7677_v28, %v7677_v28 }
 0x23e   : > { %v4497_v44 = vsel %vm169_vm2, %v4461_v6, 0.0  ;;  %v7698_v4 = vsub.f32 %v7497_v53, %v7632_v16  ;;  %v4464_v22 = vmul.f32 %v7684_v13, %v7684_v13  ;;  %v4499_v25 = vsel %vm169_vm2, %v4462_v41, 0.0 }
 0x23f   : > { %v4492_v2 = vadd.f32 %v4491_v59, %v4490_v0  ;;  %v7705_v34 = vsub.f32 %v7494_v63, %v7632_v16  ;;  %v4465_v26 = vmul.f32 %v7691_v42, %v7691_v42  ;;  %v4501_v45 = vsel %vm169_vm2, %v4463_v40, 0.0 }
 0x240   : > { %v7712_v53 = vsub.f32 %v7511_v43, %v7632_v16  ;;  %v4466_v61 = vmul.f32 %v7698_v4, %v7698_v4  ;;  %v4503_v33 = vsel %vm169_vm2, %v4464_v22, 0.0  ;;  %v7719_v63 = vsub.f32 %v7508_v38, %v7632_v16 }
 0x241   : > { %v4494_v51 = vadd.f32 %v4493_v11, %v4492_v2  ;;  %v4467_v15 = vmul.f32 %v7705_v34, %v7705_v34  ;;  %v4505_v50 = vsel %vm169_vm2, %v4465_v26, 0.0  ;;  %v7726_v43 = vsub.f32 %v7525_v19, %v7632_v16 }
 0x242   : > { %v4468_v10 = vmul.f32 %v7712_v53, %v7712_v53  ;;  %v4507_v3 = vsel %vm169_vm2, %v4466_v61, 0.0  ;;  %v7733_v38 = vsub.f32 %v7522_v32, %v7632_v16  ;;  %v4469_v60 = vmul.f32 %v7719_v63, %v7719_v63 }
 0x243   : > { %v4496_v52 = vadd.f32 %v4495_v57, %v4494_v51  ;;  %v4509_v0 = vsel %vm169_vm2, %v4467_v15, 0.0  ;;  %v7740_v19 = vsub.f32 %v7539_v36, %v7632_v16  ;;  %v4470_v59 = vmul.f32 %v7726_v43, %v7726_v43 }
 0x244   : > { %v4511_v2 = vsel %vm169_vm2, %v4468_v10, 0.0  ;;  %v7747_v32 = vsub.f32 %v7536_v55, %v7632_v16  ;;  %v4471_v11 = vmul.f32 %v7733_v38, %v7733_v38  ;;  %v4513_v51 = vsel %vm169_vm2, %v4469_v60, 0.0 }
 0x245   : > { %v4498_v21 = vadd.f32 %v4497_v44, %v4496_v52  ;;  %v7754_v36 = vsub.f32 %v7553_v30, %v7632_v16  ;;  %v4472_v57 = vmul.f32 %v7740_v19, %v7740_v19  ;;  %v4515_v52 = vsel %vm169_vm2, %v4470_v59, 0.0 }
 0x246   : > { %v7761_v55 = vsub.f32 %v7550_v29, %v7632_v16  ;;  %v4473_v44 = vmul.f32 %v7747_v32, %v7747_v32  ;;  %v7768_v30 = vsub.f32 %v7567_v31, %v7632_v16  ;;  %v7775_v29 = vsub.f32 %v7564_v1, %v7632_v16 }
 0x247   : > { %v4500_v58 = vadd.f32 %v4499_v25, %v4498_v21  ;;  %v4517_v21 = vsel %vm169_vm2, %v4471_v11, 0.0  ;;  %v4474_v25 = vmul.f32 %v7754_v36, %v7754_v36  ;;  %v7782_v31 = vsub.f32 %v7581_v39, %v7632_v16 }
 0x248   : > { %v7789_v1 = vsub.f32 %v7578_v17, %v7632_v16  ;;  %v7796_v39 = vsub.f32 %v7593_v12, %v7632_v16  ;;  %v7803_v17 = vsub.f32 %v7590_v5, %v7632_v16  ;;  %v7810_v12 = vsub.f32 %v7605_v62, %v7632_v16 }
 0x249   : > { %v4502_v18 = vadd.f32 %v4501_v45, %v4500_v58  ;;  %v4519_v58 = vsel %vm169_vm2, %v4472_v57, 0.0  ;;  %v4475_v45 = vmul.f32 %v7761_v55, %v7761_v55  ;;  %v7817_v5 = vsub.f32 %v7602_v48, %v7632_v16 }
 0x24a   : > { %v4452_v62 = vsub.f32 %v7616_v8, %v7632_v16 }
 0x24b   : > { %v4504_v46 = vadd.f32 %v4503_v33, %v4502_v18  ;;  %v4521_v18 = vsel %vm169_vm2, %v4473_v44, 0.0  ;;  %v4476_v33 = vmul.f32 %v7768_v30, %v7768_v30  ;;  %v4483_v48 = vmul.f32 %v7817_v5, %v7817_v5 }
 0x24c   : > { %v4484_v8 = vmul.f32 %v4452_v62, %v4452_v62 }
 0x24d   : > { %v4506_v24 = vadd.f32 %v4505_v50, %v4504_v46  ;;  %v4523_v46 = vsel %vm169_vm2, %v4474_v25, 0.0  ;;  %v4477_v50 = vmul.f32 %v7775_v29, %v7775_v29 }
 0x24f   : > { %v4508_v27 = vadd.f32 %v4507_v3, %v4506_v24  ;;  %v4525_v24 = vsel %vm169_vm2, %v4475_v45, 0.0  ;;  %v4478_v3 = vmul.f32 %v7782_v31, %v7782_v31 }
 0x251   : > { %v4510_v14 = vadd.f32 %v4509_v0, %v4508_v27  ;;  %v4527_v27 = vsel %vm169_vm2, %v4476_v33, 0.0  ;;  %v4479_v0 = vmul.f32 %v7789_v1, %v7789_v1 }
 0x253   : > { %v4512_v6 = vadd.f32 %v4511_v2, %v4510_v14  ;;  %v4529_v14 = vsel %vm169_vm2, %v4477_v50, 0.0  ;;  %v4480_v2 = vmul.f32 %v7796_v39, %v7796_v39 }
 0x255   : > { %v4514_v41 = vadd.f32 %v4513_v51, %v4512_v6  ;;  %v4531_v6 = vsel %vm169_vm2, %v4478_v3, 0.0  ;;  %v4481_v51 = vmul.f32 %v7803_v17, %v7803_v17 }
 0x257   : > { %v4516_v40 = vadd.f32 %v4515_v52, %v4514_v41  ;;  %v4533_v41 = vsel %vm169_vm2, %v4479_v0, 0.0  ;;  %v4482_v52 = vmul.f32 %v7810_v12, %v7810_v12 }
 0x259   : > { %v4518_v22 = vadd.f32 %v4517_v21, %v4516_v40  ;;  %v4535_v40 = vsel %vm169_vm2, %v4480_v2, 0.0  ;;  %v7829_v21 = vsub.f32 %v7613_v54, %v7632_v16 }
 0x25b   : > { %v4520_v26 = vadd.f32 %v4519_v58, %v4518_v22  ;;  %v4537_v22 = vsel %vm169_vm2, %v4481_v51, 0.0  ;;  %v4454_v58 = vsub.f32 %v7626_v56, %v7632_v16  ;;  %v4485_v54 = vmul.f32 %v7829_v21, %v7829_v21 }
 0x25d   : > { %v4522_v61 = vadd.f32 %v4521_v18, %v4520_v26  ;;  %v4539_v26 = vsel %vm169_vm2, %v4482_v52, 0.0  ;;  %v4455_v18 = vsub.f32 %v7623_v35, %v7632_v16  ;;  %v4545_v56 = vsel %vm169_vm2, %v4485_v54, 0.0 }
 0x25f   : > { %v4524_v15 = vadd.f32 %v4523_v46, %v4522_v61  ;;  %v4541_v61 = vsel %vm169_vm2, %v4483_v48, 0.0  ;;  %v4486_v46 = vmul.f32 %v4454_v58, %v4454_v58 }
 0x261   : > { %v4526_v10 = vadd.f32 %v4525_v24, %v4524_v15  ;;  %v4543_v15 = vsel %vm169_vm2, %v4484_v8, 0.0  ;;  %v4487_v24 = vmul.f32 %v4455_v18, %v4455_v18  ;;  %v4547_v3 = vsel %vm169_vm2, %v4486_v46, 0.0 }
 0x263   : > { %v4528_v60 = vadd.f32 %v4527_v27, %v4526_v10 }
 0x265   : > { %v4530_v59 = vadd.f32 %v4529_v14, %v4528_v60  ;;  %v4549_v60 = vsel %vm169_vm2, %v4487_v24, 0.0 }
 0x267   : > { %v4532_v11 = vadd.f32 %v4531_v6, %v4530_v59 }
 0x269   : > { %v4534_v57 = vadd.f32 %v4533_v41, %v4532_v11 }
 0x26b   : > { %v4536_v44 = vadd.f32 %v4535_v40, %v4534_v57 }
 0x26d   : > { %v4538_v25 = vadd.f32 %v4537_v22, %v4536_v44 }
 0x26f   : > { %v4540_v45 = vadd.f32 %v4539_v26, %v4538_v25 }
 0x271   : > { %v4542_v33 = vadd.f32 %v4541_v61, %v4540_v45 }
 0x273   : > { %v4544_v50 = vadd.f32 %v4543_v15, %v4542_v33 }
 0x275   : > { %v4546_v10 = vadd.f32 %v4545_v56, %v4544_v50 }
 0x277   : > { %v4548_v27 = vadd.f32 %v4547_v3, %v4546_v10 }
 0x279   : > { %v4550_v35 = vadd.f32 %v4549_v60, %v4548_v27 }
 0x27b   : > { %v4551_v16 = vrot.slane %v4550_v35, 4 }
 0x27d   : > { %v4552_v0 = vadd.f32 %v4551_v16, %v4550_v35 }
 0x27f   : > { %v4553_v14 = vrot.slane %v4552_v0, 2 }
 0x281   : > { %v4554_v59 = vadd.f32 %v4553_v14, %v4552_v0 }
 0x283   : > { %v4555_v2 = vrot.slane %v4554_v59, 1 }
 0x285   : > { %v4556_v6 = vadd.f32 %v4555_v2, %v4554_v59 }
 0x287   : > { %v4557_v11 = vmul.f32 0.00390625, %v4556_v6 }
 0x289   : > { %v4558_v51 = vadd.f32 1e-05, %v4557_v11 }
 0x28b   : > { %6073 = vrsqrt.f32 %v4558_v51 }
 0x295   : > { %v6074_v41 = vpop.eup %6073 }
 0x296   : > { %v4588_v57 = vmul.f32 %v6074_v41, %v4452_v62  ;;  %v4590_v52 = vmul.f32 %v6074_v41, %v4454_v58  ;;  %v7847_v40 = vmul.f32 %v6074_v41, %v7636_v7  ;;  %v7850_v44 = vmul.f32 %v6074_v41, %v7640_v49 }
 0x297   : > { %v7853_v48 = vmul.f32 %v6074_v41, %v7644_v9  ;;  %v7856_v22 = vmul.f32 %v6074_v41, %v7648_v23  ;;  %v7859_v25 = vmul.f32 %v6074_v41, %v7656_v47  ;;  %v7862_v8 = vmul.f32 %v6074_v41, %v7662_v37 }
 0x298   : > { %v4620_v62 = vmax.f32 %v4588_v57, 0.0  ;;  %v4622_v58 = vmax.f32 %v4590_v52, 0.0  ;;  %v4566_v7 = vmul.f32 %v6074_v41, %v7670_v20  ;;  %v4567_v26 = vmul.f32 %v6074_v41, %v7677_v28 }
 0x299   : > { %v4568_v49 = vmul.f32 %v6074_v41, %v7684_v13  ;;  %v4569_v9 = vmul.f32 %v6074_v41, %v7691_v42  ;;  %v4570_v45 = vmul.f32 %v6074_v41, %v7698_v4  ;;  %v4571_v23 = vmul.f32 %v6074_v41, %v7705_v34 }
 0x29a   : > { %v4638_v54 = vmax.f32 %v4620_v62, %v4622_v58  ;;  %v4572_v47 = vmul.f32 %v6074_v41, %v7712_v53  ;;  %v4573_v37 = vmul.f32 %v6074_v41, %v7719_v63  ;;  %v4574_v61 = vmul.f32 %v6074_v41, %v7726_v43 }
 0x29b   : > { %v4575_v33 = vmul.f32 %v6074_v41, %v7733_v38  ;;  %v4576_v20 = vmul.f32 %v6074_v41, %v7740_v19  ;;  %v4577_v28 = vmul.f32 %v6074_v41, %v7747_v32  ;;  %v4578_v13 = vmul.f32 %v6074_v41, %v7754_v36 }
 0x29c   : > { %4654 = vst.msk [vmem:[#allocation3 + $0x70] sm:$0xff] %vm169_vm2, %v4638_v54  ;;  %v4579_v42 = vmul.f32 %v6074_v41, %v7761_v55  ;;  %v4580_v4 = vmul.f32 %v6074_v41, %v7768_v30  ;;  %v4581_v34 = vmul.f32 %v6074_v41, %v7775_v29  ;;  %v4582_v53 = vmul.f32 %v6074_v41, %v7782_v31 }
 0x29d   : > { %v4583_v63 = vmul.f32 %v6074_v41, %v7789_v1  ;;  %v4584_v43 = vmul.f32 %v6074_v41, %v7796_v39  ;;  %v4585_v38 = vmul.f32 %v6074_v41, %v7803_v17  ;;  %v4586_v19 = vmul.f32 %v6074_v41, %v7810_v12 }
 0x29e   : > { %v4587_v32 = vmul.f32 %v6074_v41, %v7817_v5  ;;  %v4589_v36 = vmul.f32 %v6074_v41, %v7829_v21  ;;  %v4591_v46 = vmul.f32 %v6074_v41, %v4455_v18  ;;  %v4592_v55 = vmax.f32 %v7847_v40, 0.0 }
 0x29f   : > { %v4593_v30 = vmax.f32 %v7850_v44, 0.0  ;;  %v4594_v29 = vmax.f32 %v7853_v48, 0.0  ;;  %v4595_v31 = vmax.f32 %v7856_v22, 0.0  ;;  %v4596_v1 = vmax.f32 %v7859_v25, 0.0 }
 0x2a0   : > { %v4597_v39 = vmax.f32 %v7862_v8, 0.0  ;;  %v4598_v17 = vmax.f32 %v4566_v7, 0.0  ;;  %v4599_v15 = vmax.f32 %v4567_v26, 0.0  ;;  %v4600_v12 = vmax.f32 %v4568_v49, 0.0 }
 0x2a1   : > { %v4601_v50 = vmax.f32 %v4569_v9, 0.0  ;;  %v4602_v5 = vmax.f32 %v4570_v45, 0.0  ;;  %v4603_v24 = vmax.f32 %v4571_v23, 0.0  ;;  %v4604_v21 = vmax.f32 %v4572_v47, 0.0 }
 0x2a2   : > { %v4605_v18 = vmax.f32 %v4573_v37, 0.0  ;;  %v4606_v56 = vmax.f32 %v4574_v61, 0.0  ;;  %v4607_v10 = vmax.f32 %v4575_v33, 0.0  ;;  %v4608_v3 = vmax.f32 %v4576_v20, 0.0 }
 0x2a3   : > { %v4609_v27 = vmax.f32 %v4577_v28, 0.0  ;;  %v4610_v60 = vmax.f32 %v4578_v13, 0.0  ;;  %v4611_v35 = vmax.f32 %v4579_v42, 0.0  ;;  %v4612_v16 = vmax.f32 %v4580_v4, 0.0 }
 0x2a4   : > { %v4613_v0 = vmax.f32 %v4581_v34, 0.0  ;;  %v4614_v14 = vmax.f32 %v4582_v53, 0.0  ;;  %v4615_v59 = vmax.f32 %v4583_v63, 0.0  ;;  %v4616_v2 = vmax.f32 %v4584_v43, 0.0 }
 0x2a5   : > { %v4617_v6 = vmax.f32 %v4585_v38, 0.0  ;;  %v4618_v11 = vmax.f32 %v4586_v19, 0.0  ;;  %v4619_v51 = vmax.f32 %v4587_v32, 0.0  ;;  %v4621_v41 = vmax.f32 %v4589_v36, 0.0 }
 0x2a6   : > { %v4623_v57 = vmax.f32 %v4591_v46, 0.0  ;;  %v4624_v52 = vmax.f32 %v4592_v55, %v4594_v29  ;;  %v4625_v40 = vmax.f32 %v4593_v30, %v4595_v31  ;;  %v4626_v44 = vmax.f32 %v4596_v1, %v4598_v17 }
 0x2a7   : > { %v4627_v48 = vmax.f32 %v4597_v39, %v4599_v15  ;;  %v4628_v22 = vmax.f32 %v4600_v12, %v4602_v5  ;;  %v4629_v25 = vmax.f32 %v4601_v50, %v4603_v24  ;;  %v4630_v8 = vmax.f32 %v4604_v21, %v4606_v56 }
 0x2a8   : > { %v4631_v62 = vmax.f32 %v4605_v18, %v4607_v10  ;;  %v4632_v58 = vmax.f32 %v4608_v3, %v4610_v60  ;;  %v4633_v7 = vmax.f32 %v4609_v27, %v4611_v35  ;;  %v4634_v26 = vmax.f32 %v4612_v16, %v4614_v14  ;;  %4640 = vst.msk [vmem:[#allocation3] sm:$0xff] %vm169_vm2, %v4624_v52 }
 0x2a9   : > { %4641 = vst.msk [vmem:[#allocation3 + $0x8] sm:$0xff] %vm169_vm2, %v4625_v40  ;;  %4642 = vst.msk [vmem:[#allocation3 + $0x10] sm:$0xff] %vm169_vm2, %v4626_v44  ;;  %v4635_v49 = vmax.f32 %v4613_v0, %v4615_v59  ;;  %v4636_v9 = vmax.f32 %v4616_v2, %v4618_v11  ;;  %v4637_v45 = vmax.f32 %v4617_v6, %v4619_v51 }
 0x2aa   : > { %v4639_v23 = vmax.f32 %v4621_v41, %v4623_v57  ;;  %4643 = vst.msk [vmem:[#allocation3 + $0x18] sm:$0xff] %vm169_vm2, %v4627_v48  ;;  %4644 = vst.msk [vmem:[#allocation3 + $0x20] sm:$0xff] %vm169_vm2, %v4628_v22 }
 0x2ab   : > { %4645 = vst.msk [vmem:[#allocation3 + $0x28] sm:$0xff] %vm169_vm2, %v4629_v25  ;;  %4646 = vst.msk [vmem:[#allocation3 + $0x30] sm:$0xff] %vm169_vm2, %v4630_v8 }
 0x2ac   : > { %4647 = vst.msk [vmem:[#allocation3 + $0x38] sm:$0xff] %vm169_vm2, %v4631_v62  ;;  %4648 = vst.msk [vmem:[#allocation3 + $0x40] sm:$0xff] %vm169_vm2, %v4632_v58 }
 0x2ad   : > { %4649 = vst.msk [vmem:[#allocation3 + $0x48] sm:$0xff] %vm169_vm2, %v4633_v7  ;;  %4650 = vst.msk [vmem:[#allocation3 + $0x50] sm:$0xff] %vm169_vm2, %v4634_v26 }
 0x2ae   : > { %4651 = vst.msk [vmem:[#allocation3 + $0x58] sm:$0xff] %vm169_vm2, %v4635_v49  ;;  %4652 = vst.msk [vmem:[#allocation3 + $0x60] sm:$0xff] %vm169_vm2, %v4636_v9 }
 0x2af   : > { %4653 = vst.msk [vmem:[#allocation3 + $0x68] sm:$0xff] %vm169_vm2, %v4637_v45  ;;  %4655 = vst.msk [vmem:[#allocation3 + $0x78] sm:$0xff] %vm169_vm2, %v4639_v23 }
 0x2b0   : > { %v4656_v54 = vld [vmem:[#allocation3] ss:$2 sm:$0xff]  ;;  %v4672_v47 = vld [vmem:[#allocation3 + $0x1] ss:$2 sm:$0xff] }
 0x2b1   : > { %v4658_v37 = vld [vmem:[#allocation3 + $0x10] ss:$2 sm:$0xff]  ;;  %v4674_v33 = vld [vmem:[#allocation3 + $0x11] ss:$2 sm:$0xff]  ;;  %v4687_v20 = vmax.f32 %v4656_v54, %v4672_v47 }
 0x2b2   : > { %v4660_v61 = vld [vmem:[#allocation3 + $0x20] ss:$2 sm:$0xff]  ;;  %v4676_v42 = vld [vmem:[#allocation3 + $0x21] ss:$2 sm:$0xff]  ;;  %v4688_v4 = vmax.f32 %v4658_v37, %v4674_v33 }
 0x2b3   : > { %v4662_v28 = vld [vmem:[#allocation3 + $0x30] ss:$2 sm:$0xff]  ;;  %v4689_v43 = vmax.f32 %v4660_v61, %v4676_v42  ;;  %4695 = vst.msk [vmem:[%s7913_s7] sm:$0xff] %vm169_vm2, %v4687_v20  ;;  %v4678_v38 = vld [vmem:[#allocation3 + $0x31] ss:$2 sm:$0xff] }
 0x2b4   : > { %v4664_v13 = vld [vmem:[#allocation3 + $0x40] ss:$2 sm:$0xff]  ;;  %v4680_v19 = vld [vmem:[#allocation3 + $0x41] ss:$2 sm:$0xff]  ;;  %4696 = vst.msk [vmem:[%s7913_s7 + $0x8] sm:$0xff] %vm169_vm2, %v4688_v4  ;;  %v4690_v55 = vmax.f32 %v4662_v28, %v4678_v38 }
 0x2b5   : > { %v4666_v34 = vld [vmem:[#allocation3 + $0x50] ss:$2 sm:$0xff]  ;;  %v4682_v32 = vld [vmem:[#allocation3 + $0x51] ss:$2 sm:$0xff]  ;;  %v4691_v30 = vmax.f32 %v4664_v13, %v4680_v19  ;;  %4697 = vst.msk [vmem:[%s7913_s7 + $0x10] sm:$0xff] %vm169_vm2, %v4689_v43 }
 0x2b6   : > { %v4668_v53 = vld [vmem:[#allocation3 + $0x60] ss:$2 sm:$0xff]  ;;  %v4670_v63 = vld [vmem:[#allocation3 + $0x70] ss:$2 sm:$0xff]  ;;  %v4684_v36 = vld [vmem:[#allocation3 + $0x61] ss:$2 sm:$0xff]  ;;  %v4692_v29 = vmax.f32 %v4666_v34, %v4682_v32 }
 0x2b7   : > { %v4686_v46 = vld [vmem:[#allocation3 + $0x71] ss:$2 sm:$0xff]  ;;  %v4693_v31 = vmax.f32 %v4668_v53, %v4684_v36  ;;  %4698 = vst.msk [vmem:[%s7913_s7 + $0x18] sm:$0xff] %vm169_vm2, %v4690_v55  ;;  %4699 = vst.msk [vmem:[%s7913_s7 + $0x20] sm:$0xff] %vm169_vm2, %v4691_v30 }
 0x2b8   : > { %v4694_v1 = vmax.f32 %v4670_v63, %v4686_v46  ;;  %4700 = vst.msk [vmem:[%s7913_s7 + $0x28] sm:$0xff] %vm169_vm2, %v4692_v29 }
 0x2b9   : > { %4701 = vst.msk [vmem:[%s7913_s7 + $0x30] sm:$0xff] %vm169_vm2, %v4693_v31 }
 0x2ba   : > { %4702 = vst.msk [vmem:[%s7913_s7 + $0x38] sm:$0xff] %vm169_vm2, %v4694_v1 }
 0x2bb   : > { %6088 = shalt.err (!%p6085_p3)
}
 0x2bc   : > { %s6089_s25 = scalar_lea.hbm %s7925_s10, 1024  ;;  %s6093_s28 = scalar_lea.hbm %s7985_s3, 2048 }
 0x2bd   : > { %p6090_p4 = scmp.ne.s32.totalorder %s7925_s10, %s6089_s25  ;;  %p6094_p9 = scmp.lt.u32.totalorder %s7925_s10, %s7985_s3 }
 0x2be   : > { %p6095_p10 = scmp.lt.u32.totalorder %s6093_s28, %s6089_s25  ;;  %p6097_p12 = scmp.lt.u32.totalorder %s6089_s25, %s7925_s10 }
 0x2bf   : > { %p6091_p7 = pnand %p6090_p4, %p6201_p5 }
 0x2c0   : > { %p6096_p11 = por %p6095_p10, %p6094_p9 }
 0x2c1   : > { %p6092_p8 = pneg %p6091_p7 }
 0x2c2   : > { %p6098_p13 = por %p6097_p12, %p6096_p11 }
 0x2c4   : > { %p6099_p0 = pnand %p6098_p13, %p6092_p8 }
 0x2c6   : > { %6102 = shalt.err (!%p6099_p0)
}
 0x2c7   : > { %s6141_s4 = smov 128   ;;  %s6142_s5 = smov 8  }
 0x2c8   : > { %6031 = dma.vmem_to_hbm [thread:$0]  (%p6201_p5), %s7927_s8, 1024, %s7925_s10, %s7941_s11, %s6141_s4, %s6141_s4, %s6142_s5  }
 0x2c9 PF: > { %p6037_p1 = scmp.ge.s32.totalorder %s6137_s15, 2  ;;  %s4732_s6 = sand.u32 1, %s6125_s12  }
 0x2ca   : > { %s4733_s7 = scalar_lea.sflag [#allocation5], %s4732_s6 }
 0x2cb   : > { %p6034_p2 = pnand %p6037_p1, %p6205_p6 }
 0x2cd   : > { %6120 = dma.done.wait (!%p6034_p2), %s4733_s7, 1024  }
 0x2ce   : > { %6122 = vsyncadd (!%p6034_p2), %s4733_s7, 4294966272  ;;  %p13_p3 = scmp.ge.s32.totalorder %s6188_s18, 4   ;;  %s8081_s12 = smov %s6129_s13 }
 0x2cf   : > { %s8082_s13 = smov %s6133_s14  ;;  %s8083_s14 = smov %s6199_s21 }
 0x2d0   : > { %s8084_s15 = smov %s6188_s18  ;;  %15 = sbr.rel (!%p13_p3) target bundleno = 3 (0x3), region = 84 }
 0x2d7   :  { %4738 = vsyncpa [#allocation5], 1 }
 0x2d8   :  { %4740 = vsyncpa [#allocation5 + $0x1], 1 }

</bundles_post_ra>
